<compile_context>
chip_gen: v5e
topology: v5e:2x2
jax: 0.10.0
libtpu: 0.0.40
codegen_flags: <defaults>
</compile_context>

<pallas_src>
import functools
from typing import NamedTuple

import jax
import jax.numpy as jnp
from jax import lax
from jax.experimental import pallas as pl
from jax.experimental.pallas import tpu as pltpu


def _elu(z):
    # ELU(alpha=1): z>0 ? z : exp(z)-1 ; clamp exp arg so the unselected branch stays finite.
    return jnp.where(z > 0, z, jnp.exp(jnp.minimum(z, 0.0)) - 1.0)


def eegnet_kernel(x_ref, wsp_ref, toep_ref, sh2_ref, pool1_ref,
                  wp_ref, sh3_ref, pool2t_ref, o_ref, u_ref):
    # x_ref     : (B*H, T_pad)        rows = (batch, eeg-channel), cols = padded time
    # wsp_ref   : (C2*B, B*H)         block-diag-over-batch spatial weights (bn2 scale folded)
    # toep_ref  : (F1, T_pad, T1u)    per-group temporal Toeplitz (bn1 scale folded), T1u = T2*4
    # sh2_ref   : (C2*B, 1)           bn2 shift (+ propagated bn1 shift), rows = (c, b)
    # pool1_ref : (T1u, T2)           avg-pool (1,4) matrix
    # wp_ref    : (F1, B*F2, D*B)     block-diag-over-batch pointwise weights (bn3 scale folded)
    # sh3_ref   : (B*F2, 1)           bn3 shift, rows = (b, j)
    # pool2t_ref: (T3, T2)            avg-pool (1,8) matrix, pre-transposed
    # o_ref     : (T3, B*F2)          lane-dense transposed output
    # u_ref     : (C2*B, T_pad)       VMEM scratch staging the spatial-conv result
    f1 = toep_ref.shape[0]

    # conv_spatial (+ bn2 scale), batch kept separate via block-diagonal weight.
    # Staged in VMEM scratch so per-group slices below are aligned vlds, not spills.
    u_ref[...] = jnp.dot(wsp_ref[...], x_ref[...],
                         preferred_element_type=jnp.float32)   # (C2*B, T_pad), rows (c, b)
    db = u_ref.shape[0] // f1                                   # rows per filter group = D*B

    sh2 = sh2_ref[...]
    pool1 = pool1_ref[...]
    bf2 = wp_ref.shape[1]
    t2 = pool1.shape[1]
    q = jnp.zeros((bf2, t2), jnp.float32)                       # pointwise-conv accumulator

    for f in range(f1):                                         # static, F1 small
        u_f = u_ref[f * db:(f + 1) * db, :]                     # (D*B, T_pad)  sublane-aligned
        # conv_temporal for group f: Toeplitz matmul over time (trimmed to T1u lanes)
        z = jnp.dot(u_f, toep_ref[f],
                    preferred_element_type=jnp.float32)         # (D*B, T1u)
        z = z + sh2[f * db:(f + 1) * db, :]                     # bn2 (+ propagated bn1) shift
        z = _elu(z)                                             # activation1
        p = jnp.dot(z, pool1,
                    preferred_element_type=jnp.float32)         # average_pool_2d_1 -> (D*B, T2)
        # dropout: inference identity
        # TODO(synk): training-mode dropout (random mask + rescale) not implemented.
        q = q + jnp.dot(wp_ref[f], p,
                        preferred_element_type=jnp.float32)     # conv_separable_point accumulate

    q = q + sh3_ref[...]                                        # bn3 shift
    q = _elu(q)                                                 # activation2
    # average_pool_2d_2, emitted transposed for a lane-dense store:
    # out.T = pool2.T @ q.T  -> (T3, B*F2).  q.T is an aligned (x8, x128) XLU transpose.
    out_t = jnp.dot(pool2t_ref[...], q.T, preferred_element_type=jnp.float32)
    o_ref[...] = out_t.astype(o_ref.dtype)


def _bn_fold(gamma, beta, mean, var, eps=1e-5):
    scale = (gamma / jnp.sqrt(var + eps)).astype(jnp.float32)
    shift = (beta - mean * scale).astype(jnp.float32)
    return scale, shift


class _Cfg(NamedTuple):
    b_tile: int
    grid: int
    f1: int
    d: int
    f2: int
    h: int
    pad: int
    t_pad: int
    t1u: int   # trimmed temporal-conv length (= t2 * 4)
    t2: int
    t3: int


def _pick_tiling(n, h, f2):
    """grid=2 (one batch tile per TensorCore) only on dual-TC chips (v7x);
    single-TC v5e/v6e: grid=1 -> one big matmul, no extra per-step overhead."""
    dual_tc = False
    try:
        kind = jax.devices()[0].device_kind.lower()
        dual_tc = 'v7' in kind
    except Exception:
        pass
    if dual_tc and n % 2 == 0:
        bt = n // 2
        if (bt * h) % 8 == 0 and (bt * f2) % 8 == 0:
            return bt, 2
    return n, 1


def eegnet_prepare(params, *, batch, channel_size, t_samples, b_tile=None):
    """Build all constant kernel operands once per parameter set (hoisted preprocessing)."""
    n, h, t = batch, channel_size, t_samples

    wt = params['conv_temporal_w'].astype(jnp.float32)     # (F1, 1, 1, K)
    ws = params['conv_spatial_w'].astype(jnp.float32)      # (F1*D, 1, H, 1)
    wp = params['conv_point_w'].astype(jnp.float32)        # (F2, F1*D, 1, 1)
    f1, _, _, k_sz = wt.shape
    c2 = ws.shape[0]
    d = c2 // f1
    f2 = wp.shape[0]
    pad = k_sz // 2

    t_pad = t + 2 * pad
    t1 = t_pad - k_sz + 1          # conv_temporal output length ("same"-ish for even K)
    t2 = t1 // 4
    t1u = t2 * 4                   # trimmed: columns >= t1u never survive floor pooling
    t3 = t2 // 8
    assert t2 >= 1 and t3 >= 1

    if b_tile is None:
        b_tile, grid = _pick_tiling(n, h, f2)
    else:
        assert n % b_tile == 0
        grid = n // b_tile
    if grid > 1:
        assert (b_tile * h) % 8 == 0 and (b_tile * f2) % 8 == 0

    # ---- fold BatchNorms (inference) into adjacent linear ops ----
    s1, sh1 = _bn_fold(*params['bn1'])
    s2, sh2 = _bn_fold(*params['bn2'])
    s3, sh3 = _bn_fold(*params['bn3'])

    wt2 = wt.reshape(f1, k_sz)
    ws2 = ws.reshape(c2, h)
    wp2 = wp.reshape(f2, c2)
    grp = jnp.arange(c2) // d                       # output channel -> group map

    wt_eff = wt2 * s1[:, None]                      # bn1 scale -> temporal filters
    ws_eff = ws2 * s2[:, None]                      # bn2 scale -> spatial weights
    wp_eff = wp2 * s3[:, None]                      # bn3 scale -> pointwise weights
    shift2 = s2 * sh1[grp] * ws2.sum(axis=1) + sh2  # bn1 shift pushed through spatial conv
    shift3 = sh3

    # ---- per-group Toeplitz matrices for the temporal conv (time = contraction axis) ----
    # Output axis trimmed to t1u = t2*4 lanes (exact: floor pooling discards the rest).
    tau = jnp.arange(t_pad)[:, None]
    tt = jnp.arange(t1u)[None, :]
    kk = tau - tt
    valid = (kk >= 0) & (kk < k_sz)
    toep = jnp.where(valid[None], wt_eff[:, jnp.clip(kk, 0, k_sz - 1)], 0.0)  # (F1,T_pad,T1u)

    # ---- average-pool matrices (floor mode) ----
    def pool_mat(t_in, k, t_out):
        r = jnp.arange(t_in)[:, None] // k
        c = jnp.arange(t_out)[None, :]
        return jnp.where(r == c, 1.0 / k, 0.0).astype(jnp.float32)

    pool1 = pool_mat(t1u, 4, t2)                    # (T1u, T2)
    pool2_t = pool_mat(t2, 8, t3).T                 # (T3, T2) pre-transposed for lane-dense out

    # ---- block-diagonal (over the batch tile) spatial / pointwise weights ----
    # NOTE(v7x): wsp_blk grows O(b_tile^2); if batch is ever scaled up, cap b_tile (<=64)
    # and/or single-buffer the grid-invariant weight inputs (pipeline_mode=pl.Buffered(1)).
    eye_b = jnp.eye(b_tile, dtype=jnp.float32)
    # rows (c, b), cols (b, h)
    wsp_blk = jnp.einsum('ch,bB->cbBh', ws_eff, eye_b).reshape(c2 * b_tile, b_tile * h)
    # rows (b, j), cols (d, b), one slab per group f
    wp3 = wp_eff.reshape(f2, f1, d)
    wp_blk = jnp.einsum('jfd,bB->fbjdB', wp3, eye_b).reshape(f1, b_tile * f2, d * b_tile)
    sh2_rep = jnp.repeat(shift2, b_tile).reshape(c2 * b_tile, 1)   # row = c*B + b
    sh3_rep = jnp.tile(shift3, b_tile).reshape(b_tile * f2, 1)     # row = b*F2 + j

    operands = (wsp_blk, toep, sh2_rep, pool1, wp_blk, sh3_rep, pool2_t)
    cfg = _Cfg(b_tile, grid, f1, d, f2, h, pad, t_pad, t1u, t2, t3)
    return operands, cfg


@functools.partial(jax.jit, static_argnums=(2,))
def eegnet_forward_prepared(x, operands, cfg):
    """x: (N, 1, channel_size, T) float32 (NCHW, like PyTorch). Returns (N, F2, 1, T3)."""
    n, cin, h, _ = x.shape
    assert cin == 1 and h == cfg.h
    (wsp_blk, toep, sh2_rep, pool1, wp_blk, sh3_rep, pool2_t) = operands
    b_tile, grid = cfg.b_tile, cfg.grid
    f1, d, f2 = cfg.f1, cfg.d, cfg.f2
    c2 = f1 * d
    pad, t_pad, t1u, t2, t3 = cfg.pad, cfg.t_pad, cfg.t1u, cfg.t2, cfg.t3

    # ---- input glue: drop channel dim, zero-pad time, rows = (batch, eeg-channel) ----
    x2 = jnp.pad(x[:, 0].astype(jnp.float32), ((0, 0), (0, 0), (pad, pad)))
    x2 = x2.reshape(n * h, t_pad)

    # Operands stay f32 (MXU f32 accumulation) to keep <1e-3 parity with the f32 reference;
    # cast them to bf16 here if a looser tolerance is acceptable — the kernel is
    # overhead-bound at these sizes either way.
    out_t = pl.pallas_call(
        eegnet_kernel,
        out_shape=jax.ShapeDtypeStruct((t3, n * f2), jnp.float32),
        grid=(grid,),
        in_specs=[
            pl.BlockSpec((b_tile * h, t_pad), lambda i: (i, 0)),           # x (per batch tile)
            pl.BlockSpec((c2 * b_tile, b_tile * h), lambda i: (0, 0)),     # spatial block-diag
            pl.BlockSpec((f1, t_pad, t1u), lambda i: (0, 0, 0)),           # temporal Toeplitz
            pl.BlockSpec((c2 * b_tile, 1), lambda i: (0, 0)),              # bn2 shift
            pl.BlockSpec((t1u, t2), lambda i: (0, 0)),                     # pool (1,4)
            pl.BlockSpec((f1, b_tile * f2, d * b_tile), lambda i: (0, 0, 0)),  # pointwise blkdiag
            pl.BlockSpec((b_tile * f2, 1), lambda i: (0, 0)),              # bn3 shift
            pl.BlockSpec((t3, t2), lambda i: (0, 0)),                      # pool (1,8), transposed
        ],
        out_specs=pl.BlockSpec((t3, b_tile * f2), lambda i: (0, i)),       # lane-dense output
        scratch_shapes=[pltpu.VMEM((c2 * b_tile, t_pad), jnp.float32)],    # spatial-conv staging
        compiler_params=pltpu.CompilerParams(
            dimension_semantics=("parallel",) if grid > 1 else ("arbitrary",)),
    )(x2, wsp_blk, toep, sh2_rep, pool1, wp_blk, sh3_rep, pool2_t)

    # out_t cols are (batch, F2); transpose back -> PyTorch NCHW (H collapsed to 1).
    return jnp.transpose(out_t).reshape(n, f2, 1, t3)


def eegnet_forward(x, params, b_tile=None):
    """Convenience one-shot path (prepare + forward). Prefer calling eegnet_prepare once
    per parameter set and reusing the operands across forward calls."""
    n, cin, h, t = x.shape
    assert cin == 1
    operands, cfg = eegnet_prepare(params, batch=n, channel_size=h, t_samples=t,
                                   b_tile=b_tile)
    return eegnet_forward_prepared(x, operands, cfg)


def eegnet_reference(x, params):
    """Pure-JAX (XLA) reference mirroring the PyTorch forward (eval mode)."""
    wt = params['conv_temporal_w']
    f1 = wt.shape[0]
    k_sz = wt.shape[-1]
    pad = k_sz // 2

    def bn(z, gamma, beta, mean, var, eps=1e-5):
        s = gamma / jnp.sqrt(var + eps)
        return z * s[None, :, None, None] + (beta - mean * s)[None, :, None, None]

    y = lax.conv_general_dilated(x, wt, (1, 1), [(0, 0), (pad, pad)],
                                 dimension_numbers=('NCHW', 'OIHW', 'NCHW'))
    y = bn(y, *params['bn1'])
    y = lax.conv_general_dilated(y, params['conv_spatial_w'], (1, 1),
                                 [(0, 0), (0, 0)],
                                 dimension_numbers=('NCHW', 'OIHW', 'NCHW'),
                                 feature_group_count=f1)
    y = bn(y, *params['bn2'])
    y = jnp.where(y > 0, y, jnp.exp(jnp.minimum(y, 0.0)) - 1.0)
    n, c, hh, tt = y.shape
    t2 = tt // 4
    y = y[..., :t2 * 4].reshape(n, c, hh, t2, 4).mean(-1)
    y = lax.conv_general_dilated(y, params['conv_point_w'], (1, 1),
                                 [(0, 0), (0, 0)],
                                 dimension_numbers=('NCHW', 'OIHW', 'NCHW'))
    y = bn(y, *params['bn3'])
    y = jnp.where(y > 0, y, jnp.exp(jnp.minimum(y, 0.0)) - 1.0)
    n, c, hh, tt = y.shape
    t3 = tt // 8
    y = y[..., :t3 * 8].reshape(n, c, hh, t3, 8).mean(-1)
    return y


if __name__ == "__main__":
    # EEGNet hyperparameters (small, consistent with the module's __init__)
    f1, d, f2 = 4, 2, 8
    channel_size = 8
    sampling_rate = 32        # -> temporal kernel = 16, padding = 8
    t_samples = 128
    batch = 32                # batch folded onto sublanes
    # dropout_rate = 0.25 (inference identity), classes = 2 (unused in forward)

    c2 = f1 * d
    half = sampling_rate // 2

    key = jax.random.PRNGKey(0)
    k0, k1, k2, k3 = jax.random.split(key, 4)

    def bn_params(c, off):
        return (1.0 + 0.10 * jnp.arange(c, dtype=jnp.float32),          # gamma
                0.05 * jnp.arange(c, dtype=jnp.float32) + off,          # beta
                0.02 * jnp.arange(c, dtype=jnp.float32) - 0.01,         # running_mean
                1.0 + 0.05 * jnp.arange(c, dtype=jnp.float32))          # running_var

    params = {
        'conv_temporal_w': 0.1 * jax.random.normal(k0, (f1, 1, 1, half), jnp.float32),
        'conv_spatial_w':  0.1 * jax.random.normal(k1, (c2, 1, channel_size, 1), jnp.float32),
        'conv_point_w':    0.1 * jax.random.normal(k2, (f2, c2, 1, 1), jnp.float32),
        'bn1': bn_params(f1, 0.00),
        'bn2': bn_params(c2, 0.01),
        'bn3': bn_params(f2, -0.02),
    }

    x = jax.random.normal(k3, (batch, 1, channel_size, t_samples), jnp.float32)

    # Hoisted preprocessing: computed once per parameter set, reused across forward calls.
    operands, cfg = eegnet_prepare(params, batch=batch, channel_size=channel_size,
                                   t_samples=t_samples)
    out = jax.block_until_ready(eegnet_forward_prepared(x, operands, cfg))
    ref = jax.block_until_ready(eegnet_reference(x, params))

    assert out.shape == ref.shape, (out.shape, ref.shape)
    max_err = float(jnp.max(jnp.abs(out - ref)))
    assert max_err < 1e-3, f"max abs error {max_err}"
    print("KERNEL_OK")
</pallas_src>

<mosaic_0001>
module attributes {stable_mosaic.version = 11 : i64} {
  func.func @eegnet_kernel(%arg0: i32, %arg1: memref<256x144xf32, #tpu.memory_space<vmem>>, %arg2: memref<256x256xf32, #tpu.memory_space<vmem>>, %arg3: memref<4x144x128xf32, #tpu.memory_space<vmem>>, %arg4: memref<256x1xf32, #tpu.memory_space<vmem>>, %arg5: memref<128x32xf32, #tpu.memory_space<vmem>>, %arg6: memref<4x256x64xf32, #tpu.memory_space<vmem>>, %arg7: memref<256x1xf32, #tpu.memory_space<vmem>>, %arg8: memref<4x32xf32, #tpu.memory_space<vmem>>, %arg9: memref<4x256xf32, #tpu.memory_space<vmem>>, %arg10: memref<256x144xf32, #tpu.memory_space<vmem>>) attributes {dimension_semantics = [#tpu.dimension_semantics<arbitrary>], iteration_bounds = array<i64: 1>, scalar_prefetch = 0 : i64, scratch_operands = 1 : i64, tpu.core_type = #tpu.core_type<tc>, window_params = [{transform_indices = @transform_0, window_bounds = array<i64: 256, 144>}, {pipeline_mode = #tpu.pipeline_mode<synchronous>, transform_indices = @transform_1, window_bounds = array<i64: 256, 256>}, {pipeline_mode = #tpu.pipeline_mode<synchronous>, transform_indices = @transform_2, window_bounds = array<i64: 4, 144, 128>}, {pipeline_mode = #tpu.pipeline_mode<synchronous>, transform_indices = @transform_3, window_bounds = array<i64: 256, 1>}, {pipeline_mode = #tpu.pipeline_mode<synchronous>, transform_indices = @transform_4, window_bounds = array<i64: 128, 32>}, {pipeline_mode = #tpu.pipeline_mode<synchronous>, transform_indices = @transform_5, window_bounds = array<i64: 4, 256, 64>}, {pipeline_mode = #tpu.pipeline_mode<synchronous>, transform_indices = @transform_6, window_bounds = array<i64: 256, 1>}, {pipeline_mode = #tpu.pipeline_mode<synchronous>, transform_indices = @transform_7, window_bounds = array<i64: 4, 32>}, {transform_indices = @transform_8, window_bounds = array<i64: 4, 256>}]} {
    %c0 = arith.constant 0 : index
    %c0_0 = arith.constant 0 : index
    %0 = vector.load %arg2[%c0, %c0_0] : memref<256x256xf32, #tpu.memory_space<vmem>>, vector<256x256xf32>
    %c0_1 = arith.constant 0 : index
    %c0_2 = arith.constant 0 : index
    %1 = vector.load %arg1[%c0_1, %c0_2] : memref<256x144xf32, #tpu.memory_space<vmem>>, vector<256x144xf32>
    %cst = arith.constant dense<0.000000e+00> : vector<256x144xf32>
    %2 = tpu.matmul %0, %1, %cst {dimension_numbers = #tpu.dot_dimension_numbers<[1], [0], [0], [1], [0, 0, 1, 1], [], []>} : vector<256x256xf32>, vector<256x144xf32>, vector<256x144xf32> -> vector<256x144xf32>
    %c0_3 = arith.constant 0 : index
    %c0_4 = arith.constant 0 : index
    %3 = vector.load %arg10[%c0_3, %c0_4] : memref<256x144xf32, #tpu.memory_space<vmem>>, vector<256x144xf32>
    tpu.vector_store %arg10[%c0_3, %c0_4], %2 {strides = array<i32>} : memref<256x144xf32, #tpu.memory_space<vmem>>, vector<256x144xf32>,
    %c0_5 = arith.constant 0 : index
    %c0_6 = arith.constant 0 : index
    %4 = vector.load %arg4[%c0_5, %c0_6] : memref<256x1xf32, #tpu.memory_space<vmem>>, vector<256x1xf32>
    %c0_7 = arith.constant 0 : index
    %c0_8 = arith.constant 0 : index
    %5 = vector.load %arg5[%c0_7, %c0_8] : memref<128x32xf32, #tpu.memory_space<vmem>>, vector<128x32xf32>
    %cst_9 = arith.constant 0.000000e+00 : f32
    %6 = vector.broadcast %cst_9 : f32 to vector<256x32xf32>
    %c0_10 = arith.constant 0 : index
    %c0_11 = arith.constant 0 : index
    %7 = vector.load %arg10[%c0_10, %c0_11] : memref<256x144xf32, #tpu.memory_space<vmem>>, vector<64x144xf32>
    %c0_12 = arith.constant 0 : index
    %c0_13 = arith.constant 0 : index
    %c0_14 = arith.constant 0 : index
    %8 = vector.load %arg3[%c0_12, %c0_13, %c0_14] : memref<4x144x128xf32, #tpu.memory_space<vmem>>, vector<1x144x128xf32>
    %9 = vector.shape_cast %8 : vector<1x144x128xf32> to vector<144x128xf32>
    %cst_15 = arith.constant dense<0.000000e+00> : vector<64x128xf32>
    %10 = tpu.matmul %7, %9, %cst_15 {dimension_numbers = #tpu.dot_dimension_numbers<[1], [0], [0], [1], [0, 0, 1, 1], [], []>} : vector<64x144xf32>, vector<144x128xf32>, vector<64x128xf32> -> vector<64x128xf32>
    %11 = vector.extract_strided_slice %4 {offsets = [0, 0], sizes = [64, 1], strides = [1, 1]} : vector<256x1xf32> to vector<64x1xf32>
    %12 = vector.broadcast %11 : vector<64x1xf32> to vector<64x128xf32>
    %13 = arith.addf %10, %12 : vector<64x128xf32>
    %cst_16 = arith.constant 0.000000e+00 : f32
    %14 = vector.broadcast %cst_16 : f32 to vector<64x128xf32>
    %15 = arith.cmpf ogt, %13, %14 : vector<64x128xf32>
    %cst_17 = arith.constant 0.000000e+00 : f32
    %16 = vector.broadcast %cst_17 : f32 to vector<64x128xf32>
    %17 = arith.minimumf %13, %16 : vector<64x128xf32>
    %18 = math.exp %17 : vector<64x128xf32>
    %cst_18 = arith.constant 1.000000e+00 : f32
    %19 = vector.broadcast %cst_18 : f32 to vector<64x128xf32>
    %20 = arith.subf %18, %19 : vector<64x128xf32>
    %21 = arith.select %15, %13, %20 : vector<64x128xi1>, vector<64x128xf32>
    %cst_19 = arith.constant dense<0.000000e+00> : vector<64x32xf32>
    %22 = tpu.matmul %21, %5, %cst_19 {dimension_numbers = #tpu.dot_dimension_numbers<[1], [0], [0], [1], [0, 0, 1, 1], [], []>} : vector<64x128xf32>, vector<128x32xf32>, vector<64x32xf32> -> vector<64x32xf32>
    %c0_20 = arith.constant 0 : index
    %c0_21 = arith.constant 0 : index
    %c0_22 = arith.constant 0 : index
    %23 = vector.load %arg6[%c0_20, %c0_21, %c0_22] : memref<4x256x64xf32, #tpu.memory_space<vmem>>, vector<1x256x64xf32>
    %24 = vector.shape_cast %23 : vector<1x256x64xf32> to vector<256x64xf32>
    %cst_23 = arith.constant dense<0.000000e+00> : vector<256x32xf32>
    %25 = tpu.matmul %24, %22, %cst_23 {dimension_numbers = #tpu.dot_dimension_numbers<[1], [0], [0], [1], [0, 0, 1, 1], [], []>} : vector<256x64xf32>, vector<64x32xf32>, vector<256x32xf32> -> vector<256x32xf32>
    %26 = arith.addf %6, %25 : vector<256x32xf32>
    %c64 = arith.constant 64 : index
    %c0_24 = arith.constant 0 : index
    %27 = vector.load %arg10[%c64, %c0_24] : memref<256x144xf32, #tpu.memory_space<vmem>>, vector<64x144xf32>
    %c1 = arith.constant 1 : index
    %c0_25 = arith.constant 0 : index
    %c0_26 = arith.constant 0 : index
    %28 = vector.load %arg3[%c1, %c0_25, %c0_26] : memref<4x144x128xf32, #tpu.memory_space<vmem>>, vector<1x144x128xf32>
    %29 = vector.shape_cast %28 : vector<1x144x128xf32> to vector<144x128xf32>
    %cst_27 = arith.constant dense<0.000000e+00> : vector<64x128xf32>
    %30 = tpu.matmul %27, %29, %cst_27 {dimension_numbers = #tpu.dot_dimension_numbers<[1], [0], [0], [1], [0, 0, 1, 1], [], []>} : vector<64x144xf32>, vector<144x128xf32>, vector<64x128xf32> -> vector<64x128xf32>
    %31 = vector.extract_strided_slice %4 {offsets = [64, 0], sizes = [64, 1], strides = [1, 1]} : vector<256x1xf32> to vector<64x1xf32>
    %32 = vector.broadcast %31 : vector<64x1xf32> to vector<64x128xf32>
    %33 = arith.addf %30, %32 : vector<64x128xf32>
    %cst_28 = arith.constant 0.000000e+00 : f32
    %34 = vector.broadcast %cst_28 : f32 to vector<64x128xf32>
    %35 = arith.cmpf ogt, %33, %34 : vector<64x128xf32>
    %cst_29 = arith.constant 0.000000e+00 : f32
    %36 = vector.broadcast %cst_29 : f32 to vector<64x128xf32>
    %37 = arith.minimumf %33, %36 : vector<64x128xf32>
    %38 = math.exp %37 : vector<64x128xf32>
    %cst_30 = arith.constant 1.000000e+00 : f32
    %39 = vector.broadcast %cst_30 : f32 to vector<64x128xf32>
    %40 = arith.subf %38, %39 : vector<64x128xf32>
    %41 = arith.select %35, %33, %40 : vector<64x128xi1>, vector<64x128xf32>
    %cst_31 = arith.constant dense<0.000000e+00> : vector<64x32xf32>
    %42 = tpu.matmul %41, %5, %cst_31 {dimension_numbers = #tpu.dot_dimension_numbers<[1], [0], [0], [1], [0, 0, 1, 1], [], []>} : vector<64x128xf32>, vector<128x32xf32>, vector<64x32xf32> -> vector<64x32xf32>
    %c1_32 = arith.constant 1 : index
    %c0_33 = arith.constant 0 : index
    %c0_34 = arith.constant 0 : index
    %43 = vector.load %arg6[%c1_32, %c0_33, %c0_34] : memref<4x256x64xf32, #tpu.memory_space<vmem>>, vector<1x256x64xf32>
    %44 = vector.shape_cast %43 : vector<1x256x64xf32> to vector<256x64xf32>
    %cst_35 = arith.constant dense<0.000000e+00> : vector<256x32xf32>
    %45 = tpu.matmul %44, %42, %cst_35 {dimension_numbers = #tpu.dot_dimension_numbers<[1], [0], [0], [1], [0, 0, 1, 1], [], []>} : vector<256x64xf32>, vector<64x32xf32>, vector<256x32xf32> -> vector<256x32xf32>
    %46 = arith.addf %26, %45 : vector<256x32xf32>
    %c128 = arith.constant 128 : index
    %c0_36 = arith.constant 0 : index
    %47 = vector.load %arg10[%c128, %c0_36] : memref<256x144xf32, #tpu.memory_space<vmem>>, vector<64x144xf32>
    %c2 = arith.constant 2 : index
    %c0_37 = arith.constant 0 : index
    %c0_38 = arith.constant 0 : index
    %48 = vector.load %arg3[%c2, %c0_37, %c0_38] : memref<4x144x128xf32, #tpu.memory_space<vmem>>, vector<1x144x128xf32>
    %49 = vector.shape_cast %48 : vector<1x144x128xf32> to vector<144x128xf32>
    %cst_39 = arith.constant dense<0.000000e+00> : vector<64x128xf32>
    %50 = tpu.matmul %47, %49, %cst_39 {dimension_numbers = #tpu.dot_dimension_numbers<[1], [0], [0], [1], [0, 0, 1, 1], [], []>} : vector<64x144xf32>, vector<144x128xf32>, vector<64x128xf32> -> vector<64x128xf32>
    %51 = vector.extract_strided_slice %4 {offsets = [128, 0], sizes = [64, 1], strides = [1, 1]} : vector<256x1xf32> to vector<64x1xf32>
    %52 = vector.broadcast %51 : vector<64x1xf32> to vector<64x128xf32>
    %53 = arith.addf %50, %52 : vector<64x128xf32>
    %cst_40 = arith.constant 0.000000e+00 : f32
    %54 = vector.broadcast %cst_40 : f32 to vector<64x128xf32>
    %55 = arith.cmpf ogt, %53, %54 : vector<64x128xf32>
    %cst_41 = arith.constant 0.000000e+00 : f32
    %56 = vector.broadcast %cst_41 : f32 to vector<64x128xf32>
    %57 = arith.minimumf %53, %56 : vector<64x128xf32>
    %58 = math.exp %57 : vector<64x128xf32>
    %cst_42 = arith.constant 1.000000e+00 : f32
    %59 = vector.broadcast %cst_42 : f32 to vector<64x128xf32>
    %60 = arith.subf %58, %59 : vector<64x128xf32>
    %61 = arith.select %55, %53, %60 : vector<64x128xi1>, vector<64x128xf32>
    %cst_43 = arith.constant dense<0.000000e+00> : vector<64x32xf32>
    %62 = tpu.matmul %61, %5, %cst_43 {dimension_numbers = #tpu.dot_dimension_numbers<[1], [0], [0], [1], [0, 0, 1, 1], [], []>} : vector<64x128xf32>, vector<128x32xf32>, vector<64x32xf32> -> vector<64x32xf32>
    %c2_44 = arith.constant 2 : index
    %c0_45 = arith.constant 0 : index
    %c0_46 = arith.constant 0 : index
    %63 = vector.load %arg6[%c2_44, %c0_45, %c0_46] : memref<4x256x64xf32, #tpu.memory_space<vmem>>, vector<1x256x64xf32>
    %64 = vector.shape_cast %63 : vector<1x256x64xf32> to vector<256x64xf32>
    %cst_47 = arith.constant dense<0.000000e+00> : vector<256x32xf32>
    %65 = tpu.matmul %64, %62, %cst_47 {dimension_numbers = #tpu.dot_dimension_numbers<[1], [0], [0], [1], [0, 0, 1, 1], [], []>} : vector<256x64xf32>, vector<64x32xf32>, vector<256x32xf32> -> vector<256x32xf32>
    %66 = arith.addf %46, %65 : vector<256x32xf32>
    %c192 = arith.constant 192 : index
    %c0_48 = arith.constant 0 : index
    %67 = vector.load %arg10[%c192, %c0_48] : memref<256x144xf32, #tpu.memory_space<vmem>>, vector<64x144xf32>
    %c3 = arith.constant 3 : index
    %c0_49 = arith.constant 0 : index
    %c0_50 = arith.constant 0 : index
    %68 = vector.load %arg3[%c3, %c0_49, %c0_50] : memref<4x144x128xf32, #tpu.memory_space<vmem>>, vector<1x144x128xf32>
    %69 = vector.shape_cast %68 : vector<1x144x128xf32> to vector<144x128xf32>
    %cst_51 = arith.constant dense<0.000000e+00> : vector<64x128xf32>
    %70 = tpu.matmul %67, %69, %cst_51 {dimension_numbers = #tpu.dot_dimension_numbers<[1], [0], [0], [1], [0, 0, 1, 1], [], []>} : vector<64x144xf32>, vector<144x128xf32>, vector<64x128xf32> -> vector<64x128xf32>
    %71 = vector.extract_strided_slice %4 {offsets = [192, 0], sizes = [64, 1], strides = [1, 1]} : vector<256x1xf32> to vector<64x1xf32>
    %72 = vector.broadcast %71 : vector<64x1xf32> to vector<64x128xf32>
    %73 = arith.addf %70, %72 : vector<64x128xf32>
    %cst_52 = arith.constant 0.000000e+00 : f32
    %74 = vector.broadcast %cst_52 : f32 to vector<64x128xf32>
    %75 = arith.cmpf ogt, %73, %74 : vector<64x128xf32>
    %cst_53 = arith.constant 0.000000e+00 : f32
    %76 = vector.broadcast %cst_53 : f32 to vector<64x128xf32>
    %77 = arith.minimumf %73, %76 : vector<64x128xf32>
    %78 = math.exp %77 : vector<64x128xf32>
    %cst_54 = arith.constant 1.000000e+00 : f32
    %79 = vector.broadcast %cst_54 : f32 to vector<64x128xf32>
    %80 = arith.subf %78, %79 : vector<64x128xf32>
    %81 = arith.select %75, %73, %80 : vector<64x128xi1>, vector<64x128xf32>
    %cst_55 = arith.constant dense<0.000000e+00> : vector<64x32xf32>
    %82 = tpu.matmul %81, %5, %cst_55 {dimension_numbers = #tpu.dot_dimension_numbers<[1], [0], [0], [1], [0, 0, 1, 1], [], []>} : vector<64x128xf32>, vector<128x32xf32>, vector<64x32xf32> -> vector<64x32xf32>
    %c3_56 = arith.constant 3 : index
    %c0_57 = arith.constant 0 : index
    %c0_58 = arith.constant 0 : index
    %83 = vector.load %arg6[%c3_56, %c0_57, %c0_58] : memref<4x256x64xf32, #tpu.memory_space<vmem>>, vector<1x256x64xf32>
    %84 = vector.shape_cast %83 : vector<1x256x64xf32> to vector<256x64xf32>
    %cst_59 = arith.constant dense<0.000000e+00> : vector<256x32xf32>
    %85 = tpu.matmul %84, %82, %cst_59 {dimension_numbers = #tpu.dot_dimension_numbers<[1], [0], [0], [1], [0, 0, 1, 1], [], []>} : vector<256x64xf32>, vector<64x32xf32>, vector<256x32xf32> -> vector<256x32xf32>
    %86 = arith.addf %66, %85 : vector<256x32xf32>
    %c0_60 = arith.constant 0 : index
    %c0_61 = arith.constant 0 : index
    %87 = vector.load %arg7[%c0_60, %c0_61] : memref<256x1xf32, #tpu.memory_space<vmem>>, vector<256x1xf32>
    %88 = vector.broadcast %87 : vector<256x1xf32> to vector<256x32xf32>
    %89 = arith.addf %86, %88 : vector<256x32xf32>
    %cst_62 = arith.constant 0.000000e+00 : f32
    %90 = vector.broadcast %cst_62 : f32 to vector<256x32xf32>
    %91 = arith.cmpf ogt, %89, %90 : vector<256x32xf32>
    %cst_63 = arith.constant 0.000000e+00 : f32
    %92 = vector.broadcast %cst_63 : f32 to vector<256x32xf32>
    %93 = arith.minimumf %89, %92 : vector<256x32xf32>
    %94 = math.exp %93 : vector<256x32xf32>
    %cst_64 = arith.constant 1.000000e+00 : f32
    %95 = vector.broadcast %cst_64 : f32 to vector<256x32xf32>
    %96 = arith.subf %94, %95 : vector<256x32xf32>
    %97 = arith.select %91, %89, %96 : vector<256x32xi1>, vector<256x32xf32>
    %c0_65 = arith.constant 0 : index
    %c0_66 = arith.constant 0 : index
    %98 = vector.load %arg8[%c0_65, %c0_66] : memref<4x32xf32, #tpu.memory_space<vmem>>, vector<4x32xf32>
    %99 = tpu.transpose %97, [1, 0] : vector<256x32xf32> -> vector<32x256xf32>
    %cst_67 = arith.constant dense<0.000000e+00> : vector<4x256xf32>
    %100 = tpu.matmul %98, %99, %cst_67 {dimension_numbers = #tpu.dot_dimension_numbers<[1], [0], [0], [1], [0, 0, 1, 1], [], []>} : vector<4x32xf32>, vector<32x256xf32>, vector<4x256xf32> -> vector<4x256xf32>
    %c0_68 = arith.constant 0 : index
    %c0_69 = arith.constant 0 : index
    %101 = vector.load %arg9[%c0_68, %c0_69] : memref<4x256xf32, #tpu.memory_space<vmem>>, vector<4x256xf32>
    tpu.vector_store %arg9[%c0_68, %c0_69], %100 {strides = array<i32>} : memref<4x256xf32, #tpu.memory_space<vmem>>, vector<4x256xf32>,
    return
  }
  func.func @transform_0(%arg0: i32) -> (i32, i32) {
    %c0_i32 = arith.constant 0 : i32
    %c0_i32_0 = arith.constant 0 : i32
    return %arg0, %c0_i32 : i32, i32
  }
  func.func @transform_1(%arg0: i32) -> (i32, i32) {
    %c0_i32 = arith.constant 0 : i32
    %c0_i32_0 = arith.constant 0 : i32
    %c0_i32_1 = arith.constant 0 : i32
    return %c0_i32, %c0_i32_0 : i32, i32
  }
  func.func @transform_2(%arg0: i32) -> (i32, i32, i32) {
    %c0_i32 = arith.constant 0 : i32
    %c0_i32_0 = arith.constant 0 : i32
    %c0_i32_1 = arith.constant 0 : i32
    %c0_i32_2 = arith.constant 0 : i32
    return %c0_i32, %c0_i32_0, %c0_i32_1 : i32, i32, i32
  }
  func.func @transform_3(%arg0: i32) -> (i32, i32) {
    %c0_i32 = arith.constant 0 : i32
    %c0_i32_0 = arith.constant 0 : i32
    %c0_i32_1 = arith.constant 0 : i32
    return %c0_i32, %c0_i32_0 : i32, i32
  }
  func.func @transform_4(%arg0: i32) -> (i32, i32) {
    %c0_i32 = arith.constant 0 : i32
    %c0_i32_0 = arith.constant 0 : i32
    %c0_i32_1 = arith.constant 0 : i32
    return %c0_i32, %c0_i32_0 : i32, i32
  }
  func.func @transform_5(%arg0: i32) -> (i32, i32, i32) {
    %c0_i32 = arith.constant 0 : i32
    %c0_i32_0 = arith.constant 0 : i32
    %c0_i32_1 = arith.constant 0 : i32
    %c0_i32_2 = arith.constant 0 : i32
    return %c0_i32, %c0_i32_0, %c0_i32_1 : i32, i32, i32
  }
  func.func @transform_6(%arg0: i32) -> (i32, i32) {
    %c0_i32 = arith.constant 0 : i32
    %c0_i32_0 = arith.constant 0 : i32
    %c0_i32_1 = arith.constant 0 : i32
    return %c0_i32, %c0_i32_0 : i32, i32
  }
  func.func @transform_7(%arg0: i32) -> (i32, i32) {
    %c0_i32 = arith.constant 0 : i32
    %c0_i32_0 = arith.constant 0 : i32
    %c0_i32_1 = arith.constant 0 : i32
    return %c0_i32, %c0_i32_0 : i32, i32
  }
  func.func @transform_8(%arg0: i32) -> (i32, i32) {
    %c0_i32 = arith.constant 0 : i32
    %c0_i32_0 = arith.constant 0 : i32
    return %c0_i32, %arg0 : i32, i32
  }
}

</mosaic_0001>

<bundles_post_ra>
// kernel: eegnet_forward_prepared.1
= control target key start
LH: loop header
LB: loop body
LE: loop exit
PB: predicated region body
PF: predicated region fallthrough
CT: control target
= control target key end

     0   :  { %vm610_vm0 = vcmask 130048   ;;  %s6376_s0 = inlined_call_operand.vmem [shape: f32[256,144], index: 0, kind: input, shape index: {}]   ;;  %s6377_s1 = inlined_call_operand.vmem [shape: f32[256,256], index: 1, kind: input, shape index: {}]   ;;  %s6378_s2 = inlined_call_operand.vmem [shape: f32[4,144,128], index: 2, kind: input, shape index: {}]   ;;  %s6379_s3 = inlined_call_operand.vmem [shape: f32[256,1], index: 3, kind: input, shape index: {}]   ;;  %s6380_s6 = inlined_call_operand.vmem [shape: f32[256,1], index: 6, kind: input, shape index: {}]   ;;  %s6381_s4 = inlined_call_operand.vmem [shape: f32[128,32], index: 4, kind: input, shape index: {}]   ;;  %s6382_s5 = inlined_call_operand.vmem [shape: f32[4,256,64], index: 5, kind: input, shape index: {}]   ;;  %s6383_s7 = inlined_call_operand.vmem [shape: f32[4,32], index: 7, kind: input, shape index: {}]   ;;  %s6384_s8 = inlined_call_operand.vmem [shape: f32[4,256], index: 8, kind: output, shape index: {}]  }
   0x1   :  { %v123_v0 = vld [vmem:[%s6376_s0 + $0xf0] sm:$0xff]  ;;  %v121_v2 = vld [vmem:[%s6376_s0 + $0xe0] sm:$0xff]  ;;  %v156_v28 = vld [vmem:[%s6376_s0 + $0x1f8] sm:$0xff] }
   0x2   :  { %v155_v1 = vld [vmem:[%s6376_s0 + $0x1f0] sm:$0xff]  ;;  %157 = vmatpush.msra.mxu0 %v123_v0  ;;  %v153_v3 = vld [vmem:[%s6376_s0 + $0x1e0] sm:$0xff]  ;;  %3809 = vmatpush.msra.mxu2 %v123_v0  ;;  %v154_v31 = vld [vmem:[%s6376_s0 + $0x1e8] sm:$0xff] }
   0x3   :  { %270 = vmatpush.msra.mxu1 %v155_v1  ;;  %v119_v4 = vld [vmem:[%s6376_s0 + $0xd0] sm:$0xff]  ;;  %v117_v6 = vld [vmem:[%s6376_s0 + $0xc0] sm:$0xff]  ;;  %3825 = vmatpush.msra.mxu3 %v156_v28  ;;  %v152_v34 = vld [vmem:[%s6376_s0 + $0x1d8] sm:$0xff] }
   0x4   :  { %v151_v5 = vld [vmem:[%s6376_s0 + $0x1d0] sm:$0xff]  ;;  %158 = vmatpush.msra.mxu0 %v121_v2  ;;  %v149_v7 = vld [vmem:[%s6376_s0 + $0x1c0] sm:$0xff]  ;;  %3810 = vmatpush.msra.mxu2 %v121_v2  ;;  %v4132_v36 = vld [vmem:[%s6377_s1 + $0x8] sm:$0xff] }
   0x5   :  { %271 = vmatpush.msra.mxu1 %v153_v3  ;;  %v115_v8 = vld [vmem:[%s6376_s0 + $0xb0] sm:$0xff]  ;;  %v113_v10 = vld [vmem:[%s6376_s0 + $0xa0] sm:$0xff]  ;;  %3826 = vmatpush.msra.mxu3 %v154_v31  ;;  %v150_v37 = vld [vmem:[%s6376_s0 + $0x1c8] sm:$0xff] }
   0x6   :  { %159 = vmatpush.msra.mxu0 %v119_v4  ;;  %v147_v9 = vld [vmem:[%s6376_s0 + $0x1b0] sm:$0xff]  ;;  %3811 = vmatpush.msra.mxu2 %v119_v4  ;;  %v145_v11 = vld [vmem:[%s6376_s0 + $0x1a0] sm:$0xff]  ;;  %v148_v38 = vld [vmem:[%s6376_s0 + $0x1b8] sm:$0xff] }
   0x7   :  { %272 = vmatpush.msra.mxu1 %v151_v5  ;;  %v111_v12 = vld [vmem:[%s6376_s0 + $0x90] sm:$0xff]  ;;  %v109_v14 = vld [vmem:[%s6376_s0 + $0x80] sm:$0xff]  ;;  %3827 = vmatpush.msra.mxu3 %v152_v34  ;;  %v146_v39 = vld [vmem:[%s6376_s0 + $0x1a8] sm:$0xff] }
   0x8   :  { %160 = vmatpush.msra.mxu0 %v117_v6  ;;  %3812 = vmatpush.msra.mxu2 %v117_v6  ;;  %v143_v13 = vld [vmem:[%s6376_s0 + $0x190] sm:$0xff]  ;;  %v141_v15 = vld [vmem:[%s6376_s0 + $0x180] sm:$0xff]  ;;  %v144_v40 = vld [vmem:[%s6376_s0 + $0x198] sm:$0xff] }
   0x9   :  { %273 = vmatpush.msra.mxu1 %v149_v7  ;;  %v107_v16 = vld [vmem:[%s6376_s0 + $0x70] sm:$0xff]  ;;  %v105_v18 = vld [vmem:[%s6376_s0 + $0x60] sm:$0xff]  ;;  %3828 = vmatpush.msra.mxu3 %v150_v37  ;;  %v4156_v42 = vld [vmem:[%s6377_s1 + $0x18] sm:$0xff] }
   0xa   :  { %161 = vmatpush.msra.mxu0 %v115_v8  ;;  %3813 = vmatpush.msra.mxu2 %v115_v8  ;;  %v139_v17 = vld [vmem:[%s6376_s0 + $0x170] sm:$0xff]  ;;  %v137_v19 = vld [vmem:[%s6376_s0 + $0x160] sm:$0xff]  ;;  %v142_v43 = vld [vmem:[%s6376_s0 + $0x188] sm:$0xff] }
   0xb   :  { %274 = vmatpush.msra.mxu1 %v147_v9  ;;  %v103_v20 = vld [vmem:[%s6376_s0 + $0x50] sm:$0xff]  ;;  %v101_v22 = vld [vmem:[%s6376_s0 + $0x40] sm:$0xff]  ;;  %3829 = vmatpush.msra.mxu3 %v148_v38  ;;  %v140_v44 = vld [vmem:[%s6376_s0 + $0x178] sm:$0xff] }
   0xc   :  { %162 = vmatpush.msra.mxu0 %v113_v10  ;;  %3814 = vmatpush.msra.mxu2 %v113_v10  ;;  %v135_v21 = vld [vmem:[%s6376_s0 + $0x150] sm:$0xff]  ;;  %v133_v23 = vld [vmem:[%s6376_s0 + $0x140] sm:$0xff]  ;;  %v138_v45 = vld [vmem:[%s6376_s0 + $0x168] sm:$0xff] }
   0xd   :  { %275 = vmatpush.msra.mxu1 %v145_v11  ;;  %v99_v24 = vld [vmem:[%s6376_s0 + $0x30] sm:$0xff]  ;;  %v97_v26 = vld [vmem:[%s6376_s0 + $0x20] sm:$0xff]  ;;  %3830 = vmatpush.msra.mxu3 %v146_v39  ;;  %v136_v46 = vld [vmem:[%s6376_s0 + $0x158] sm:$0xff] }
   0xe   :  { %163 = vmatpush.msra.mxu0 %v111_v12  ;;  %3815 = vmatpush.msra.mxu2 %v111_v12  ;;  %v131_v25 = vld [vmem:[%s6376_s0 + $0x130] sm:$0xff]  ;;  %v129_v27 = vld [vmem:[%s6376_s0 + $0x120] sm:$0xff]  ;;  %v4180_v48 = vld [vmem:[%s6377_s1 + $0x28] sm:$0xff] }
   0xf   :  { %276 = vmatpush.msra.mxu1 %v143_v13  ;;  %v95_v29 = vld [vmem:[%s6376_s0 + $0x10] sm:$0xff]  ;;  %v93_v32 = vld [vmem:[%s6376_s0] sm:$0xff]  ;;  %3831 = vmatpush.msra.mxu3 %v144_v40  ;;  %v134_v49 = vld [vmem:[%s6376_s0 + $0x148] sm:$0xff] }
  0x10   :  { %164 = vmatpush.msra.mxu0 %v109_v14  ;;  %3816 = vmatpush.msra.mxu2 %v109_v14  ;;  %v127_v30 = vld [vmem:[%s6376_s0 + $0x110] sm:$0xff]  ;;  %v125_v33 = vld [vmem:[%s6376_s0 + $0x100] sm:$0xff]  ;;  %v132_v50 = vld [vmem:[%s6376_s0 + $0x138] sm:$0xff] }
  0x11   :  { %277 = vmatpush.msra.mxu1 %v141_v15  ;;  %v4127_v35 = vld [vmem:[%s6377_s1] sm:$0xff]  ;;  %v4151_v41 = vld [vmem:[%s6377_s1 + $0x10] sm:$0xff]  ;;  %3832 = vmatpush.msra.mxu3 %v142_v43  ;;  %v130_v51 = vld [vmem:[%s6376_s0 + $0x128] sm:$0xff] }
  0x12   :  { %165 = vmatpush.msra.mxu0 %v107_v16  ;;  %3817 = vmatpush.msra.mxu2 %v107_v16  ;;  %v4175_v47 = vld [vmem:[%s6377_s1 + $0x20] sm:$0xff]  ;;  %v128_v52 = vld [vmem:[%s6376_s0 + $0x118] sm:$0xff]  ;;  %v4199_v53 = vld [vmem:[%s6377_s1 + $0x30] sm:$0xff] }
  0x13   :  { %278 = vmatpush.msra.mxu1 %v139_v17  ;;  %3833 = vmatpush.msra.mxu3 %v140_v44  ;;  %v4204_v54 = vld [vmem:[%s6377_s1 + $0x38] sm:$0xff]  ;;  %v126_v55 = vld [vmem:[%s6376_s0 + $0x108] sm:$0xff]  ;;  %v4220_v57 = vld [vmem:[%s6377_s1 + $0x40] sm:$0xff] }
  0x14   :  { %166 = vmatpush.msra.mxu0 %v105_v18  ;;  %3818 = vmatpush.msra.mxu2 %v105_v18  ;;  %v4212_v56 = vld [vmem:[%s6377_s1 + $0xf8] sm:$0xff]  ;;  %v4225_v58 = vld [vmem:[%s6377_s1 + $0x48] sm:$0xff]  ;;  %v4238_v60 = vld [vmem:[%s6377_s1 + $0x50] sm:$0xff] }
  0x15   :  { %279 = vmatpush.msra.mxu1 %v137_v19  ;;  %3834 = vmatpush.msra.mxu3 %v138_v45  ;;  %v4230_v59 = vld [vmem:[%s6377_s1 + $0x108] sm:$0xff]  ;;  %v4243_v61 = vld [vmem:[%s6377_s1 + $0x58] sm:$0xff]  ;;  %v4256_v63 = vld [vmem:[%s6377_s1 + $0x60] sm:$0xff] }
  0x16   :  { %167 = vmatpush.msra.mxu0 %v103_v20  ;;  %3819 = vmatpush.msra.mxu2 %v103_v20  ;;  %v4248_v62 = vld [vmem:[%s6377_s1 + $0x118] sm:$0xff]  ;;  %v4261_v0 = vld [vmem:[%s6377_s1 + $0x68] sm:$0xff]  ;;  %v4266_v1 = vld [vmem:[%s6377_s1 + $0x190] sm:$0xff] }
  0x17   :  { %280 = vmatpush.msra.mxu1 %v135_v21  ;;  %3835 = vmatpush.msra.mxu3 %v136_v46  ;;  %v4271_v2 = vld [vmem:[%s6377_s1 + $0x128] sm:$0xff]  ;;  %v4280_v3 = vld [vmem:[%s6377_s1 + $0x70] sm:$0xff]  ;;  %v4285_v4 = vld [vmem:[%s6377_s1 + $0x78] sm:$0xff] }
  0x18   :  { %168 = vmatpush.msra.mxu0 %v101_v22  ;;  %3820 = vmatpush.msra.mxu2 %v101_v22  ;;  %v4290_v5 = vld [vmem:[%s6377_s1 + $0x1a0] sm:$0xff]  ;;  %v4295_v6 = vld [vmem:[%s6377_s1 + $0x138] sm:$0xff]  ;;  %v4309_v8 = vld [vmem:[%s6377_s1 + $0x88] sm:$0xff] }
  0x19   :  { %281 = vmatpush.msra.mxu1 %v133_v23  ;;  %3836 = vmatpush.msra.mxu3 %v134_v49  ;;  %v4304_v7 = vld [vmem:[%s6377_s1 + $0x80] sm:$0xff]  ;;  %v4314_v9 = vld [vmem:[%s6377_s1 + $0x1b0] sm:$0xff]  ;;  %v4319_v10 = vld [vmem:[%s6377_s1 + $0x148] sm:$0xff] }
  0x1a   :  { %169 = vmatpush.msra.mxu0 %v99_v24  ;;  %3821 = vmatpush.msra.mxu2 %v99_v24  ;;  %v4328_v11 = vld [vmem:[%s6377_s1 + $0x90] sm:$0xff]  ;;  %v4333_v12 = vld [vmem:[%s6377_s1 + $0x98] sm:$0xff]  ;;  %v4338_v13 = vld [vmem:[%s6377_s1 + $0x1c0] sm:$0xff] }
  0x1b   :  { %282 = vmatpush.msra.mxu1 %v131_v25  ;;  %3837 = vmatpush.msra.mxu3 %v132_v50  ;;  %v4343_v14 = vld [vmem:[%s6377_s1 + $0x158] sm:$0xff]  ;;  %v122_v16 = vld [vmem:[%s6376_s0 + $0xe8] sm:$0xff]  ;;  %v4361_v18 = vld [vmem:[%s6377_s1 + $0xa0] sm:$0xff] }
  0x1c   :  { %170 = vmatpush.msra.mxu0 %v97_v26  ;;  %3822 = vmatpush.msra.mxu2 %v97_v26  ;;  %v124_v15 = vld [vmem:[%s6376_s0 + $0xf8] sm:$0xff]  ;;  %v4366_v19 = vld [vmem:[%s6377_s1 + $0xa8] sm:$0xff]  ;;  %v4374_v21 = vld [vmem:[%s6377_s1 + $0x1d0] sm:$0xff] }
  0x1d   :  { %283 = vmatpush.msra.mxu1 %v129_v27  ;;  %3838 = vmatpush.msra.mxu3 %v130_v51  ;;  %v120_v17 = vld [vmem:[%s6376_s0 + $0xd8] sm:$0xff]  ;;  %v118_v20 = vld [vmem:[%s6376_s0 + $0xc8] sm:$0xff]  ;;  %v4397_v26 = vld [vmem:[%s6377_s1 + $0xb0] sm:$0xff] }
  0x1e   :  { %171 = vmatpush.msra.mxu0 %v95_v29  ;;  %3823 = vmatpush.msra.mxu2 %v95_v29  ;;  %v4379_v22 = vld [vmem:[%s6377_s1 + $0x168] sm:$0xff]  ;;  %v116_v23 = vld [vmem:[%s6376_s0 + $0xb8] sm:$0xff]  ;;  %v4410_v29 = vld [vmem:[%s6377_s1 + $0x1e0] sm:$0xff] }
  0x1f   :  { %284 = vmatpush.msra.mxu1 %v127_v30  ;;  %3839 = vmatpush.msra.mxu3 %v128_v52  ;;  %v114_v24 = vld [vmem:[%s6376_s0 + $0xa8] sm:$0xff]  ;;  %v112_v25 = vld [vmem:[%s6376_s0 + $0x98] sm:$0xff] }
  0x20   :  { %172 = vmatpush.msra.mxu0 %v93_v32  ;;  %3824 = vmatpush.msra.mxu2 %v93_v32  ;;  %v4402_v27 = vld [vmem:[%s6377_s1 + $0xb8] sm:$0xff]  ;;  %v106_v32 = vld [vmem:[%s6376_s0 + $0x68] sm:$0xff] }
  0x21   :  { %285 = vmatpush.msra.mxu1 %v125_v33  ;;  %173 = vmatmul.f32.vlgmr.msra.gmra.mxu0 %v4127_v35  ;;  %v4415_v30 = vld [vmem:[%s6377_s1 + $0x178] sm:$0xff] }
  0x22   :  { %286 = vmatmul.f32.vlgmr.msra.gmra.mxu1 %v4132_v36  ;;  %496 = vmatpush.msrb.mxu0 %v156_v28  ;;  %v110_v28 = vld [vmem:[%s6376_s0 + $0x88] sm:$0xff]  ;;  %v104_v33 = vld [vmem:[%s6376_s0 + $0x58] sm:$0xff] }
  0x23   :  { %3840 = vmatpush.msra.mxu3 %v126_v55  ;;  %248 = vmatmul.f32.vlgmr.msra.gmra.mxu2 %v4266_v1 }
  0x24   :  { %497 = vmatpush.msrb.mxu0 %v154_v31  ;;  %557 = vmatmul.f32.vlgmr.msra.gmra.mxu3 %v4212_v56  ;;  %v108_v31 = vld [vmem:[%s6376_s0 + $0x78] sm:$0xff] }
  0x25   :  { %383 = vmatpush.msrb.mxu2 %v124_v15  ;;  %v4501_v15 = vld [vmem:[%s6377_s1 + $0x1a8] sm:$0xff] }
  0x26   :  { %498 = vmatpush.msrb.mxu0 %v152_v34  ;;  %v4433_v34 = vld [vmem:[%s6377_s1 + $0xc0] sm:$0xff] }
  0x27   :  { %384 = vmatpush.msrb.mxu2 %v122_v16  ;;  %v4515_v16 = vld [vmem:[%s6377_s1 + $0x1b8] sm:$0xff] }
  0x28   :  { %499 = vmatpush.msrb.mxu0 %v150_v37  ;;  %v4438_v37 = vld [vmem:[%s6377_s1 + $0xc8] sm:$0xff] }
  0x29   :  { %176 = vmatmul.f32.gmra.mxu0 %v4151_v41  ;;  %385 = vmatpush.msrb.mxu2 %v120_v17 }
  0x2a   :  { %289 = vmatmul.f32.gmra.mxu1 %v4156_v42  ;;  %500 = vmatpush.msrb.mxu0 %v148_v38  ;;  %v102_v38 = vld [vmem:[%s6376_s0 + $0x48] sm:$0xff] }
  0x2b   :  { %251 = vmatmul.f32.gmra.mxu2 %v4290_v5 }
  0x2c   :  { %501 = vmatpush.msrb.mxu0 %v146_v39  ;;  %560 = vmatmul.f32.gmra.mxu3 %v4230_v59  ;;  %v4446_v39 = vld [vmem:[%s6377_s1 + $0x1f0] sm:$0xff] }
  0x2d   :  { %386 = vmatpush.msrb.mxu2 %v118_v20  ;;  %v4524_v20 = vld [vmem:[%s6377_s1 + $0x100] sm:$0xff] }
  0x2e   :  { %502 = vmatpush.msrb.mxu0 %v144_v40  ;;  %v4451_v40 = vld [vmem:[%s6377_s1 + $0x188] sm:$0xff] }
  0x2f   :  { %387 = vmatpush.msrb.mxu2 %v116_v23 }
  0x30   :  { %503 = vmatpush.msrb.mxu0 %v142_v43  ;;  %v100_v43 = vld [vmem:[%s6376_s0 + $0x38] sm:$0xff] }
  0x31   :  { %179 = vmatmul.f32.gmra.mxu0 %v4175_v47  ;;  %388 = vmatpush.msrb.mxu2 %v114_v24  ;;  %v4531_v24 = vld [vmem:[%s6377_s1 + $0x1c8] sm:$0xff] }
  0x32   :  { %292 = vmatmul.f32.gmra.mxu1 %v4180_v48  ;;  %504 = vmatpush.msrb.mxu0 %v140_v44  ;;  %v98_v44 = vld [vmem:[%s6376_s0 + $0x28] sm:$0xff] }
  0x33   :  { %254 = vmatmul.f32.gmra.mxu2 %v4314_v9 }
  0x34   :  { %505 = vmatpush.msrb.mxu0 %v138_v45  ;;  %563 = vmatmul.f32.gmra.mxu3 %v4248_v62  ;;  %v96_v45 = vld [vmem:[%s6376_s0 + $0x18] sm:$0xff] }
  0x35   :  { %389 = vmatpush.msrb.mxu2 %v112_v25  ;;  %v3430_v25 = vld [vmem:[%s6378_s2 + $0xf8] sm:$0xff] }
  0x36   :  { %506 = vmatpush.msrb.mxu0 %v136_v46  ;;  %v4469_v46 = vld [vmem:[%s6377_s1 + $0xd0] sm:$0xff] }
  0x37   :  { %390 = vmatpush.msrb.mxu2 %v110_v28 }
  0x38   :  { %507 = vmatpush.msrb.mxu0 %v134_v49  ;;  %v4474_v49 = vld [vmem:[%s6377_s1 + $0xd8] sm:$0xff] }
  0x39   :  { %182 = vmatmul.f32.gmra.mxu0 %v4199_v53  ;;  %391 = vmatpush.msrb.mxu2 %v108_v31  ;;  %v4549_v31 = vld [vmem:[%s6377_s1 + $0x110] sm:$0xff] }
  0x3a   :  { %295 = vmatmul.f32.gmra.mxu1 %v4204_v54  ;;  %508 = vmatpush.msrb.mxu0 %v132_v50  ;;  %v94_v50 = vld [vmem:[%s6376_s0 + $0x8] sm:$0xff] }
  0x3b   :  { %257 = vmatmul.f32.gmra.mxu2 %v4338_v13 }
  0x3c   :  { %509 = vmatpush.msrb.mxu0 %v130_v51  ;;  %566 = vmatmul.f32.gmra.mxu3 %v4271_v2  ;;  %v4482_v51 = vld [vmem:[%s6377_s1 + $0x198] sm:$0xff] }
  0x3d   :  { %392 = vmatpush.msrb.mxu2 %v106_v32  ;;  %v3429_v32 = vld [vmem:[%s6378_s2 + $0xf0] sm:$0xff] }
  0x3e   :  { %510 = vmatpush.msrb.mxu0 %v128_v52  ;;  %v4491_v52 = vld [vmem:[%s6377_s1 + $0xe0] sm:$0xff] }
  0x3f   :  { %393 = vmatpush.msrb.mxu2 %v104_v33  ;;  %v4559_v33 = vld [vmem:[%s6377_s1 + $0x1d8] sm:$0xff] }
  0x40   :  { %511 = vmatpush.msrb.mxu0 %v126_v55  ;;  %v4496_v55 = vld [vmem:[%s6377_s1 + $0xe8] sm:$0xff] }
  0x41   :  { %185 = vmatmul.f32.gmra.mxu0 %v4220_v57  ;;  %394 = vmatpush.msrb.mxu2 %v102_v38  ;;  %v3428_v38 = vld [vmem:[%s6378_s2 + $0xe8] sm:$0xff] }
  0x42   :  { %298 = vmatmul.f32.gmra.mxu1 %v4225_v58 }
  0x43   :  { %260 = vmatmul.f32.gmra.mxu2 %v4374_v21 }
  0x44   :  { %569 = vmatmul.f32.gmra.mxu3 %v4295_v6  ;;  %395 = vmatpush.msrb.mxu2 %v100_v43  ;;  %v3427_v43 = vld [vmem:[%s6378_s2 + $0xe0] sm:$0xff] }
  0x46   :  { %396 = vmatpush.msrb.mxu2 %v98_v44  ;;  %v3426_v44 = vld [vmem:[%s6378_s2 + $0xd8] sm:$0xff] }
  0x48   :  { %397 = vmatpush.msrb.mxu2 %v96_v45 }
  0x49   :  { %188 = vmatmul.f32.gmra.mxu0 %v4238_v60 }
  0x4a   :  { %301 = vmatmul.f32.gmra.mxu1 %v4243_v61  ;;  %398 = vmatpush.msrb.mxu2 %v94_v50  ;;  %v4577_v50 = vld [vmem:[%s6377_s1 + $0x120] sm:$0xff] }
  0x4b   :  { %263 = vmatmul.f32.gmra.mxu2 %v4410_v29 }
  0x4c   :  { %572 = vmatmul.f32.gmra.mxu3 %v4319_v10 }
  0x51   :  { %191 = vmatmul.f32.gmra.mxu0 %v4256_v63 }
  0x52   :  { %304 = vmatmul.f32.gmra.mxu1 %v4261_v0 }
  0x53   :  { %266 = vmatmul.f32.gmra.mxu2 %v4446_v39 }
  0x54   :  { %575 = vmatmul.f32.gmra.mxu3 %v4343_v14 }
  0x59   :  { %194 = vmatmul.f32.gmra.mxu0 %v4280_v3 }
  0x5a   :  { %307 = vmatmul.f32.gmra.mxu1 %v4285_v4 }
  0x5b   :  { %399 = vmatmul.f32.vlgmr.msrb.gmra.mxu2 %v4127_v35  ;;  %v4510_v35 = vld [vmem:[%s6377_s1 + $0xf0] sm:$0xff] }
  0x5c   :  { %578 = vmatmul.f32.gmra.mxu3 %v4379_v22 }
  0x61   :  { %197 = vmatmul.f32.gmra.mxu0 %v4304_v7 }
  0x62   :  { %310 = vmatmul.f32.gmra.mxu1 %v4309_v8 }
  0x63   :  { %402 = vmatmul.f32.gmra.mxu2 %v4151_v41 }
  0x64   :  { %581 = vmatmul.f32.gmra.mxu3 %v4415_v30 }
  0x69   :  { %200 = vmatmul.f32.gmra.mxu0 %v4328_v11 }
  0x6a   :  { %313 = vmatmul.f32.gmra.mxu1 %v4333_v12 }
  0x6b   :  { %405 = vmatmul.f32.gmra.mxu2 %v4175_v47  ;;  %v3432_v47 = vld [vmem:[%s6378_s2 + $0x108] sm:$0xff] }
  0x6c   :  { %584 = vmatmul.f32.gmra.mxu3 %v4451_v40 }
  0x6d   :  { %1122 = vmatpush.msrb.mxu3 %v3432_v47  ;;  %v3424_v47 = vld [vmem:[%s6378_s2 + $0xc8] sm:$0xff] }
  0x71   :  { %203 = vmatmul.f32.gmra.mxu0 %v4361_v18 }
  0x72   :  { %316 = vmatmul.f32.gmra.mxu1 %v4366_v19 }
  0x73   :  { %408 = vmatmul.f32.gmra.mxu2 %v4199_v53 }
  0x74   :  { %587 = vmatmul.f32.gmra.mxu3 %v4482_v51 }
  0x79   :  { %206 = vmatmul.f32.gmra.mxu0 %v4397_v26 }
  0x7a   :  { %319 = vmatmul.f32.gmra.mxu1 %v4402_v27 }
  0x7b   :  { %411 = vmatmul.f32.gmra.mxu2 %v4220_v57 }
  0x7c   :  { %590 = vmatmul.f32.gmra.mxu3 %v4501_v15 }
  0x81   :  { %209 = vmatmul.f32.gmra.mxu0 %v4433_v34 }
  0x82   :  { %322 = vmatmul.f32.gmra.mxu1 %v4438_v37 }
  0x83   :  { %414 = vmatmul.f32.gmra.mxu2 %v4238_v60 }
  0x84   :  { %593 = vmatmul.f32.gmra.mxu3 %v4515_v16 }
  0x89   :  { %212 = vmatmul.f32.gmra.mxu0 %v4469_v46 }
  0x8a   :  { %325 = vmatmul.f32.gmra.mxu1 %v4474_v49 }
  0x8b   :  { %417 = vmatmul.f32.gmra.mxu2 %v4256_v63 }
  0x8c   :  { %596 = vmatmul.f32.gmra.mxu3 %v4531_v24 }
  0x91   :  { %215 = vmatmul.f32.gmra.mxu0 %v4491_v52 }
  0x92   :  { %328 = vmatmul.f32.gmra.mxu1 %v4496_v55 }
  0x93   :  { %420 = vmatmul.f32.gmra.mxu2 %v4280_v3  ;;  %v4656_v3 = vld [vmem:[%s6377_s1 + $0x160] sm:$0xff] }
  0x94   :  { %599 = vmatmul.f32.gmra.mxu3 %v4559_v33 }
  0x99   :  { %218 = vmatmul.f32.gmra.mxu0 %v4510_v35 }
  0x9a   :  { %331 = vmatmul.f32.gmra.mxu1 %v4212_v56  ;;  %v3431_v56 = vld [vmem:[%s6378_s2 + $0x100] sm:$0xff] }
  0x9b   :  { %1123 = vmatpush.msrb.mxu3 %v3431_v56  ;;  %v3423_v56 = vld [vmem:[%s6378_s2 + $0xc0] sm:$0xff]  ;;  %423 = vmatmul.f32.gmra.mxu2 %v4304_v7 }
  0x9d   :  { %1124 = vmatpush.msrb.mxu3 %v3430_v25  ;;  %v3422_v25 = vld [vmem:[%s6378_s2 + $0xb8] sm:$0xff] }
  0x9e   :  { %v174_v41 = vpop.f32.mrf.mxu0 }
  0x9f   :  { %v287_v17 = vpop.f32.mrf.mxu1  ;;  %1125 = vmatpush.msrb.mxu3 %v3429_v32  ;;  %v3421_v32 = vld [vmem:[%s6378_s2 + $0xb0] sm:$0xff] }
  0xa0   :  { %v4526_v23 = vadd.f32 %v287_v17, %v174_v41  ;;  %v3425_v41 = vld [vmem:[%s6378_s2 + $0xd0] sm:$0xff]  ;;  %v4587_v17 = vld [vmem:[%s6377_s1 + $0x1e8] sm:$0xff] }
  0xa1   :  { %221 = vmatmul.f32.gmra.mxu0 %v4524_v20  ;;  %1126 = vmatpush.msrb.mxu3 %v3428_v38  ;;  %v4615_v38 = vld [vmem:[%s6377_s1 + $0x1f8] sm:$0xff] }
  0xa2   :  { %334 = vmatmul.f32.gmra.mxu1 %v4230_v59  ;;  %602 = vmatmul.f32.gmra.mxu3 %v4587_v17 }
  0xa3   :  { %1127 = vmatpush.msrb.mxu3 %v3427_v43  ;;  %v3420_v43 = vld [vmem:[%s6378_s2 + $0xa8] sm:$0xff]  ;;  %426 = vmatmul.f32.gmra.mxu2 %v4328_v11 }
  0xa4   :  { %v683_v11 = vld [vmem:[%s6379_s3 + $0x48] sm:$0xff] }
  0xa5   :  { %1128 = vmatpush.msrb.mxu3 %v3426_v44  ;;  %v3419_v44 = vld [vmem:[%s6378_s2 + $0xa0] sm:$0xff] }
  0xa6   :  { %v177_v28 = vpop.f32.mrf.mxu0  ;;  %v4666_v7 = vpop.f32.mrf.mxu2 }
  0xa7   :  { %v290_v59 = vpop.f32.mrf.mxu1  ;;  %1129 = vmatpush.msrb.mxu3 %v3425_v41  ;;  %v4633_v41 = vld [vmem:[%s6377_s1 + $0x140] sm:$0xff] }
  0xa8   :  { %v4551_v53 = vadd.f32 %v290_v59, %v177_v28  ;;  %v4605_v59 = vld [vmem:[%s6377_s1 + $0x130] sm:$0xff] }
  0xa9   :  { %224 = vmatmul.f32.gmra.mxu0 %v4549_v31  ;;  %1130 = vmatpush.msrb.mxu3 %v3424_v47  ;;  %v3417_v47 = vld [vmem:[%s6378_s2 + $0x90] sm:$0xff] }
  0xaa   :  { %337 = vmatmul.f32.gmra.mxu1 %v4248_v62  ;;  %605 = vmatmul.f32.gmra.mxu3 %v4615_v38 }
  0xab   :  { %1131 = vmatpush.msrb.mxu3 %v3423_v56  ;;  %429 = vmatmul.f32.gmra.mxu2 %v4361_v18  ;;  %v684_v18 = vld [vmem:[%s6379_s3 + $0x50] sm:$0xff] }
  0xad   :  { %1132 = vmatpush.msrb.mxu3 %v3422_v25 }
  0xae   :  { %v180_v45 = vpop.f32.mrf.mxu0 }
  0xaf   :  { %v293_v62 = vpop.f32.mrf.mxu1  ;;  %1133 = vmatpush.msrb.mxu3 %v3421_v32 }
  0xb0   :  { %v4579_v57 = vadd.f32 %v293_v62, %v180_v45  ;;  %v3418_v45 = vld [vmem:[%s6378_s2 + $0x98] sm:$0xff] }
  0xb1   :  { %227 = vmatmul.f32.gmra.mxu0 %v4577_v50  ;;  %1134 = vmatpush.msrb.mxu3 %v3420_v43 }
  0xb2   :  { %340 = vmatmul.f32.gmra.mxu1 %v4271_v2 }
  0xb3   :  { %1135 = vmatpush.msrb.mxu3 %v3419_v44  ;;  %v3973_v44 = vmov 0   ;;  %432 = vmatmul.f32.gmra.mxu2 %v4397_v26 }
  0xb4   :  { %3842 = vset.pattern.permute.xlu0 %v3973_v44  ;;  %3843 = vset.pattern.permute.xlu1 %v3973_v44 }
  0xb5   :  { %1136 = vmatpush.msrb.mxu3 %v3418_v45  ;;  %3844 = vset.pattern.permute.xlu2 %v3973_v44 }
  0xb6   :  { %v183_v28 = vpop.f32.mrf.mxu0  ;;  %1070 = vperm.xlu1 %3843, %v684_v18  }
  0xb7   :  { %v296_v2 = vpop.f32.mrf.mxu1  ;;  %1137 = vmatpush.msrb.mxu3 %v3417_v47  ;;  %v4681_v47 = vpop.f32.mrf.mxu2 }
  0xb8   :  { %v4607_v60 = vadd.f32 %v296_v2, %v183_v28  ;;  %v4646_v28 = vld [vmem:[%s6377_s1 + $0x150] sm:$0xff] }
  0xb9   :  { %230 = vmatmul.f32.gmra.mxu0 %v4605_v59 }
  0xba   :  { %343 = vmatmul.f32.gmra.mxu1 %v4295_v6 }
  0xbb   :  { %435 = vmatmul.f32.gmra.mxu2 %v4433_v34 }
  0xbe   :  { %v186_v62 = vpop.f32.mrf.mxu0 }
  0xbf   :  { %v299_v6 = vpop.f32.mrf.mxu1 }
  0xc0   :  { %v4635_v63 = vadd.f32 %v299_v6, %v186_v62  ;;  %v4671_v6 = vld [vmem:[%s6377_s1 + $0x170] sm:$0xff] }
  0xc1   :  { %233 = vmatmul.f32.gmra.mxu0 %v4633_v41 }
  0xc2   :  { %346 = vmatmul.f32.gmra.mxu1 %v4319_v10 }
  0xc3   :  { %438 = vmatmul.f32.gmra.mxu2 %v4469_v46 }
  0xc6   :  { %v189_v56 = vpop.f32.mrf.mxu0 }
  0xc7   :  { %v302_v25 = vpop.f32.mrf.mxu1 }
  0xc8   :  { %v4648_v2 = vadd.f32 %v302_v25, %v189_v56 }
  0xc9   :  { %236 = vmatmul.f32.gmra.mxu0 %v4646_v28 }
  0xca   :  { %349 = vmatmul.f32.gmra.mxu1 %v4343_v14  ;;  %v682_v14 = vld [vmem:[%s6379_s3 + $0x40] sm:$0xff] }
  0xcb   :  { %1060 = vperm.xlu0 %3842, %v682_v14   ;;  %441 = vmatmul.f32.gmra.mxu2 %v4491_v52 }
  0xce   :  { %v192_v32 = vpop.f32.mrf.mxu0 }
  0xcf   :  { %v305_v43 = vpop.f32.mrf.mxu1 }
  0xd0   :  { %v4658_v10 = vadd.f32 %v305_v43, %v192_v32  ;;  %v4686_v32 = vld [vmem:[%s6377_s1 + $0x180] sm:$0xff] }
  0xd1   :  { %239 = vmatmul.f32.gmra.mxu0 %v4656_v3 }
  0xd2   :  { %352 = vmatmul.f32.gmra.mxu1 %v4379_v22 }
  0xd3   :  { %1065 = vperm.xlu0 %3842, %v683_v11   ;;  %444 = vmatmul.f32.gmra.mxu2 %v4510_v35  ;;  %v689_v35 = vld [vmem:[%s6379_s3 + $0x78] sm:$0xff] }
  0xd6   :  { %v195_v45 = vpop.f32.mrf.mxu0 }
  0xd7   :  { %v308_v62 = vpop.f32.mrf.mxu1 }
  0xd8   :  { %v4673_v22 = vadd.f32 %v308_v62, %v195_v45 }
  0xd9   :  { %242 = vmatmul.f32.gmra.mxu0 %v4671_v6 }
  0xda   :  { %355 = vmatmul.f32.gmra.mxu1 %v4415_v30  ;;  %v4694_v30 = vpop.f32.mrf.mxu2 }
  0xdb   :  { %447 = vmatmul.f32.gmra.mxu2 %v4524_v20  ;;  %v687_v20 = vld [vmem:[%s6379_s3 + $0x68] sm:$0xff] }
  0xde   :  { %v198_v56 = vpop.f32.mrf.mxu0 }
  0xdf   :  { %v311_v25 = vpop.f32.mrf.mxu1 }
  0xe0   :  { %v312_v43 = vadd.f32 %v311_v25, %v198_v56 }
  0xe1   :  { %245 = vmatmul.f32.gmra.mxu0 %v4686_v32 }
  0xe2   :  { %358 = vmatmul.f32.gmra.mxu1 %v4451_v40  ;;  %1138 = vmatmul.f32.vlgmr.msrb.gmra.mxu3 %v312_v43  ;;  %v685_v40 = vld [vmem:[%s6379_s3 + $0x58] sm:$0xff]  ;;  %v4702_v62 = vpop.f32.mrf.mxu2 }
  0xe3   :  { %1075 = vperm.xlu1 %3843, %v685_v40   ;;  %v678_v40 = vld [vmem:[%s6379_s3 + $0x20] sm:$0xff]  ;;  %450 = vmatmul.f32.gmra.mxu2 %v4549_v31 }
  0xe6   :  { %v201_v44 = vpop.f32.mrf.mxu0 }
  0xe7   :  { %v314_v14 = vpop.f32.mrf.mxu1 }
  0xe8   :  { %v315_v45 = vadd.f32 %v314_v14, %v201_v44 }
  0xe9   :  { %512 = vmatmul.f32.vlgmr.msrb.gmra.mxu0 %v4132_v36 }
  0xea   :  { %361 = vmatmul.f32.gmra.mxu1 %v4482_v51  ;;  %1141 = vmatmul.f32.gmra.mxu3 %v315_v45  ;;  %v4707_v43 = vpop.f32.mrf.mxu2 }
  0xeb   :  { %1095 = vperm.xlu1 %3843, %v689_v35   ;;  %453 = vmatmul.f32.gmra.mxu2 %v4577_v50  ;;  %v753_v50 = vld [vmem:[%s6378_s2 + $0x78] sm:$0xff] }
  0xec   :  { %820 = vmatpush.msra.mxu0 %v753_v50  ;;  %v701_v50 = vld [vmem:[%s6379_s3 + $0xd8] sm:$0xff] }
  0xee   :  { %v204_v26 = vpop.f32.mrf.mxu0 }
  0xef   :  { %v317_v11 = vpop.f32.mrf.mxu1 }
  0xf0   :  { %v318_v56 = vadd.f32 %v317_v11, %v204_v26 }
  0xf1   :  { %515 = vmatmul.f32.gmra.mxu0 %v4156_v42  ;;  %v688_v42 = vld [vmem:[%s6379_s3 + $0x70] sm:$0xff] }
  0xf2   :  { %364 = vmatmul.f32.gmra.mxu1 %v4501_v15  ;;  %1144 = vmatmul.f32.gmra.mxu3 %v318_v56  ;;  %v4712_v44 = vpop.f32.mrf.mxu2 }
  0xf3   :  { %1090 = vperm.xlu0 %3842, %v688_v42   ;;  %456 = vmatmul.f32.gmra.mxu2 %v4605_v59  ;;  %v751_v42 = vld [vmem:[%s6378_s2 + $0x68] sm:$0xff] }
  0xf4   :  { %v679_v59 = vld [vmem:[%s6379_s3 + $0x28] sm:$0xff] }
  0xf6   :  { %v207_v36 = vpop.f32.mrf.mxu0 }
  0xf7   :  { %v320_v51 = vpop.f32.mrf.mxu1 }
  0xf8   :  { %v321_v25 = vadd.f32 %v320_v51, %v207_v36 }
  0xf9   :  { %518 = vmatmul.f32.gmra.mxu0 %v4180_v48 }
  0xfa   :  { %367 = vmatmul.f32.gmra.mxu1 %v4515_v16  ;;  %1147 = vmatmul.f32.gmra.mxu3 %v321_v25  ;;  %v4720_v16 = vpop.f32.mrf.mxu2 }
  0xfb   :  { %459 = vmatmul.f32.gmra.mxu2 %v4633_v41  ;;  %v746_v41 = vld [vmem:[%s6378_s2 + $0x40] sm:$0xff] }
  0xfe   :  { %v210_v34 = vpop.f32.mrf.mxu0 }
  0xff   :  { %v323_v18 = vpop.f32.mrf.mxu1 }
 0x100   :  { %v324_v15 = vadd.f32 %v323_v18, %v210_v34  ;;  %v752_v18 = vld [vmem:[%s6378_s2 + $0x70] sm:$0xff] }
 0x101   :  { %521 = vmatmul.f32.gmra.mxu0 %v4204_v54  ;;  %v675_v54 = vld [vmem:[%s6379_s3 + $0x8] sm:$0xff] }
 0x102   :  { %370 = vmatmul.f32.gmra.mxu1 %v4531_v24  ;;  %1150 = vmatmul.f32.gmra.mxu3 %v324_v15  ;;  %v686_v24 = vld [vmem:[%s6379_s3 + $0x60] sm:$0xff]  ;;  %v4734_v45 = vpop.f32.mrf.mxu2 }
 0x103   :  { %763 = vperm.xlu0 %3842, %v675_v54   ;;  %1080 = vperm.xlu2 %3844, %v686_v24   ;;  %v695_v54 = vld [vmem:[%s6379_s3 + $0xa8] sm:$0xff]  ;;  %v749_v24 = vld [vmem:[%s6378_s2 + $0x58] sm:$0xff] }
 0x104   :  { %821 = vmatpush.msra.mxu0 %v752_v18  ;;  %462 = vmatmul.f32.gmra.mxu2 %v4646_v28  ;;  %v742_v28 = vld [vmem:[%s6378_s2 + $0x20] sm:$0xff]  ;;  %v741_v18 = vld [vmem:[%s6378_s2 + $0x18] sm:$0xff] }
 0x106   :  { %v213_v48 = vpop.f32.mrf.mxu0  ;;  %822 = vmatpush.msra.mxu0 %v751_v42  ;;  %v739_v42 = vld [vmem:[%s6378_s2 + $0x8] sm:$0xff] }
 0x107   :  { %v326_v46 = vpop.f32.mrf.mxu1 }
 0x108   :  { %v327_v52 = vadd.f32 %v326_v46, %v213_v48 }
 0x109   :  { %524 = vmatmul.f32.gmra.mxu0 %v4225_v58 }
 0x10a   :  { %373 = vmatmul.f32.gmra.mxu1 %v4559_v33  ;;  %1153 = vmatmul.f32.gmra.mxu3 %v327_v52  ;;  %v4745_v36 = vpop.f32.mrf.mxu2  ;;  %v750_v52 = vld [vmem:[%s6378_s2 + $0x60] sm:$0xff] }
 0x10b   :  { %778 = vperm.xlu0 %3842, %v678_v40   ;;  %1085 = vperm.xlu2 %3844, %v687_v20   ;;  %v681_v20 = vld [vmem:[%s6379_s3 + $0x38] sm:$0xff] }
 0x10c   :  { %823 = vmatpush.msra.mxu0 %v750_v52  ;;  %465 = vmatmul.f32.gmra.mxu2 %v4656_v3  ;;  %v738_v3 = vld [vmem:[%s6378_s2] sm:$0xff] }
 0x10e   :  { %v216_v33 = vpop.f32.mrf.mxu0  ;;  %824 = vmatpush.msra.mxu0 %v749_v24  ;;  %v674_v24 = vld [vmem:[%s6379_s3] sm:$0xff] }
 0x10f   :  { %v329_v58 = vpop.f32.mrf.mxu1 }
 0x110   :  { %v330_v14 = vadd.f32 %v329_v58, %v216_v33  ;;  %v747_v58 = vld [vmem:[%s6378_s2 + $0x48] sm:$0xff] }
 0x111   :  { %527 = vmatmul.f32.gmra.mxu0 %v4243_v61  ;;  %v690_v61 = vld [vmem:[%s6379_s3 + $0x80] sm:$0xff] }
 0x112   :  { %376 = vmatmul.f32.gmra.mxu1 %v4587_v17  ;;  %1156 = vmatmul.f32.gmra.mxu3 %v330_v14  ;;  %v4752_v17 = vpop.f32.mrf.mxu3  ;;  %v4757_v34 = vpop.f32.mrf.mxu2 }
 0x113   :  { %1782 = vperm.xlu0 %3842, %v690_v61   ;;  %758 = vperm.xlu2 %3844, %v674_v24   ;;  %v2857_v24 = vld [vmem:[%s6380_s6 + $0xc0] sm:$0xff] }
 0x114   :  { %468 = vmatmul.f32.gmra.mxu2 %v4671_v6  ;;  %v677_v6 = vld [vmem:[%s6379_s3 + $0x18] sm:$0xff] }
 0x116   :  { %v219_v26 = vpop.f32.mrf.mxu0 }
 0x117   :  { %v332_v11 = vpop.f32.mrf.mxu1 }
 0x118   :  { %v333_v56 = vadd.f32 %v332_v11, %v219_v26  ;;  %v698_v26 = vld [vmem:[%s6379_s3 + $0xc0] sm:$0xff]  ;;  %v745_v11 = vld [vmem:[%s6378_s2 + $0x38] sm:$0xff] }
 0x119   :  { %530 = vmatmul.f32.gmra.mxu0 %v4261_v0  ;;  %v676_v0 = vld [vmem:[%s6379_s3 + $0x10] sm:$0xff] }
 0x11a   :  { %379 = vmatmul.f32.gmra.mxu1 %v4615_v38  ;;  %1159 = vmatmul.f32.gmra.mxu3 %v333_v56  ;;  %v692_v38 = vld [vmem:[%s6379_s3 + $0x90] sm:$0xff]  ;;  %v4776_v46 = vpop.f32.mrf.mxu2 }
 0x11b   :  { %768 = vperm.xlu1 %3843, %v676_v0   ;;  %1792 = vperm.xlu0 %3842, %v692_v38   ;;  %v693_v38 = vld [vmem:[%s6379_s3 + $0x98] sm:$0xff] }
 0x11c   :  { %471 = vmatmul.f32.gmra.mxu2 %v4686_v32  ;;  %773 = vperm.xlu2 %3844, %v677_v6   ;;  %v702_v32 = vld [vmem:[%s6379_s3 + $0xe0] sm:$0xff] }
 0x11e   :  { %v222_v31 = vpop.f32.mrf.mxu0 }
 0x11f   :  { %v335_v51 = vpop.f32.mrf.mxu1 }
 0x120   :  { %v4755_v25 = vadd.f32 %v335_v51, %v222_v31  ;;  %v743_v31 = vld [vmem:[%s6378_s2 + $0x28] sm:$0xff] }
 0x121   :  { %533 = vmatmul.f32.gmra.mxu0 %v4285_v4 }
 0x122   :  { %v4798_v40 = vpop.f32.mrf.mxu2 }
 0x123   :  { %783 = vperm.xlu1 %3843, %v679_v59   ;;  %1807 = vperm.xlu0 %3842, %v695_v54   ;;  %v696_v59 = vld [vmem:[%s6379_s3 + $0xb0] sm:$0xff] }
 0x124   :  { %v704_v54 = vld [vmem:[%s6379_s3 + $0xf0] sm:$0xff]  ;;  %474 = vmatmul.f32.gmra.mxu2 %v4266_v1  ;;  %v691_v1 = vld [vmem:[%s6379_s3 + $0x88] sm:$0xff] }
 0x126   :  { %v225_v4 = vpop.f32.mrf.mxu0 }
 0x127   :  { %v338_v15 = vpop.f32.mrf.mxu1 }
 0x128   :  { %v339_v48 = vadd.f32 %v338_v15, %v225_v4 }
 0x129   :  { %536 = vmatmul.f32.gmra.mxu0 %v4309_v8  ;;  %v748_v8 = vld [vmem:[%s6378_s2 + $0x50] sm:$0xff] }
 0x12a   :  { %644 = vst [vmem:[#allocation2 + $0x110] sm:$0xff] %v339_v48  ;;  %825 = vmatpush.msra.mxu0 %v748_v8  ;;  %v4820_v0 = vpop.f32.mrf.mxu2 }
 0x12b   :  { %793 = vperm.xlu1 %3843, %v681_v20   ;;  %2326 = vperm.xlu0 %3842, %v698_v26  }
 0x12c   :  { %826 = vmatpush.msra.mxu0 %v747_v58  ;;  %v699_v58 = vld [vmem:[%s6379_s3 + $0xc8] sm:$0xff]  ;;  %477 = vmatmul.f32.gmra.mxu2 %v4290_v5  ;;  %v694_v5 = vld [vmem:[%s6379_s3 + $0xa0] sm:$0xff] }
 0x12e   :  { %v228_v35 = vpop.f32.mrf.mxu0  ;;  %827 = vmatpush.msra.mxu0 %v746_v41 }
 0x12f   :  { %v341_v33 = vpop.f32.mrf.mxu1 }
 0x130   :  { %v342_v14 = vadd.f32 %v341_v33, %v228_v35  ;;  %828 = vmatpush.msra.mxu0 %v745_v11 }
 0x131   :  { %539 = vmatmul.f32.gmra.mxu0 %v4333_v12  ;;  %v744_v12 = vld [vmem:[%s6378_s2 + $0x30] sm:$0xff] }
 0x132   :  { %646 = vst [vmem:[#allocation2 + $0x120] sm:$0xff] %v342_v14  ;;  %829 = vmatpush.msra.mxu0 %v744_v12  ;;  %v4842_v52 = vpop.f32.mrf.mxu2  ;;  %v2863_v14 = vld [vmem:[%s6380_s6 + $0xf0] sm:$0xff]  ;;  %v754_v12 = vld [vmem:[%s6378_s2 + $0x80] sm:$0xff] }
 0x133   :  { %1797 = vperm.xlu1 %3843, %v693_v38   ;;  %2341 = vperm.xlu0 %3842, %v701_v50   ;;  %v705_v38 = vld [vmem:[%s6379_s3 + $0xf8] sm:$0xff] }
 0x134   :  { %830 = vmatpush.msra.mxu0 %v743_v31  ;;  %v2860_v50 = vld [vmem:[%s6380_s6 + $0xd8] sm:$0xff]  ;;  %480 = vmatmul.f32.gmra.mxu2 %v4314_v9  ;;  %v2861_v9 = vld [vmem:[%s6380_s6 + $0xe0] sm:$0xff] }
 0x136   :  { %v231_v56 = vpop.f32.mrf.mxu0  ;;  %831 = vmatpush.msra.mxu0 %v742_v28 }
 0x137   :  { %v344_v61 = vpop.f32.mrf.mxu1 }
 0x138   :  { %v345_v51 = vadd.f32 %v344_v61, %v231_v56  ;;  %832 = vmatpush.msra.mxu0 %v741_v18  ;;  %v2847_v56 = vld [vmem:[%s6380_s6 + $0x70] sm:$0xff] }
 0x139   :  { %542 = vmatmul.f32.gmra.mxu0 %v4366_v19  ;;  %v740_v19 = vld [vmem:[%s6378_s2 + $0x10] sm:$0xff] }
 0x13a   :  { %648 = vst [vmem:[#allocation2 + $0x130] sm:$0xff] %v345_v51  ;;  %833 = vmatpush.msra.mxu0 %v740_v19  ;;  %v4858_v33 = vpop.f32.mrf.mxu2  ;;  %v680_v61 = vld [vmem:[%s6379_s3 + $0x30] sm:$0xff] }
 0x13b   :  { %1812 = vperm.xlu1 %3843, %v696_v59   ;;  %2356 = vperm.xlu0 %3842, %v704_v54  }
 0x13c   :  { %834 = vmatpush.msra.mxu0 %v739_v42  ;;  %788 = vperm.xlu2 %3844, %v680_v61   ;;  %v2844_v42 = vld [vmem:[%s6380_s6 + $0x58] sm:$0xff] }
 0x13d   :  { %483 = vmatmul.f32.gmra.mxu2 %v4338_v13  ;;  %v2845_v13 = vld [vmem:[%s6380_s6 + $0x60] sm:$0xff] }
 0x13e   :  { %v234_v4 = vpop.f32.mrf.mxu0  ;;  %835 = vmatpush.msra.mxu0 %v738_v3 }
 0x13f   :  { %v347_v15 = vpop.f32.mrf.mxu1 }
 0x140   :  { %v348_v48 = vadd.f32 %v347_v15, %v234_v4  ;;  %v2848_v15 = vld [vmem:[%s6380_s6 + $0x78] sm:$0xff] }
 0x141   :  { %545 = vmatmul.f32.gmra.mxu0 %v4402_v27 }
 0x142   :  { %650 = vst [vmem:[#allocation2 + $0x140] sm:$0xff] %v348_v48  ;;  %v4874_v11 = vpop.f32.mrf.mxu2 }
 0x143   :  { %2331 = vperm.xlu1 %3843, %v699_v58   ;;  %3017 = vperm.xlu0 %3842, %v2863_v14   ;;  %v4936_v58 = vpop.f32.mrf.mxu3 }
 0x144   :  { %1787 = vperm.xlu2 %3844, %v691_v1  }
 0x145   :  { %486 = vmatmul.f32.gmra.mxu2 %v4374_v21  ;;  %v2858_v21 = vld [vmem:[%s6380_s6 + $0xc8] sm:$0xff] }
 0x146   :  { %v237_v8 = vpop.f32.mrf.mxu0 }
 0x147   :  { %v350_v27 = vpop.f32.mrf.mxu1 }
 0x148   :  { %v351_v35 = vadd.f32 %v350_v27, %v237_v8 }
 0x149   :  { %548 = vmatmul.f32.gmra.mxu0 %v4438_v37  ;;  %v755_v37 = vld [vmem:[%s6378_s2 + $0x88] sm:$0xff] }
 0x14a   :  { %652 = vst [vmem:[#allocation2 + $0x150] sm:$0xff] %v351_v35  ;;  %875 = vmatpush.msrb.mxu1 %v755_v37  ;;  %v4890_v28 = vpop.f32.mrf.mxu2 }
 0x14b   :  { %2346 = vperm.xlu1 %3843, %v702_v32   ;;  %2937 = vperm.xlu0 %3842, %v2847_v56  }
 0x14c   :  { %876 = vmatpush.msrb.mxu1 %v754_v12  ;;  %1802 = vperm.xlu2 %3844, %v694_v5   ;;  %v4967_v12 = vpop.f32.mrf.mxu3 }
 0x14d   :  { %489 = vmatmul.f32.gmra.mxu2 %v4410_v29  ;;  %v2842_v29 = vld [vmem:[%s6380_s6 + $0x48] sm:$0xff] }
 0x14e   :  { %v240_v41 = vpop.f32.mrf.mxu0 }
 0x14f   :  { %v353_v20 = vpop.f32.mrf.mxu1 }
 0x150   :  { %v354_v26 = vadd.f32 %v353_v20, %v240_v41 }
 0x151   :  { %551 = vmatmul.f32.gmra.mxu0 %v4474_v49 }
 0x152   :  { %654 = vst [vmem:[#allocation2 + $0x160] sm:$0xff] %v354_v26  ;;  %v4903_v4 = vpop.f32.mrf.mxu2 }
 0x153   :  { %2361 = vperm.xlu1 %3843, %v705_v38   ;;  %3002 = vperm.xlu0 %3842, %v2860_v50  }
 0x155   :  { %492 = vmatmul.f32.gmra.mxu2 %v4446_v39  ;;  %v2855_v39 = vld [vmem:[%s6380_s6 + $0xb0] sm:$0xff] }
 0x156   :  { %v243_v31 = vpop.f32.mrf.mxu0 }
 0x157   :  { %v356_v49 = vpop.f32.mrf.mxu1 }
 0x158   :  { %v357_v51 = vadd.f32 %v356_v49, %v243_v31 }
 0x159   :  { %554 = vmatmul.f32.gmra.mxu0 %v4496_v55 }
 0x15a   :  { %656 = vst [vmem:[#allocation2 + $0x170] sm:$0xff] %v357_v51  ;;  %v4918_v54 = vpop.f32.mrf.mxu2 }
 0x15b   :  { %2942 = vperm.xlu1 %3843, %v2848_v15   ;;  %2922 = vperm.xlu0 %3842, %v2844_v42   ;;  %v3434_v15 = vld [vmem:[%s6378_s2 + $0x118] sm:$0xff] }
 0x15c   :  { %1177 = vmatpush.msrb.mxu0 %v3434_v15 }
 0x15e   :  { %v246_v18 = vpop.f32.mrf.mxu0 }
 0x15f   :  { %v359_v19 = vpop.f32.mrf.mxu1 }
 0x160   :  { %v360_v55 = vadd.f32 %v359_v19, %v246_v18 }
 0x161   :  { %836 = vmatmul.f32.vlgmr.msra.gmra.mxu0 %v4526_v23 }
 0x162   :  { %658 = vst [vmem:[#allocation2 + $0x180] sm:$0xff] %v360_v55  ;;  %v4934_v35 = vpop.f32.mrf.mxu2 }
 0x163   :  { %3007 = vperm.xlu1 %3843, %v2861_v9   ;;  %2987 = vperm.xlu0 %3842, %v2857_v24   ;;  %v2839_v24 = vld [vmem:[%s6380_s6 + $0x30] sm:$0xff] }
 0x166   :  { %v513_v3 = vpop.f32.mrf.mxu0 }
 0x167   :  { %v362_v48 = vpop.f32.mrf.mxu1  ;;  %v514_v59 = vadd.f32 %v513_v3, %v4734_v45 }
 0x168   :  { %v363_v23 = vadd.f32 %v362_v48, %v4666_v7  ;;  %v697_v7 = vld [vmem:[%s6379_s3 + $0xb8] sm:$0xff] }
 0x169   :  { %839 = vmatmul.f32.gmra.mxu0 %v4551_v53  ;;  %611 = vst.msk [vmem:[#allocation2 + $0x8] sm:$0xff] %vm610_vm0, %v514_v59  ;;  %1817 = vperm.xlu2 %3844, %v697_v7   ;;  %v3433_v59 = vld [vmem:[%s6378_s2 + $0x110] sm:$0xff] }
 0x16a   :  { %660 = vst [vmem:[#allocation2 + $0x190] sm:$0xff] %v363_v23  ;;  %v4953_v37 = vpop.f32.mrf.mxu2  ;;  %1178 = vmatpush.msrb.mxu0 %v3433_v59  ;;  %v5117_v59 = vld [vmem:[%s6381_s4 + $0x70] sm:$0xff] }
 0x16b   :  { %2927 = vperm.xlu1 %3843, %v2845_v13   ;;  %v2833_v13 = vld [vmem:[%s6380_s6] sm:$0xff] }
 0x16e   :  { %v516_v45 = vpop.f32.mrf.mxu0 }
 0x16f   :  { %v365_v53 = vpop.f32.mrf.mxu1  ;;  %v517_v27 = vadd.f32 %v516_v45, %v4745_v36  ;;  %v700_v36 = vld [vmem:[%s6379_s3 + $0xd0] sm:$0xff] }
 0x170   :  { %v366_v8 = vadd.f32 %v365_v53, %v4681_v47  ;;  %v723_v14 = vld [vmem:[#allocation2 + $0x8] sm:$0xff]  ;;  %v2841_v47 = vld [vmem:[%s6380_s6 + $0x40] sm:$0xff] }
 0x171   :  { %842 = vmatmul.f32.gmra.mxu0 %v4579_v57  ;;  %613 = vst.msk [vmem:[#allocation2 + $0x18] sm:$0xff] %vm610_vm0, %v517_v27  ;;  %3401 = vmatmul.msk.f32.vlgmr.msrb.gmra.mxu1 %vm610_vm0, %v723_v14  ;;  %v2852_v14 = vld [vmem:[%s6380_s6 + $0x98] sm:$0xff] }
 0x172   :  { %662 = vst [vmem:[#allocation2 + $0x1a0] sm:$0xff] %v366_v8  ;;  %2907 = vperm.xlu0 %3842, %v2841_v47   ;;  %2336 = vperm.xlu2 %3844, %v700_v36   ;;  %v4972_v31 = vpop.f32.mrf.mxu2 }
 0x173   :  { %2992 = vperm.xlu1 %3843, %v2858_v21  }
 0x176   :  { %v519_v6 = vpop.f32.mrf.mxu0 }
 0x177   :  { %v368_v57 = vpop.f32.mrf.mxu1  ;;  %v520_v20 = vadd.f32 %v519_v6, %v4757_v34  ;;  %v703_v34 = vld [vmem:[%s6379_s3 + $0xe8] sm:$0xff] }
 0x178   :  { %v369_v41 = vadd.f32 %v368_v57, %v4694_v30  ;;  %v725_v26 = vld [vmem:[#allocation2 + $0x18] sm:$0xff]  ;;  %v2854_v30 = vld [vmem:[%s6380_s6 + $0xa8] sm:$0xff] }
 0x179   :  { %845 = vmatmul.f32.gmra.mxu0 %v4607_v60  ;;  %615 = vst.msk [vmem:[#allocation2 + $0x28] sm:$0xff] %vm610_vm0, %v520_v20  ;;  %3402 = vmatmul.msk.f32.gmra.mxu1 %vm610_vm0, %v725_v26  ;;  %v2843_v20 = vld [vmem:[%s6380_s6 + $0x50] sm:$0xff] }
 0x17a   :  { %664 = vst [vmem:[#allocation2 + $0x1b0] sm:$0xff] %v369_v41  ;;  %2972 = vperm.xlu0 %3842, %v2854_v30   ;;  %2351 = vperm.xlu2 %3844, %v703_v34   ;;  %v445_v18 = vpop.f32.mrf.mxu2  ;;  %v2836_v41 = vld [vmem:[%s6380_s6 + $0x18] sm:$0xff] }
 0x17b   :  { %2912 = vperm.xlu1 %3843, %v2842_v29   ;;  %v559_v19 = vadd.f32 %v4752_v17, %v445_v18  ;;  %v2862_v17 = vld [vmem:[%s6380_s6 + $0xe8] sm:$0xff] }
 0x17d   :  { %641 = vst.msk [vmem:[#allocation2 + $0xf8] sm:$0xff] %vm610_vm0, %v559_v19 }
 0x17e   :  { %v522_v32 = vpop.f32.mrf.mxu0 }
 0x17f   :  { %v371_v60 = vpop.f32.mrf.mxu1  ;;  %v523_v61 = vadd.f32 %v522_v32, %v4776_v46  ;;  %v2864_v46 = vld [vmem:[%s6380_s6 + $0xf8] sm:$0xff] }
 0x180   :  { %v372_v56 = vadd.f32 %v371_v60, %v4702_v62  ;;  %v727_v49 = vld [vmem:[#allocation2 + $0x28] sm:$0xff]  ;;  %v2849_v60 = vld [vmem:[%s6380_s6 + $0x80] sm:$0xff]  ;;  %v2856_v32 = vld [vmem:[%s6380_s6 + $0xb8] sm:$0xff] }
 0x181   :  { %848 = vmatmul.f32.gmra.mxu0 %v4635_v63  ;;  %617 = vst.msk [vmem:[#allocation2 + $0x38] sm:$0xff] %vm610_vm0, %v523_v61  ;;  %3403 = vmatmul.msk.f32.gmra.mxu1 %vm610_vm0, %v727_v49  ;;  %v2838_v62 = vld [vmem:[%s6380_s6 + $0x28] sm:$0xff]  ;;  %v4987_v63 = vpop.f32.mrf.mxu3 }
 0x182   :  { %666 = vst [vmem:[#allocation2 + $0x1c0] sm:$0xff] %v372_v56  ;;  %2892 = vperm.xlu0 %3842, %v2838_v62   ;;  %3022 = vperm.xlu2 %3844, %v2864_v46   ;;  %v448_v48 = vpop.f32.mrf.mxu2  ;;  %v2840_v46 = vld [vmem:[%s6380_s6 + $0x38] sm:$0xff] }
 0x183   :  { %2977 = vperm.xlu1 %3843, %v2855_v39   ;;  %v562_v23 = vadd.f32 %v4936_v58, %v448_v48  ;;  %v3559_v39 = vld [vmem:[%s6378_s2 + $0x180] sm:$0xff] }
 0x184   :  { %v3555_v48 = vld [vmem:[%s6378_s2 + $0x160] sm:$0xff] }
 0x185   :  { %643 = vst.msk [vmem:[#allocation2 + $0x108] sm:$0xff] %vm610_vm0, %v562_v23 }
 0x186   :  { %v525_v38 = vpop.f32.mrf.mxu0 }
 0x187   :  { %v374_v51 = vpop.f32.mrf.mxu1  ;;  %v526_v1 = vadd.f32 %v525_v38, %v4798_v40  ;;  %v3560_v38 = vld [vmem:[%s6378_s2 + $0x188] sm:$0xff] }
 0x188   :  { %v375_v50 = vadd.f32 %v374_v51, %v4707_v43  ;;  %v729_v55 = vld [vmem:[#allocation2 + $0x38] sm:$0xff]  ;;  %v2851_v43 = vld [vmem:[%s6380_s6 + $0x90] sm:$0xff] }
 0x189   :  { %851 = vmatmul.f32.gmra.mxu0 %v4648_v2  ;;  %619 = vst.msk [vmem:[#allocation2 + $0x48] sm:$0xff] %vm610_vm0, %v526_v1  ;;  %3404 = vmatmul.msk.f32.gmra.mxu1 %vm610_vm0, %v729_v55  ;;  %v570_v3 = vpop.f32.mrf.mxu3  ;;  %v3561_v51 = vld [vmem:[%s6378_s2 + $0x190] sm:$0xff] }
 0x18a   :  { %668 = vst [vmem:[#allocation2 + $0x1d0] sm:$0xff] %v375_v50  ;;  %2957 = vperm.xlu0 %3842, %v2851_v43   ;;  %3012 = vperm.xlu2 %3844, %v2862_v17   ;;  %v451_v8 = vpop.f32.mrf.mxu2  ;;  %v2853_v43 = vld [vmem:[%s6380_s6 + $0xa0] sm:$0xff]  ;;  %v3557_v17 = vld [vmem:[%s6378_s2 + $0x170] sm:$0xff] }
 0x18b   :  { %2897 = vperm.xlu1 %3843, %v2839_v24   ;;  %v565_v27 = vadd.f32 %v4967_v12, %v451_v8 }
 0x18d   :  { %645 = vst.msk [vmem:[#allocation2 + $0x118] sm:$0xff] %vm610_vm0, %v565_v27  ;;  %v5149_v27 = vld [vmem:[%s6381_s4 + $0x58] sm:$0xff] }
 0x18e   :  { %v528_v40 = vpop.f32.mrf.mxu0 }
 0x18f   :  { %v377_v2 = vpop.f32.mrf.mxu1  ;;  %v529_v5 = vadd.f32 %v528_v40, %v4820_v0  ;;  %v2846_v0 = vld [vmem:[%s6380_s6 + $0x68] sm:$0xff] }
 0x190   :  { %v378_v42 = vadd.f32 %v377_v2, %v4712_v44  ;;  %v731_v9 = vld [vmem:[#allocation2 + $0x48] sm:$0xff]  ;;  %v2835_v44 = vld [vmem:[%s6380_s6 + $0x10] sm:$0xff] }
 0x191   :  { %854 = vmatmul.f32.gmra.mxu0 %v4658_v10  ;;  %621 = vst.msk [vmem:[#allocation2 + $0x58] sm:$0xff] %vm610_vm0, %v529_v5  ;;  %3405 = vmatmul.msk.f32.gmra.mxu1 %vm610_vm0, %v731_v9  ;;  %v573_v47 = vpop.f32.mrf.mxu3  ;;  %v3556_v40 = vld [vmem:[%s6378_s2 + $0x168] sm:$0xff]  ;;  %v5103_v5 = vld [vmem:[%s6381_s4 + $0x78] sm:$0xff] }
 0x192   :  { %670 = vst [vmem:[#allocation2 + $0x1e0] sm:$0xff] %v378_v42  ;;  %2877 = vperm.xlu0 %3842, %v2835_v44   ;;  %2932 = vperm.xlu2 %3844, %v2846_v0   ;;  %v454_v36 = vpop.f32.mrf.mxu2  ;;  %v3554_v9 = vld [vmem:[%s6378_s2 + $0x158] sm:$0xff]  ;;  %v5128_v44 = vld [vmem:[%s6381_s4 + $0x68] sm:$0xff]  ;;  %v3553_v0 = vld [vmem:[%s6378_s2 + $0x150] sm:$0xff] }
 0x193   :  { %2962 = vperm.xlu1 %3843, %v2852_v14   ;;  %v568_v57 = vadd.f32 %v4987_v63, %v454_v36  ;;  %v3562_v63 = vld [vmem:[%s6378_s2 + $0x198] sm:$0xff]  ;;  %950 = vmatpush.msra.mxu2 %v5103_v5 }
 0x194   :  { %1844 = vmatpush.msra.mxu0 %v3562_v63  ;;  %1252 = vmatpush.msra.mxu1 %v5103_v5  ;;  %v5239_v63 = vpop.permute.xlu0 %1060 }
 0x195   :  { %647 = vst.msk [vmem:[#allocation2 + $0x128] sm:$0xff] %vm610_vm0, %v568_v57  ;;  %951 = vmatpush.msra.mxu2 %v5117_v59 }
 0x196   :  { %v531_v7 = vpop.f32.mrf.mxu0  ;;  %1845 = vmatpush.msra.mxu0 %v3561_v51  ;;  %1253 = vmatpush.msra.mxu1 %v5117_v59  ;;  %v5252_v51 = vpop.permute.xlu2 %1080 }
 0x197   :  { %v380_v10 = vpop.f32.mrf.mxu1  ;;  %v532_v45 = vadd.f32 %v531_v7, %v4842_v52  ;;  %952 = vmatpush.msra.mxu2 %v5128_v44  ;;  %v5139_v7 = vld [vmem:[%s6381_s4 + $0x60] sm:$0xff] }
 0x198   :  { %v381_v53 = vadd.f32 %v380_v10, %v4720_v16  ;;  %v733_v58 = vld [vmem:[#allocation2 + $0x58] sm:$0xff]  ;;  %v2859_v16 = vld [vmem:[%s6380_s6 + $0xd0] sm:$0xff]  ;;  %1846 = vmatpush.msra.mxu0 %v3560_v38  ;;  %1254 = vmatpush.msra.mxu1 %v5128_v44 }
 0x199   :  { %857 = vmatmul.f32.gmra.mxu0 %v4673_v22  ;;  %623 = vst.msk [vmem:[#allocation2 + $0x68] sm:$0xff] %vm610_vm0, %v532_v45  ;;  %3406 = vmatmul.msk.f32.gmra.mxu1 %vm610_vm0, %v733_v58  ;;  %v3551_v58 = vld [vmem:[%s6378_s2 + $0x140] sm:$0xff] }
 0x19a   :  { %672 = vst [vmem:[#allocation2 + $0x1f0] sm:$0xff] %v381_v53  ;;  %2867 = vperm.xlu0 %3842, %v2833_v13   ;;  %2997 = vperm.xlu2 %3844, %v2859_v16   ;;  %v457_v30 = vpop.f32.mrf.mxu2  ;;  %v3552_v53 = vld [vmem:[%s6378_s2 + $0x148] sm:$0xff]  ;;  %v3550_v16 = vld [vmem:[%s6378_s2 + $0x138] sm:$0xff] }
 0x19b   :  { %2882 = vperm.xlu1 %3843, %v2836_v41   ;;  %v571_v12 = vadd.f32 %v570_v3, %v457_v30  ;;  %1847 = vmatpush.msra.mxu0 %v3559_v39  ;;  %v3548_v41 = vld [vmem:[%s6378_s2 + $0x128] sm:$0xff]  ;;  %v5196_v30 = vld [vmem:[%s6381_s4 + $0x38] sm:$0xff] }
 0x19c   :  { %953 = vmatpush.msra.mxu2 %v5139_v7  ;;  %1255 = vmatpush.msra.mxu1 %v5139_v7  ;;  %v5277_v39 = vpop.permute.xlu0 %1065 }
 0x19d   :  { %649 = vst.msk [vmem:[#allocation2 + $0x138] sm:$0xff] %vm610_vm0, %v571_v12  ;;  %v5211_v12 = vld [vmem:[%s6381_s4 + $0x30] sm:$0xff] }
 0x19e   :  { %v534_v22 = vpop.f32.mrf.mxu0  ;;  %954 = vmatpush.msra.mxu2 %v5149_v27  ;;  %1256 = vmatpush.msra.mxu1 %v5149_v27 }
 0x19f   :  { %v535_v52 = vadd.f32 %v534_v22, %v4858_v33  ;;  %v576_v33 = vpop.f32.mrf.mxu3  ;;  %v5173_v22 = vld [vmem:[%s6381_s4 + $0x48] sm:$0xff] }
 0x1a0   :  { %v735_v6 = vld [vmem:[#allocation2 + $0x68] sm:$0xff] }
 0x1a1   :  { %625 = vst.msk [vmem:[#allocation2 + $0x78] sm:$0xff] %vm610_vm0, %v535_v52  ;;  %3407 = vmatmul.msk.f32.gmra.mxu1 %vm610_vm0, %v735_v6  ;;  %v3549_v52 = vld [vmem:[%s6378_s2 + $0x130] sm:$0xff]  ;;  %v5185_v6 = vld [vmem:[%s6381_s4 + $0x40] sm:$0xff] }
 0x1a2   :  { %2917 = vperm.xlu2 %3844, %v2843_v20   ;;  %v460_v49 = vpop.f32.mrf.mxu2 }
 0x1a3   :  { %2947 = vperm.xlu1 %3843, %v2849_v60   ;;  %v574_v62 = vadd.f32 %v573_v47, %v460_v49  ;;  %v5164_v47 = vld [vmem:[%s6381_s4 + $0x50] sm:$0xff]  ;;  %v5219_v60 = vld [vmem:[%s6381_s4 + $0x28] sm:$0xff] }
 0x1a4   :  { %955 = vmatpush.msra.mxu2 %v5164_v47  ;;  %1257 = vmatpush.msra.mxu1 %v5164_v47 }
 0x1a5   :  { %651 = vst.msk [vmem:[#allocation2 + $0x148] sm:$0xff] %vm610_vm0, %v574_v62 }
 0x1a6   :  { %v537_v26 = vpop.f32.mrf.mxu0  ;;  %956 = vmatpush.msra.mxu2 %v5173_v22  ;;  %1258 = vmatpush.msra.mxu1 %v5173_v22 }
 0x1a7   :  { %v538_v21 = vadd.f32 %v537_v26, %v4874_v11  ;;  %v579_v11 = vpop.f32.mrf.mxu3 }
 0x1a8   :  { %v737_v34 = vld [vmem:[#allocation2 + $0x78] sm:$0xff]  ;;  %957 = vmatpush.msra.mxu2 %v5185_v6  ;;  %1259 = vmatpush.msra.mxu1 %v5185_v6 }
 0x1a9   :  { %627 = vst.msk [vmem:[#allocation2 + $0x88] sm:$0xff] %vm610_vm0, %v538_v21  ;;  %3408 = vmatmul.msk.f32.gmra.mxu1 %vm610_vm0, %v737_v34  ;;  %v3547_v34 = vld [vmem:[%s6378_s2 + $0x120] sm:$0xff] }
 0x1aa   :  { %2982 = vperm.xlu2 %3844, %v2856_v32   ;;  %v463_v1 = vpop.f32.mrf.mxu2  ;;  %958 = vmatpush.msra.mxu2 %v5196_v30 }
 0x1ab   :  { %v577_v55 = vadd.f32 %v576_v33, %v463_v1  ;;  %1260 = vmatpush.msra.mxu1 %v5196_v30 }
 0x1ac   :  { %959 = vmatpush.msra.mxu2 %v5211_v12 }
 0x1ad   :  { %653 = vst.msk [vmem:[#allocation2 + $0x158] sm:$0xff] %vm610_vm0, %v577_v55  ;;  %1261 = vmatpush.msra.mxu1 %v5211_v12 }
 0x1ae   :  { %v540_v56 = vpop.f32.mrf.mxu0  ;;  %960 = vmatpush.msra.mxu2 %v5219_v60 }
 0x1af   :  { %v541_v61 = vadd.f32 %v540_v56, %v4890_v28  ;;  %v582_v18 = vpop.f32.mrf.mxu3  ;;  %v5227_v56 = vld [vmem:[%s6381_s4 + $0x20] sm:$0xff]  ;;  %1262 = vmatpush.msra.mxu1 %v5219_v60 }
 0x1b0   :  { %v1024_v29 = vld [vmem:[#allocation2 + $0x88] sm:$0xff]  ;;  %961 = vmatpush.msra.mxu2 %v5227_v56 }
 0x1b1   :  { %629 = vst.msk [vmem:[#allocation2 + $0x98] sm:$0xff] %vm610_vm0, %v541_v61  ;;  %3435 = vmatmul.msk.f32.vlgmr.msrb.gmra.mxu0 %vm610_vm0, %v1024_v29  ;;  %1263 = vmatpush.msra.mxu1 %v5227_v56 }
 0x1b2   :  { %2902 = vperm.xlu2 %3844, %v2840_v46   ;;  %v466_v42 = vpop.f32.mrf.mxu2  ;;  %v5236_v46 = vld [vmem:[%s6381_s4 + $0x18] sm:$0xff] }
 0x1b3   :  { %v580_v23 = vadd.f32 %v579_v11, %v466_v42  ;;  %962 = vmatpush.msra.mxu2 %v5236_v46  ;;  %1264 = vmatpush.msra.mxu1 %v5236_v46 }
 0x1b5   :  { %655 = vst.msk [vmem:[#allocation2 + $0x168] sm:$0xff] %vm610_vm0, %v580_v23 }
 0x1b6   :  { %v543_v28 = vpop.f32.mrf.mxu0 }
 0x1b7   :  { %v544_v50 = vadd.f32 %v543_v28, %v4903_v4  ;;  %v3558_v4 = vld [vmem:[%s6378_s2 + $0x178] sm:$0xff]  ;;  %v585_v24 = vpop.f32.mrf.mxu3  ;;  %v5258_v28 = vld [vmem:[%s6381_s4 + $0x8] sm:$0xff] }
 0x1b8   :  { %v1026_v19 = vld [vmem:[#allocation2 + $0x98] sm:$0xff]  ;;  %1848 = vmatpush.msra.mxu0 %v3558_v4  ;;  %v5282_v4 = vpop.permute.xlu2 %1085 }
 0x1b9   :  { %631 = vst.msk [vmem:[#allocation2 + $0xa8] sm:$0xff] %vm610_vm0, %v544_v50  ;;  %3436 = vmatmul.msk.f32.gmra.mxu0 %vm610_vm0, %v1026_v19  ;;  %v5266_v50 = vld [vmem:[%s6381_s4] sm:$0xff] }
 0x1ba   :  { %2967 = vperm.xlu2 %3844, %v2853_v43   ;;  %1849 = vmatpush.msra.mxu0 %v3557_v17  ;;  %v469_v8 = vpop.f32.mrf.mxu2  ;;  %v5279_v43 = vpop.permute.xlu1 %1070 }
 0x1bb   :  { %v583_v13 = vadd.f32 %v582_v18, %v469_v8 }
 0x1bc   :  { %1850 = vmatpush.msra.mxu0 %v3556_v40  ;;  %v1038_v40 = vld [vmem:[#allocation2 + $0xf8] sm:$0xff] }
 0x1bd   :  { %657 = vst.msk [vmem:[#allocation2 + $0x178] sm:$0xff] %vm610_vm0, %v583_v13 }
 0x1be   :  { %v546_v2 = vpop.f32.mrf.mxu0  ;;  %1851 = vmatpush.msra.mxu0 %v3555_v48  ;;  %v5289_v48 = vpop.permute.xlu0 %1090 }
 0x1bf   :  { %v547_v15 = vadd.f32 %v546_v2, %v4918_v54  ;;  %v2837_v54 = vld [vmem:[%s6380_s6 + $0x20] sm:$0xff]  ;;  %v588_v36 = vpop.f32.mrf.mxu3 }
 0x1c0   :  { %v1028_v3 = vld [vmem:[#allocation2 + $0xa8] sm:$0xff]  ;;  %1852 = vmatpush.msra.mxu0 %v3554_v9  ;;  %v759_v23 = vpop.permute.xlu2 %758 }
 0x1c1   :  { %633 = vst.msk [vmem:[#allocation2 + $0xb8] sm:$0xff] %vm610_vm0, %v547_v15  ;;  %3437 = vmatmul.msk.f32.gmra.mxu0 %vm610_vm0, %v1028_v3 }
 0x1c2   :  { %2887 = vperm.xlu2 %3844, %v2837_v54   ;;  %1853 = vmatpush.msra.mxu0 %v3553_v0  ;;  %v472_v33 = vpop.f32.mrf.mxu2  ;;  %v5292_v3 = vpop.permute.xlu1 %1075 }
 0x1c3   :  { %v586_v21 = vadd.f32 %v585_v24, %v472_v33 }
 0x1c4   :  { %1854 = vmatpush.msra.mxu0 %v3552_v53 }
 0x1c5   :  { %659 = vst.msk [vmem:[#allocation2 + $0x188] sm:$0xff] %vm610_vm0, %v586_v21 }
 0x1c6   :  { %v549_v10 = vpop.f32.mrf.mxu0  ;;  %1855 = vmatpush.msra.mxu0 %v3551_v58 }
 0x1c7   :  { %v550_v45 = vadd.f32 %v549_v10, %v4934_v35  ;;  %v2850_v35 = vld [vmem:[%s6380_s6 + $0x88] sm:$0xff]  ;;  %v591_v32 = vpop.f32.mrf.mxu3 }
 0x1c8   :  { %v1030_v14 = vld [vmem:[#allocation2 + $0xb8] sm:$0xff]  ;;  %1856 = vmatpush.msra.mxu0 %v3550_v16 }
 0x1c9   :  { %635 = vst.msk [vmem:[#allocation2 + $0xc8] sm:$0xff] %vm610_vm0, %v550_v45  ;;  %3438 = vmatmul.msk.f32.gmra.mxu0 %vm610_vm0, %v1030_v14  ;;  %v764_v14 = vpop.permute.xlu0 %763 }
 0x1ca   :  { %2952 = vperm.xlu2 %3844, %v2850_v35   ;;  %1857 = vmatpush.msra.mxu0 %v3549_v52  ;;  %v475_v49 = vpop.f32.mrf.mxu2  ;;  %v5299_v13 = vpop.permute.xlu1 %1095 }
 0x1cb   :  { %v589_v62 = vadd.f32 %v588_v36, %v475_v49  ;;  %v1747_v36 = vld [vmem:[#allocation2 + $0x110] sm:$0xff] }
 0x1cc   :  { %1858 = vmatpush.msra.mxu0 %v3548_v41 }
 0x1cd   :  { %661 = vst.msk [vmem:[#allocation2 + $0x198] sm:$0xff] %vm610_vm0, %v589_v62 }
 0x1ce   :  { %v552_v57 = vpop.f32.mrf.mxu0  ;;  %1859 = vmatpush.msra.mxu0 %v3547_v34 }
 0x1cf   :  { %v553_v20 = vadd.f32 %v552_v57, %v4953_v37  ;;  %v2834_v37 = vld [vmem:[%s6380_s6 + $0x8] sm:$0xff]  ;;  %v594_v18 = vpop.f32.mrf.mxu3 }
 0x1d0   :  { %v1032_v26 = vld [vmem:[#allocation2 + $0xc8] sm:$0xff]  ;;  %1974 = vmatpush.msrb.mxu0 %v5103_v5 }
 0x1d1   :  { %637 = vst.msk [vmem:[#allocation2 + $0xd8] sm:$0xff] %vm610_vm0, %v553_v20  ;;  %3439 = vmatmul.msk.f32.gmra.mxu0 %vm610_vm0, %v1032_v26 }
 0x1d2   :  { %2872 = vperm.xlu2 %3844, %v2834_v37   ;;  %1975 = vmatpush.msrb.mxu0 %v5117_v59  ;;  %v478_v1 = vpop.f32.mrf.mxu2  ;;  %v769_v21 = vpop.permute.xlu1 %768 }
 0x1d3   :  { %v592_v55 = vadd.f32 %v591_v32, %v478_v1 }
 0x1d4   :  { %1976 = vmatpush.msrb.mxu0 %v5128_v44 }
 0x1d5   :  { %663 = vst.msk [vmem:[#allocation2 + $0x1a8] sm:$0xff] %vm610_vm0, %v592_v55  ;;  %v774_v55 = vpop.permute.xlu2 %773 }
 0x1d6   :  { %v555_v11 = vpop.f32.mrf.mxu0  ;;  %1977 = vmatpush.msrb.mxu0 %v5139_v7 }
 0x1d7   :  { %v556_v61 = vadd.f32 %v555_v11, %v4972_v31  ;;  %v5248_v31 = vld [vmem:[%s6381_s4 + $0x10] sm:$0xff]  ;;  %v597_v42 = vpop.f32.mrf.mxu3 }
 0x1d8   :  { %v1034_v29 = vld [vmem:[#allocation2 + $0xd8] sm:$0xff]  ;;  %963 = vmatpush.msra.mxu2 %v5248_v31  ;;  %1978 = vmatpush.msrb.mxu0 %v5149_v27 }
 0x1d9   :  { %639 = vst.msk [vmem:[#allocation2 + $0xe8] sm:$0xff] %vm610_vm0, %v556_v61  ;;  %3440 = vmatmul.msk.f32.gmra.mxu0 %vm610_vm0, %v1034_v29  ;;  %1265 = vmatpush.msra.mxu1 %v5248_v31  ;;  %v1749_v29 = vld [vmem:[#allocation2 + $0x120] sm:$0xff] }
 0x1da   :  { %964 = vmatpush.msra.mxu2 %v5258_v28  ;;  %1979 = vmatpush.msrb.mxu0 %v5164_v47  ;;  %v481_v2 = vpop.f32.mrf.mxu2 }
 0x1db   :  { %1266 = vmatpush.msra.mxu1 %v5258_v28  ;;  %v595_v15 = vadd.f32 %v594_v18, %v481_v2 }
 0x1dc   :  { %965 = vmatpush.msra.mxu2 %v5266_v50  ;;  %1980 = vmatpush.msrb.mxu0 %v5173_v22 }
 0x1dd   :  { %1267 = vmatpush.msra.mxu1 %v5266_v50  ;;  %665 = vst.msk [vmem:[#allocation2 + $0x1b8] sm:$0xff] %vm610_vm0, %v595_v15 }
 0x1de   :  { %v837_v38 = vpop.f32.mrf.mxu0  ;;  %1981 = vmatpush.msrb.mxu0 %v5185_v6 }
 0x1df   :  { %v838_v54 = vadd.f32 %v837_v38, %v759_v23  ;;  %v600_v8 = vpop.f32.mrf.mxu3 }
 0x1e0   :  { %v1036_v19 = vld [vmem:[#allocation2 + $0xe8] sm:$0xff]  ;;  %1982 = vmatpush.msrb.mxu0 %v5196_v30 }
 0x1e1   :  { %3441 = vmatmul.msk.f32.gmra.mxu0 %vm610_vm0, %v1036_v19 }
 0x1e2   :  { %1983 = vmatpush.msrb.mxu0 %v5211_v12  ;;  %v484_v0 = vpop.f32.mrf.mxu2 }
 0x1e3   :  { %v598_v53 = vadd.f32 %v597_v42, %v484_v0 }
 0x1e4   :  { %1984 = vmatpush.msrb.mxu0 %v5219_v60 }
 0x1e5   :  { %667 = vst.msk [vmem:[#allocation2 + $0x1c8] sm:$0xff] %vm610_vm0, %v598_v53 }
 0x1e6   :  { %v840_v17 = vpop.f32.mrf.mxu0  ;;  %1985 = vmatpush.msrb.mxu0 %v5227_v56 }
 0x1e7   :  { %v841_v35 = vadd.f32 %v840_v17, %v764_v14  ;;  %v603_v37 = vpop.f32.mrf.mxu3 }
 0x1e8   :  { %1986 = vmatpush.msrb.mxu0 %v5236_v46 }
 0x1e9   :  { %3442 = vmatmul.msk.f32.gmra.mxu0 %vm610_vm0, %v1038_v40 }
 0x1ea   :  { %1987 = vmatpush.msrb.mxu0 %v5248_v31  ;;  %v487_v57 = vpop.f32.mrf.mxu2 }
 0x1eb   :  { %v601_v41 = vadd.f32 %v600_v8, %v487_v57  ;;  %v779_v8 = vpop.permute.xlu0 %778  ;;  %v1753_v57 = vld [vmem:[#allocation2 + $0x140] sm:$0xff] }
 0x1ec   :  { %1988 = vmatpush.msrb.mxu0 %v5258_v28 }
 0x1ed   :  { %669 = vst.msk [vmem:[#allocation2 + $0x1d8] sm:$0xff] %vm610_vm0, %v601_v41 }
 0x1ee   :  { %v878_v9 = vpop.f32.mrf.mxu1  ;;  %v843_v10 = vpop.f32.mrf.mxu0  ;;  %1989 = vmatpush.msrb.mxu0 %v5266_v50 }
 0x1ef   :  { %v879_v24 = vadd.f32 %v878_v9, %v838_v54  ;;  %v844_v32 = vadd.f32 %v843_v10, %v769_v21  ;;  %v606_v23 = vpop.f32.mrf.mxu3  ;;  %v1751_v9 = vld [vmem:[#allocation2 + $0x130] sm:$0xff] }
 0x1f1   :  { %1860 = vmatmul.f32.vlgmr.msra.gmra.mxu0 %v4755_v25  ;;  %v910_v45 = vmin.f32 %v879_v24, 0.0  ;;  %vm902_vm1 = vcmp.gt.f32.partialorder %v879_v24, 0.0 }
 0x1f2   :  { %v490_v62 = vpop.f32.mrf.mxu2 }
 0x1f3   :  { %v918_v58 = vmul.f32 1.442695, %v910_v45  ;;  %v604_v38 = vadd.f32 %v603_v37, %v490_v62 }
 0x1f5   :  { %3845 = vpow2.f32 %v918_v58  ;;  %671 = vst.msk [vmem:[#allocation2 + $0x1e8] sm:$0xff] %vm610_vm0, %v604_v38 }
 0x1f6   :  { %v881_v16 = vpop.f32.mrf.mxu1  ;;  %v846_v20 = vpop.f32.mrf.mxu0 }
 0x1f7   :  { %v882_v52 = vadd.f32 %v881_v16, %v841_v35  ;;  %v847_v40 = vadd.f32 %v846_v20, %v774_v55  ;;  %v1139_v62 = vpop.f32.mrf.mxu3 }
 0x1f9   :  { %1863 = vmatmul.f32.gmra.mxu0 %v1747_v36  ;;  %v911_v25 = vmin.f32 %v882_v52, 0.0  ;;  %vm903_vm2 = vcmp.gt.f32.partialorder %v882_v52, 0.0 }
 0x1fb   :  { %v3846_v33 = vpop.eup %3845  ;;  %v920_v26 = vmul.f32 1.442695, %v911_v25 }
 0x1fc   :  { %v3409_v34 = vadd.f32 -1.0, %v3846_v33  ;;  %v784_v33 = vpop.permute.xlu1 %783 }
 0x1fd   :  { %3847 = vpow2.f32 %v920_v26 }
 0x1fe   :  { %v884_v11 = vpop.f32.mrf.mxu1  ;;  %v942_v61 = vsel %vm902_vm1, %v879_v24, %v3409_v34  ;;  %v849_v17 = vpop.f32.mrf.mxu0 }
 0x1ff   :  { %v885_v49 = vadd.f32 %v884_v11, %v844_v32  ;;  %966 = vmatmul.f32.vlgmr.msra.gmra.mxu2 %v942_v61  ;;  %v493_v24 = vpop.f32.mrf.mxu2  ;;  %v850_v14 = vadd.f32 %v849_v17, %v779_v8  ;;  %v1755_v11 = vld [vmem:[#allocation2 + $0x150] sm:$0xff] }
 0x200   :  { %v607_v0 = vadd.f32 %v606_v23, %v493_v24 }
 0x201   :  { %1866 = vmatmul.f32.gmra.mxu0 %v1749_v29  ;;  %v912_v1 = vmin.f32 %v885_v49, 0.0  ;;  %vm904_vm3 = vcmp.gt.f32.partialorder %v885_v49, 0.0 }
 0x202   :  { %673 = vst.msk [vmem:[#allocation2 + $0x1f8] sm:$0xff] %vm610_vm0, %v607_v0  ;;  %v1142_v0 = vpop.f32.mrf.mxu3 }
 0x203   :  { %v3848_v18 = vpop.eup %3847  ;;  %v922_v19 = vmul.f32 1.442695, %v912_v1  ;;  %v789_v1 = vpop.permute.xlu2 %788 }
 0x204   :  { %v3410_v2 = vadd.f32 -1.0, %v3848_v18 }
 0x205   :  { %3849 = vpow2.f32 %v922_v19 }
 0x206   :  { %v887_v15 = vpop.f32.mrf.mxu1  ;;  %v943_v42 = vsel %vm903_vm2, %v882_v52, %v3410_v2  ;;  %v852_v35 = vpop.f32.mrf.mxu0  ;;  %vm1326_vm2 = vcmask 523264  }
 0x207   :  { %v888_v54 = vadd.f32 %v887_v15, %v847_v40  ;;  %969 = vmatmul.f32.gmra.mxu2 %v943_v42  ;;  %v853_v21 = vadd.f32 %v852_v35, %v784_v33  ;;  %v1757_v40 = vld [vmem:[#allocation2 + $0x160] sm:$0xff] }
 0x209   :  { %1869 = vmatmul.f32.gmra.mxu0 %v1751_v9  ;;  %v913_v10 = vmin.f32 %v888_v54, 0.0  ;;  %vm905_vm4 = vcmp.gt.f32.partialorder %v888_v54, 0.0  ;;  %v794_v9 = vpop.permute.xlu1 %793 }
 0x20b   :  { %v3850_v53 = vpop.eup %3849  ;;  %v924_v45 = vmul.f32 1.442695, %v913_v10 }
 0x20c   :  { %v3411_v58 = vadd.f32 -1.0, %v3850_v53 }
 0x20d   :  { %3851 = vpow2.f32 %v924_v45 }
 0x20e   :  { %v890_v16 = vpop.f32.mrf.mxu1  ;;  %v944_v52 = vsel %vm904_vm3, %v885_v49, %v3411_v58  ;;  %v855_v61 = vpop.f32.mrf.mxu0  ;;  %v1759_v58 = vld [vmem:[#allocation2 + $0x170] sm:$0xff] }
 0x20f   :  { %v891_v36 = vadd.f32 %v890_v16, %v850_v14  ;;  %972 = vmatmul.f32.gmra.mxu2 %v944_v52  ;;  %v856_v19 = vadd.f32 %v855_v61, %v789_v1  ;;  %v1140_v52 = vadd.f32 %v1139_v62, %v5239_v63 }
 0x211   :  { %1872 = vmatmul.f32.gmra.mxu0 %v1753_v57  ;;  %v914_v41 = vmin.f32 %v891_v36, 0.0  ;;  %vm906_vm5 = vcmp.gt.f32.partialorder %v891_v36, 0.0 }
 0x213   :  { %v3852_v25 = vpop.eup %3851  ;;  %v926_v20 = vmul.f32 1.442695, %v914_v41 }
 0x214   :  { %v3412_v26 = vadd.f32 -1.0, %v3852_v25 }
 0x215   :  { %3853 = vpow2.f32 %v926_v20  ;;  %v1145_v20 = vpop.f32.mrf.mxu3 }
 0x216   :  { %v893_v34 = vpop.f32.mrf.mxu1  ;;  %v945_v37 = vsel %vm905_vm4, %v888_v54, %v3412_v26  ;;  %v858_v42 = vpop.f32.mrf.mxu0  ;;  %v1146_v1 = vadd.f32 %v1145_v20, %v5279_v43 }
 0x217   :  { %v894_v32 = vadd.f32 %v893_v34, %v853_v21  ;;  %975 = vmatmul.f32.gmra.mxu2 %v945_v37  ;;  %v859_v10 = vadd.f32 %v858_v42, %v794_v9  ;;  %v1143_v34 = vadd.f32 %v1142_v0, %v5277_v39 }
 0x219   :  { %1875 = vmatmul.f32.gmra.mxu0 %v1755_v11  ;;  %v915_v49 = vmin.f32 %v894_v32, 0.0  ;;  %vm907_vm6 = vcmp.gt.f32.partialorder %v894_v32, 0.0 }
 0x21b   :  { %v3854_v29 = vpop.eup %3853  ;;  %v928_v38 = vmul.f32 1.442695, %v915_v49 }
 0x21c   :  { %v3413_v18 = vadd.f32 -1.0, %v3854_v29 }
 0x21d   :  { %3855 = vpow2.f32 %v928_v38  ;;  %v1148_v49 = vpop.f32.mrf.mxu3 }
 0x21e   :  { %v896_v55 = vpop.f32.mrf.mxu1  ;;  %v946_v17 = vsel %vm906_vm5, %v891_v36, %v3413_v18  ;;  %v1149_v42 = vadd.f32 %v1148_v49, %v5292_v3 }
 0x21f   :  { %v897_v2 = vadd.f32 %v896_v55, %v856_v19  ;;  %978 = vmatmul.f32.gmra.mxu2 %v946_v17 }
 0x221   :  { %1878 = vmatmul.f32.gmra.mxu0 %v1757_v40  ;;  %v916_v15 = vmin.f32 %v897_v2, 0.0  ;;  %vm908_vm7 = vcmp.gt.f32.partialorder %v897_v2, 0.0 }
 0x223   :  { %v3856_v23 = vpop.eup %3855  ;;  %v930_v54 = vmul.f32 1.442695, %v916_v15 }
 0x224   :  { %v3414_v24 = vadd.f32 -1.0, %v3856_v23 }
 0x225   :  { %3857 = vpow2.f32 %v930_v54  ;;  %v1151_v40 = vpop.f32.mrf.mxu3 }
 0x226   :  { %v899_v53 = vpop.f32.mrf.mxu1  ;;  %v947_v45 = vsel %vm907_vm6, %v894_v32, %v3414_v24 }
 0x227   :  { %v900_v8 = vadd.f32 %v899_v53, %v859_v10  ;;  %981 = vmatmul.f32.gmra.mxu2 %v947_v45  ;;  %v1152_v53 = vadd.f32 %v1151_v40, %v5252_v51  ;;  %v3564_v51 = vld [vmem:[%s6378_s2 + $0x1a8] sm:$0xff] }
 0x228   :  { %1899 = vmatpush.msrb.mxu1 %v3564_v51 }
 0x229   :  { %1881 = vmatmul.f32.gmra.mxu0 %v1759_v58  ;;  %v917_v14 = vmin.f32 %v900_v8, 0.0  ;;  %vm909_vm8 = vcmp.gt.f32.partialorder %v900_v8, 0.0 }
 0x22b   :  { %v3858_v35 = vpop.eup %3857  ;;  %v932_v16 = vmul.f32 1.442695, %v917_v14 }
 0x22c   :  { %v3415_v36 = vadd.f32 -1.0, %v3858_v35 }
 0x22d   :  { %3859 = vpow2.f32 %v932_v16  ;;  %v1154_v45 = vpop.f32.mrf.mxu3 }
 0x22e   :  { %v1180_v57 = vpop.f32.mrf.mxu0  ;;  %v948_v25 = vsel %vm908_vm7, %v897_v2, %v3415_v36  ;;  %v1155_v36 = vadd.f32 %v1154_v45, %v5282_v4  ;;  %v1754_v45 = vld [vmem:[#allocation2 + $0x148] sm:$0xff] }
 0x22f   :  { %v1181_v41 = vadd.f32 %v1180_v57, %v1140_v52  ;;  %984 = vmatmul.f32.gmra.mxu2 %v948_v25 }
 0x231   :  { %v1212_v33 = vmin.f32 %v1181_v41, 0.0  ;;  %vm1204_vm9 = vcmp.gt.f32.partialorder %v1181_v41, 0.0 }
 0x233   :  { %v1220_v26 = vmul.f32 1.442695, %v1212_v33  ;;  %v3860_v21 = vpop.eup %3859 }
 0x234   :  { %v3416_v37 = vadd.f32 -1.0, %v3860_v21 }
 0x235   :  { %3861 = vpow2.f32 %v1220_v26  ;;  %v1157_v20 = vpop.f32.mrf.mxu3 }
 0x236   :  { %v1183_v32 = vpop.f32.mrf.mxu0  ;;  %v949_v61 = vsel %vm909_vm8, %v900_v8, %v3416_v37  ;;  %v1158_v37 = vadd.f32 %v1157_v20, %v5289_v48 }
 0x237   :  { %v1184_v11 = vadd.f32 %v1183_v32, %v1143_v34  ;;  %987 = vmatmul.f32.gmra.mxu2 %v949_v61 }
 0x239   :  { %v1213_v63 = vmin.f32 %v1184_v11, 0.0  ;;  %vm1205_vm10 = vcmp.gt.f32.partialorder %v1184_v11, 0.0 }
 0x23b   :  { %v3862_v29 = vpop.eup %3861  ;;  %v1222_v62 = vmul.f32 1.442695, %v1213_v63 }
 0x23c   :  { %v3443_v38 = vadd.f32 -1.0, %v3862_v29 }
 0x23d   :  { %3863 = vpow2.f32 %v1222_v62  ;;  %v1160_v49 = vpop.f32.mrf.mxu3 }
 0x23e   :  { %v1186_v18 = vpop.f32.mrf.mxu0  ;;  %v1244_v19 = vsel %vm1204_vm9, %v1181_v41, %v3443_v38 }
 0x23f   :  { %v1187_v55 = vadd.f32 %v1186_v18, %v1146_v1  ;;  %1268 = vmatmul.f32.vlgmr.msra.gmra.mxu1 %v1244_v19  ;;  %v1161_v1 = vadd.f32 %v1160_v49, %v5299_v13  ;;  %v1746_v13 = vld [vmem:[#allocation2 + $0x108] sm:$0xff] }
 0x241   :  { %v1214_v39 = vmin.f32 %v1187_v55, 0.0  ;;  %vm1206_vm11 = vcmp.gt.f32.partialorder %v1187_v55, 0.0 }
 0x243   :  { %v3864_v17 = vpop.eup %3863  ;;  %v1224_v2 = vmul.f32 1.442695, %v1214_v39 }
 0x244   :  { %v3444_v15 = vadd.f32 -1.0, %v3864_v17 }
 0x245   :  { %3865 = vpow2.f32 %v1224_v2 }
 0x246   :  { %v1189_v23 = vpop.f32.mrf.mxu0  ;;  %v1245_v54 = vsel %vm1205_vm10, %v1184_v11, %v3444_v15  ;;  %v3563_v11 = vld [vmem:[%s6378_s2 + $0x1a0] sm:$0xff] }
 0x247   :  { %v1190_v9 = vadd.f32 %v1189_v23, %v1149_v42  ;;  %1271 = vmatmul.f32.gmra.mxu1 %v1245_v54 }
 0x248   :  { %1900 = vmatpush.msrb.mxu1 %v3563_v11 }
 0x249   :  { %v1215_v43 = vmin.f32 %v1190_v9, 0.0  ;;  %vm1207_vm12 = vcmp.gt.f32.partialorder %v1190_v9, 0.0 }
 0x24b   :  { %v3866_v24 = vpop.eup %3865  ;;  %v1226_v0 = vmul.f32 1.442695, %v1215_v43 }
 0x24c   :  { %v3445_v10 = vadd.f32 -1.0, %v3866_v24  ;;  %v1750_v24 = vld [vmem:[#allocation2 + $0x128] sm:$0xff] }
 0x24d   :  { %3867 = vpow2.f32 %v1226_v0 }
 0x24e   :  { %v1192_v8 = vpop.f32.mrf.mxu0  ;;  %v1246_v58 = vsel %vm1206_vm11, %v1187_v55, %v3445_v10  ;;  %v1752_v10 = vld [vmem:[#allocation2 + $0x138] sm:$0xff] }
 0x24f   :  { %v1193_v14 = vadd.f32 %v1192_v8, %v1152_v53  ;;  %1274 = vmatmul.f32.gmra.mxu1 %v1246_v58  ;;  %v1756_v58 = vld [vmem:[#allocation2 + $0x158] sm:$0xff] }
 0x251   :  { %v1216_v3 = vmin.f32 %v1193_v14, 0.0  ;;  %vm1208_vm13 = vcmp.gt.f32.partialorder %v1193_v14, 0.0 }
 0x253   :  { %v3868_v35 = vpop.eup %3867  ;;  %v1228_v16 = vmul.f32 1.442695, %v1216_v3  ;;  %v1758_v3 = vld [vmem:[#allocation2 + $0x168] sm:$0xff] }
 0x254   :  { %v3446_v52 = vadd.f32 -1.0, %v3868_v35 }
 0x255   :  { %3869 = vpow2.f32 %v1228_v16  ;;  %v1760_v16 = vld [vmem:[#allocation2 + $0x178] sm:$0xff] }
 0x256   :  { %v1195_v57 = vpop.f32.mrf.mxu0  ;;  %v1247_v41 = vsel %vm1207_vm12, %v1190_v9, %v3446_v52  ;;  %v1748_v9 = vld [vmem:[#allocation2 + $0x118] sm:$0xff] }
 0x257   :  { %v1196_v25 = vadd.f32 %v1195_v57, %v1155_v36  ;;  %1277 = vmatmul.f32.gmra.mxu1 %v1247_v41 }
 0x259   :  { %v1217_v33 = vmin.f32 %v1196_v25, 0.0  ;;  %vm1209_vm14 = vcmp.gt.f32.partialorder %v1196_v25, 0.0 }
 0x25b   :  { %v3870_v26 = vpop.eup %3869  ;;  %v1230_v21 = vmul.f32 1.442695, %v1217_v33 }
 0x25c   :  { %v3447_v34 = vadd.f32 -1.0, %v3870_v26 }
 0x25d   :  { %3871 = vpow2.f32 %v1230_v21 }
 0x25e   :  { %v1198_v4 = vpop.f32.mrf.mxu0  ;;  %v1248_v32 = vsel %vm1208_vm13, %v1193_v14, %v3447_v34 }
 0x25f   :  { %v1199_v61 = vadd.f32 %v1198_v4, %v1158_v37  ;;  %1280 = vmatmul.f32.gmra.mxu1 %v1248_v32  ;;  %v1783_v37 = vpop.permute.xlu0 %1782  ;;  %v991_v32 = vld [vmem:[%s6382_s5] sm:$0xff] }
 0x261   :  { %v1218_v63 = vmin.f32 %v1199_v61, 0.0  ;;  %vm1210_vm15 = vcmp.gt.f32.partialorder %v1199_v61, 0.0 }
 0x263   :  { %v3872_v29 = vpop.eup %3871  ;;  %v1232_v62 = vmul.f32 1.442695, %v1218_v63 }
 0x264   :  { %v3448_v38 = vadd.f32 -1.0, %v3872_v29 }
 0x265   :  { %3873 = vpow2.f32 %v1232_v62  ;;  %v3451_v62 = vld [vmem:[%s6382_s5 + $0x100] sm:$0xff] }
 0x266   :  { %v1201_v48 = vpop.f32.mrf.mxu0  ;;  %v1249_v18 = vsel %vm1209_vm14, %v1196_v25, %v3448_v38  ;;  %v1788_v38 = vpop.permute.xlu2 %1787 }
 0x267   :  { %v1202_v19 = vadd.f32 %v1201_v48, %v1161_v1  ;;  %1283 = vmatmul.f32.gmra.mxu1 %v1249_v18  ;;  %v992_v48 = vld [vmem:[%s6382_s5 + $0x8] sm:$0xff] }
 0x269   :  { %v1219_v55 = vmin.f32 %v1202_v19, 0.0  ;;  %vm1211_vm1 = vcmp.gt.f32.partialorder %v1202_v19, 0.0 }
 0x26b   :  { %v3874_v39 = vpop.eup %3873  ;;  %v1234_v17 = vmul.f32 1.442695, %v1219_v55 }
 0x26c   :  { %v3449_v2 = vadd.f32 -1.0, %v3874_v39 }
 0x26d   :  { %3875 = vpow2.f32 %v1234_v17 }
 0x26e   :  { %v1250_v40 = vsel %vm1210_vm15, %v1199_v61, %v3449_v2  ;;  %v1861_v33 = vpop.f32.mrf.mxu0 }
 0x26f   :  { %1286 = vmatmul.f32.gmra.mxu1 %v1250_v40  ;;  %v1862_v4 = vadd.f32 %v1861_v33, %v1783_v37  ;;  %v3452_v40 = vld [vmem:[%s6382_s5 + $0x108] sm:$0xff] }
 0x273   :  { %v3876_v15 = vpop.eup %3875 }
 0x274   :  { %v3450_v42 = vadd.f32 -1.0, %v3876_v15  ;;  %v1793_v15 = vpop.permute.xlu0 %1792 }
 0x276   :  { %v1251_v23 = vsel %vm1211_vm1, %v1202_v19, %v3450_v42  ;;  %v1864_v21 = vpop.f32.mrf.mxu0 }
 0x277   :  { %1289 = vmatmul.f32.gmra.mxu1 %v1251_v23  ;;  %v1865_v1 = vadd.f32 %v1864_v21, %v1788_v38 }
 0x27e   :  { %v1867_v63 = vpop.f32.mrf.mxu0 }
 0x27f   :  { %3565 = vmatmul.msk.f32.vlgmr.msrb.gmra.mxu1 %vm610_vm0, %v1746_v13  ;;  %v1868_v23 = vadd.f32 %v1867_v63, %v1793_v15  ;;  %v1808_v63 = vpop.permute.xlu0 %1807 }
 0x282   :  { %v967_v54 = vpop.f32.mrf.mxu2 }
 0x286   :  { %v1870_v39 = vpop.f32.mrf.mxu0 }
 0x287   :  { %3566 = vmatmul.msk.f32.gmra.mxu1 %vm610_vm0, %v1748_v9 }
 0x28a   :  { %v970_v43 = vpop.f32.mrf.mxu2 }
 0x28f   :  { %3567 = vmatmul.msk.f32.gmra.mxu1 %vm610_vm0, %v1750_v24 }
 0x292   :  { %v973_v0 = vpop.f32.mrf.mxu2 }
 0x297   :  { %3568 = vmatmul.msk.f32.gmra.mxu1 %vm610_vm0, %v1752_v10  ;;  %v1873_v10 = vpop.f32.mrf.mxu0 }
 0x29a   :  { %v976_v53 = vpop.f32.mrf.mxu2 }
 0x29f   :  { %3569 = vmatmul.msk.f32.gmra.mxu1 %vm610_vm0, %v1754_v45 }
 0x2a2   :  { %v979_v8 = vpop.f32.mrf.mxu2 }
 0x2a7   :  { %3570 = vmatmul.msk.f32.gmra.mxu1 %vm610_vm0, %v1756_v58 }
 0x2aa   :  { %v982_v14 = vpop.f32.mrf.mxu2 }
 0x2af   :  { %3571 = vmatmul.msk.f32.gmra.mxu1 %vm610_vm0, %v1758_v3 }
 0x2b2   :  { %v985_v35 = vpop.f32.mrf.mxu2 }
 0x2b7   :  { %3572 = vmatmul.msk.f32.gmra.mxu1 %vm610_vm0, %v1760_v16  ;;  %v3655_v16 = vld [vmem:[%s6378_s2 + $0x200] sm:$0xff] }
 0x2ba   :  { %v988_v52 = vpop.f32.mrf.mxu2 }
 0x2bb   :  { %1640 = vmatpush.msra.mxu3 %v988_v52 }
 0x2bc   :  { %v1269_v36 = vpop.f32.mrf.mxu1 }
 0x2bd   :  { %1641 = vmatpush.msra.mxu3 %v985_v35  ;;  %v3656_v35 = vld [vmem:[%s6378_s2 + $0x208] sm:$0xff] }
 0x2bf   :  { %1642 = vmatpush.msra.mxu3 %v982_v14 }
 0x2c1   :  { %1643 = vmatpush.msra.mxu3 %v979_v8  ;;  %v994_v8 = vld [vmem:[%s6382_s5 + $0x18] sm:$0xff] }
 0x2c3   :  { %1644 = vmatpush.msra.mxu3 %v976_v53 }
 0x2c4   :  { %v1272_v57 = vpop.f32.mrf.mxu1 }
 0x2c5   :  { %1645 = vmatpush.msra.mxu3 %v973_v0  ;;  %v3453_v0 = vld [vmem:[%s6382_s5 + $0x110] sm:$0xff] }
 0x2c7   :  { %1646 = vmatpush.msra.mxu3 %v970_v43 }
 0x2c9   :  { %1647 = vmatpush.msra.mxu3 %v967_v54 }
 0x2ca   :  { %3515 = vmatmul.msk.f32.vlgmr.msra.gmra.mxu3 %vm1326_vm2, %v991_v32 }
 0x2cc   :  { %v1275_v41 = vpop.f32.mrf.mxu1 }
 0x2d2   :  { %3516 = vmatmul.msk.f32.gmra.mxu3 %vm1326_vm2, %v992_v48 }
 0x2d4   :  { %v1278_v25 = vpop.f32.mrf.mxu1 }
 0x2dc   :  { %v1281_v51 = vpop.f32.mrf.mxu1 }
 0x2e4   :  { %v1284_v20 = vpop.f32.mrf.mxu1 }
 0x2ec   :  { %v1287_v26 = vpop.f32.mrf.mxu1 }
 0x2f4   :  { %v1290_v34 = vpop.f32.mrf.mxu1 }
 0x2f5   :  { %1431 = vmatpush.msrb.mxu2 %v1290_v34  ;;  %v3652_v34 = vld [vmem:[%s6378_s2 + $0x1e8] sm:$0xff] }
 0x2f7   :  { %1432 = vmatpush.msrb.mxu2 %v1287_v26 }
 0x2f9   :  { %1433 = vmatpush.msrb.mxu2 %v1284_v20  ;;  %v3653_v20 = vld [vmem:[%s6378_s2 + $0x1f0] sm:$0xff] }
 0x2fb   :  { %1434 = vmatpush.msrb.mxu2 %v1281_v51  ;;  %v995_v51 = vld [vmem:[%s6382_s5 + $0x20] sm:$0xff] }
 0x2fc   :  { %v1902_v11 = vpop.f32.mrf.mxu1 }
 0x2fd   :  { %v1903_v61 = vadd.f32 %v1902_v11, %v1862_v4  ;;  %1435 = vmatpush.msrb.mxu2 %v1278_v25  ;;  %v3455_v11 = vld [vmem:[%s6382_s5 + $0x120] sm:$0xff] }
 0x2ff   :  { %v1934_v49 = vmin.f32 %v1903_v61, 0.0  ;;  %1436 = vmatpush.msrb.mxu2 %v1275_v41  ;;  %vm1926_vm3 = vcmp.gt.f32.partialorder %v1903_v61, 0.0 }
 0x301   :  { %v1942_v29 = vmul.f32 1.442695, %v1934_v49  ;;  %1437 = vmatpush.msrb.mxu2 %v1272_v57  ;;  %v3454_v57 = vld [vmem:[%s6382_s5 + $0x118] sm:$0xff]  ;;  %v996_v49 = vld [vmem:[%s6382_s5 + $0x28] sm:$0xff] }
 0x303   :  { %3877 = vpow2.f32 %v1942_v29  ;;  %1438 = vmatpush.msrb.mxu2 %v1269_v36  ;;  %v3649_v29 = vld [vmem:[%s6378_s2 + $0x1d0] sm:$0xff] }
 0x304   :  { %v1905_v18 = vpop.f32.mrf.mxu1  ;;  %3483 = vmatmul.msk.f32.vlgmr.msrb.gmra.mxu2 %vm1326_vm2, %v3451_v62 }
 0x305   :  { %v1906_v19 = vadd.f32 %v1905_v18, %v1865_v1  ;;  %2518 = vmatpush.msra.mxu2 %v5103_v5  ;;  %v993_v5 = vld [vmem:[%s6382_s5 + $0x10] sm:$0xff] }
 0x306   :  { %3517 = vmatmul.msk.f32.gmra.mxu3 %vm1326_vm2, %v993_v5 }
 0x307   :  { %v1935_v55 = vmin.f32 %v1906_v19, 0.0  ;;  %2519 = vmatpush.msra.mxu2 %v5117_v59  ;;  %vm1927_vm4 = vcmp.gt.f32.partialorder %v1906_v19, 0.0 }
 0x309   :  { %v3878_v17 = vpop.eup %3877  ;;  %v1944_v2 = vmul.f32 1.442695, %v1935_v55  ;;  %2520 = vmatpush.msra.mxu2 %v5128_v44  ;;  %v3660_v44 = vld [vmem:[%s6378_s2 + $0x228] sm:$0xff] }
 0x30a   :  { %v3573_v42 = vadd.f32 -1.0, %v3878_v17  ;;  %2388 = vmatpush.msra.mxu0 %v3660_v44  ;;  %v3456_v17 = vld [vmem:[%s6382_s5 + $0x128] sm:$0xff] }
 0x30b   :  { %3879 = vpow2.f32 %v1944_v2  ;;  %2521 = vmatpush.msra.mxu2 %v5139_v7  ;;  %v3659_v7 = vld [vmem:[%s6378_s2 + $0x220] sm:$0xff]  ;;  %v3646_v2 = vld [vmem:[%s6378_s2 + $0x1b8] sm:$0xff] }
 0x30c   :  { %v1908_v59 = vpop.f32.mrf.mxu1  ;;  %v1966_v13 = vsel %vm1926_vm3, %v1903_v61, %v3573_v42  ;;  %3484 = vmatmul.msk.f32.gmra.mxu2 %vm1326_vm2, %v3452_v40  ;;  %2389 = vmatpush.msra.mxu0 %v3659_v7  ;;  %v3650_v61 = vld [vmem:[%s6378_s2 + $0x1d8] sm:$0xff] }
 0x30d   :  { %v1909_v54 = vadd.f32 %v1908_v59, %v1868_v23  ;;  %1990 = vmatmul.f32.vlgmr.msrb.gmra.mxu0 %v1966_v13  ;;  %2522 = vmatpush.msra.mxu2 %v5149_v27  ;;  %v1798_v27 = vpop.permute.xlu1 %1797  ;;  %v3645_v23 = vld [vmem:[%s6378_s2 + $0x1b0] sm:$0xff] }
 0x30e   :  { %v1871_v45 = vadd.f32 %v1870_v39, %v1798_v27  ;;  %3518 = vmatmul.msk.f32.gmra.mxu3 %vm1326_vm2, %v994_v8  ;;  %v998_v27 = vld [vmem:[%s6382_s5 + $0x38] sm:$0xff] }
 0x30f   :  { %v1936_v9 = vmin.f32 %v1909_v54, 0.0  ;;  %2523 = vmatpush.msra.mxu2 %v5164_v47  ;;  %v3658_v47 = vld [vmem:[%s6378_s2 + $0x218] sm:$0xff]  ;;  %vm1928_vm5 = vcmp.gt.f32.partialorder %v1909_v54, 0.0 }
 0x310   :  { %2390 = vmatpush.msra.mxu0 %v3658_v47 }
 0x311   :  { %v3880_v43 = vpop.eup %3879  ;;  %v1946_v24 = vmul.f32 1.442695, %v1936_v9  ;;  %2524 = vmatpush.msra.mxu2 %v5173_v22  ;;  %v3657_v22 = vld [vmem:[%s6378_s2 + $0x210] sm:$0xff] }
 0x312   :  { %v3574_v53 = vadd.f32 -1.0, %v3880_v43  ;;  %2391 = vmatpush.msra.mxu0 %v3657_v22  ;;  %v3457_v43 = vld [vmem:[%s6382_s5 + $0x130] sm:$0xff]  ;;  %v3458_v22 = vld [vmem:[%s6382_s5 + $0x138] sm:$0xff] }
 0x313   :  { %3881 = vpow2.f32 %v1946_v24  ;;  %2525 = vmatpush.msra.mxu2 %v5185_v6 }
 0x314   :  { %v1911_v58 = vpop.f32.mrf.mxu1  ;;  %v1967_v14 = vsel %vm1927_vm4, %v1906_v19, %v3574_v53  ;;  %3485 = vmatmul.msk.f32.gmra.mxu2 %vm1326_vm2, %v3453_v0  ;;  %2392 = vmatpush.msra.mxu0 %v3656_v35  ;;  %v3647_v19 = vld [vmem:[%s6378_s2 + $0x1c0] sm:$0xff] }
 0x315   :  { %v1912_v3 = vadd.f32 %v1911_v58, %v1871_v45  ;;  %1993 = vmatmul.f32.gmra.mxu0 %v1967_v14  ;;  %2526 = vmatpush.msra.mxu2 %v5196_v30  ;;  %v1803_v30 = vpop.permute.xlu2 %1802  ;;  %v1813_v40 = vpop.permute.xlu1 %1812  ;;  %v999_v35 = vld [vmem:[%s6382_s5 + $0x40] sm:$0xff] }
 0x316   :  { %2393 = vmatpush.msra.mxu0 %v3655_v16  ;;  %v1874_v25 = vadd.f32 %v1873_v10, %v1803_v30  ;;  %3519 = vmatmul.msk.f32.gmra.mxu3 %vm1326_vm2, %v995_v51  ;;  %v3461_v51 = vld [vmem:[%s6382_s5 + $0x150] sm:$0xff] }
 0x317   :  { %v1937_v6 = vmin.f32 %v1912_v3, 0.0  ;;  %2527 = vmatpush.msra.mxu2 %v5211_v12  ;;  %v3654_v12 = vld [vmem:[%s6378_s2 + $0x1f8] sm:$0xff]  ;;  %vm1929_vm6 = vcmp.gt.f32.partialorder %v1912_v3, 0.0 }
 0x318   :  { %2394 = vmatpush.msra.mxu0 %v3654_v12  ;;  %v1001_v12 = vld [vmem:[%s6382_s5 + $0x50] sm:$0xff] }
 0x319   :  { %v3882_v52 = vpop.eup %3881  ;;  %v1948_v36 = vmul.f32 1.442695, %v1937_v6  ;;  %2528 = vmatpush.msra.mxu2 %v5219_v60  ;;  %v1876_v60 = vpop.f32.mrf.mxu0 }
 0x31a   :  { %v3575_v41 = vadd.f32 -1.0, %v3882_v52  ;;  %2395 = vmatpush.msra.mxu0 %v3653_v20  ;;  %v3459_v52 = vld [vmem:[%s6382_s5 + $0x140] sm:$0xff]  ;;  %v1002_v20 = vld [vmem:[%s6382_s5 + $0x58] sm:$0xff] }
 0x31b   :  { %3883 = vpow2.f32 %v1948_v36  ;;  %2529 = vmatpush.msra.mxu2 %v5227_v56  ;;  %v3651_v56 = vld [vmem:[%s6378_s2 + $0x1e0] sm:$0xff] }
 0x31c   :  { %v1914_v33 = vpop.f32.mrf.mxu1  ;;  %v1968_v26 = vsel %vm1928_vm5, %v1909_v54, %v3575_v41  ;;  %3486 = vmatmul.msk.f32.gmra.mxu2 %vm1326_vm2, %v3454_v57  ;;  %2396 = vmatpush.msra.mxu0 %v3652_v34  ;;  %v1000_v57 = vld [vmem:[%s6382_s5 + $0x48] sm:$0xff]  ;;  %v3463_v34 = vld [vmem:[%s6382_s5 + $0x160] sm:$0xff] }
 0x31d   :  { %v1915_v21 = vadd.f32 %v1914_v33, %v1874_v25  ;;  %1996 = vmatmul.f32.gmra.mxu0 %v1968_v26  ;;  %2530 = vmatpush.msra.mxu2 %v5236_v46  ;;  %v1818_v24 = vpop.permute.xlu2 %1817  ;;  %v3460_v41 = vld [vmem:[%s6382_s5 + $0x148] sm:$0xff]  ;;  %v2289_v25 = vld [vmem:[#allocation2 + $0x180] sm:$0xff]  ;;  %v3462_v33 = vld [vmem:[%s6382_s5 + $0x158] sm:$0xff] }
 0x31e   :  { %2397 = vmatpush.msra.mxu0 %v3651_v56  ;;  %3520 = vmatmul.msk.f32.gmra.mxu3 %vm1326_vm2, %v996_v49  ;;  %v1003_v26 = vld [vmem:[%s6382_s5 + $0x60] sm:$0xff]  ;;  %v2295_v56 = vld [vmem:[#allocation2 + $0x1b0] sm:$0xff]  ;;  %v1006_v49 = vld [vmem:[%s6382_s5 + $0x78] sm:$0xff] }
 0x31f   :  { %v1938_v37 = vmin.f32 %v1915_v21, 0.0  ;;  %2531 = vmatpush.msra.mxu2 %v5248_v31  ;;  %v1877_v31 = vadd.f32 %v1876_v60, %v1808_v63  ;;  %vm1930_vm7 = vcmp.gt.f32.partialorder %v1915_v21, 0.0  ;;  %v2291_v60 = vld [vmem:[#allocation2 + $0x190] sm:$0xff]  ;;  %v2297_v63 = vld [vmem:[#allocation2 + $0x1c0] sm:$0xff] }
 0x320   :  { %2398 = vmatpush.msra.mxu0 %v3650_v61  ;;  %v3661_v61 = vld [vmem:[%s6378_s2 + $0x230] sm:$0xff] }
 0x321   :  { %v3884_v4 = vpop.eup %3883  ;;  %v1950_v32 = vmul.f32 1.442695, %v1938_v37  ;;  %2532 = vmatpush.msra.mxu2 %v5258_v28  ;;  %v3648_v28 = vld [vmem:[%s6378_s2 + $0x1c8] sm:$0xff]  ;;  %v1879_v48 = vpop.f32.mrf.mxu0 }
 0x322   :  { %v3576_v46 = vadd.f32 -1.0, %v3884_v4  ;;  %2399 = vmatpush.msra.mxu0 %v3649_v29  ;;  %v1880_v42 = vadd.f32 %v1879_v48, %v1813_v40  ;;  %v1004_v37 = vld [vmem:[%s6382_s5 + $0x68] sm:$0xff]  ;;  %v3466_v29 = vld [vmem:[%s6382_s5 + $0x178] sm:$0xff]  ;;  %v1009_v40 = vld [vmem:[%s6382_s5 + $0x90] sm:$0xff] }
 0x323   :  { %3885 = vpow2.f32 %v1950_v32  ;;  %2533 = vmatpush.msra.mxu2 %v5266_v50  ;;  %v997_v50 = vld [vmem:[%s6382_s5 + $0x30] sm:$0xff]  ;;  %v3464_v4 = vld [vmem:[%s6382_s5 + $0x168] sm:$0xff]  ;;  %v3662_v32 = vld [vmem:[%s6378_s2 + $0x238] sm:$0xff] }
 0x324   :  { %v1917_v62 = vpop.f32.mrf.mxu1  ;;  %v1969_v38 = vsel %vm1929_vm6, %v1912_v3, %v3576_v46  ;;  %3487 = vmatmul.msk.f32.gmra.mxu2 %vm1326_vm2, %v3455_v11  ;;  %2400 = vmatpush.msra.mxu0 %v3648_v28  ;;  %v1005_v11 = vld [vmem:[%s6382_s5 + $0x70] sm:$0xff]  ;;  %v3467_v28 = vld [vmem:[%s6382_s5 + $0x180] sm:$0xff]  ;;  %v1008_v48 = vld [vmem:[%s6382_s5 + $0x88] sm:$0xff] }
 0x325   :  { %v1918_v1 = vadd.f32 %v1917_v62, %v1877_v31  ;;  %1999 = vmatmul.f32.gmra.mxu0 %v1969_v38  ;;  %v3465_v46 = vld [vmem:[%s6382_s5 + $0x170] sm:$0xff]  ;;  %v1007_v62 = vld [vmem:[%s6382_s5 + $0x80] sm:$0xff] }
 0x326   :  { %2401 = vmatpush.msra.mxu0 %v3647_v19  ;;  %3521 = vmatmul.msk.f32.gmra.mxu3 %vm1326_vm2, %v997_v50  ;;  %v2299_v31 = vld [vmem:[#allocation2 + $0x1d0] sm:$0xff]  ;;  %v2301_v38 = vld [vmem:[#allocation2 + $0x1e0] sm:$0xff] }
 0x327   :  { %v1939_v18 = vmin.f32 %v1918_v1, 0.0  ;;  %vm1931_vm8 = vcmp.gt.f32.partialorder %v1918_v1, 0.0 }
 0x328   :  { %2402 = vmatpush.msra.mxu0 %v3646_v2 }
 0x329   :  { %v3886_v55 = vpop.eup %3885  ;;  %v1952_v39 = vmul.f32 1.442695, %v1939_v18  ;;  %v1882_v44 = vpop.f32.mrf.mxu0  ;;  %v2303_v18 = vld [vmem:[#allocation2 + $0x1f0] sm:$0xff] }
 0x32a   :  { %v3577_v15 = vadd.f32 -1.0, %v3886_v55  ;;  %2403 = vmatpush.msra.mxu0 %v3645_v23  ;;  %v1883_v10 = vadd.f32 %v1882_v44, %v1818_v24 }
 0x32b   :  { %3887 = vpow2.f32 %v1952_v39 }
 0x32c   :  { %v1920_v5 = vpop.f32.mrf.mxu1  ;;  %v1970_v59 = vsel %vm1930_vm7, %v1915_v21, %v3577_v15  ;;  %3488 = vmatmul.msk.f32.gmra.mxu2 %vm1326_vm2, %v3456_v17  ;;  %v2293_v21 = vld [vmem:[#allocation2 + $0x1a0] sm:$0xff]  ;;  %2443 = vmatpush.msrb.mxu0 %v3662_v32  ;;  %v3468_v17 = vld [vmem:[%s6382_s5 + $0x188] sm:$0xff] }
 0x32d   :  { %v1921_v13 = vadd.f32 %v1920_v5, %v1880_v42  ;;  %2002 = vmatmul.f32.gmra.mxu0 %v1970_v59  ;;  %v2290_v15 = vld [vmem:[#allocation2 + $0x188] sm:$0xff]  ;;  %v3469_v5 = vld [vmem:[%s6382_s5 + $0x190] sm:$0xff] }
 0x32e   :  { %3522 = vmatmul.msk.f32.gmra.mxu3 %vm1326_vm2, %v998_v27  ;;  %2444 = vmatpush.msrb.mxu0 %v3661_v61  ;;  %v2294_v27 = vld [vmem:[#allocation2 + $0x1a8] sm:$0xff] }
 0x32f   :  { %v1940_v54 = vmin.f32 %v1921_v13, 0.0  ;;  %vm1932_vm9 = vcmp.gt.f32.partialorder %v1921_v13, 0.0 }
 0x331   :  { %v3888_v9 = vpop.eup %3887  ;;  %v1954_v7 = vmul.f32 1.442695, %v1940_v54  ;;  %v2292_v54 = vld [vmem:[#allocation2 + $0x198] sm:$0xff] }
 0x332   :  { %v3578_v0 = vadd.f32 -1.0, %v3888_v9 }
 0x333   :  { %3889 = vpow2.f32 %v1954_v7 }
 0x334   :  { %v1923_v53 = vpop.f32.mrf.mxu1  ;;  %v1971_v47 = vsel %vm1931_vm8, %v1918_v1, %v3578_v0  ;;  %3489 = vmatmul.msk.f32.gmra.mxu2 %vm1326_vm2, %v3457_v43  ;;  %v3470_v43 = vld [vmem:[%s6382_s5 + $0x198] sm:$0xff]  ;;  %v1011_v0 = vld [vmem:[%s6382_s5 + $0xa0] sm:$0xff] }
 0x335   :  { %v1924_v45 = vadd.f32 %v1923_v53, %v1883_v10  ;;  %2005 = vmatmul.f32.gmra.mxu0 %v1971_v47 }
 0x336   :  { %3523 = vmatmul.msk.f32.gmra.mxu3 %vm1326_vm2, %v999_v35  ;;  %v3472_v35 = vld [vmem:[%s6382_s5 + $0x1a8] sm:$0xff] }
 0x337   :  { %v1941_v8 = vmin.f32 %v1924_v45, 0.0  ;;  %vm1933_vm10 = vcmp.gt.f32.partialorder %v1924_v45, 0.0 }
 0x339   :  { %v3890_v58 = vpop.eup %3889  ;;  %v1956_v14 = vmul.f32 1.442695, %v1941_v8 }
 0x33a   :  { %v3579_v3 = vadd.f32 -1.0, %v3890_v58  ;;  %v1012_v58 = vld [vmem:[%s6382_s5 + $0xa8] sm:$0xff] }
 0x33b   :  { %3891 = vpow2.f32 %v1956_v14  ;;  %v2296_v14 = vld [vmem:[#allocation2 + $0x1b8] sm:$0xff] }
 0x33c   :  { %v1972_v6 = vsel %vm1932_vm9, %v1921_v13, %v3579_v3  ;;  %3490 = vmatmul.msk.f32.gmra.mxu2 %vm1326_vm2, %v3458_v22  ;;  %v1010_v13 = vld [vmem:[%s6382_s5 + $0x98] sm:$0xff] }
 0x33d   :  { %2008 = vmatmul.f32.gmra.mxu0 %v1972_v6 }
 0x33e   :  { %3524 = vmatmul.msk.f32.gmra.mxu3 %vm1326_vm2, %v1000_v57 }
 0x341   :  { %v3892_v16 = vpop.eup %3891 }
 0x342   :  { %v3580_v36 = vadd.f32 -1.0, %v3892_v16 }
 0x344   :  { %v1973_v30 = vsel %vm1933_vm10, %v1924_v45, %v3580_v36  ;;  %3491 = vmatmul.msk.f32.gmra.mxu2 %vm1326_vm2, %v3459_v52  ;;  %v3471_v45 = vld [vmem:[%s6382_s5 + $0x1a0] sm:$0xff]  ;;  %v1013_v52 = vld [vmem:[%s6382_s5 + $0xb0] sm:$0xff]  ;;  %v2298_v36 = vld [vmem:[#allocation2 + $0x1c8] sm:$0xff] }
 0x345   :  { %2011 = vmatmul.f32.gmra.mxu0 %v1973_v30 }
 0x346   :  { %3525 = vmatmul.msk.f32.gmra.mxu3 %vm1326_vm2, %v1001_v12 }
 0x34c   :  { %3492 = vmatmul.msk.f32.gmra.mxu2 %vm1326_vm2, %v3460_v41  ;;  %v3473_v41 = vld [vmem:[%s6382_s5 + $0x1b0] sm:$0xff] }
 0x34d   :  { %2404 = vmatmul.f32.vlgmr.msra.gmra.mxu0 %v2289_v25  ;;  %v1649_v1 = vpop.f32.mrf.mxu3 }
 0x34e   :  { %3526 = vmatmul.msk.f32.gmra.mxu3 %vm1326_vm2, %v1002_v20  ;;  %v2300_v20 = vld [vmem:[#allocation2 + $0x1d8] sm:$0xff] }
 0x354   :  { %3493 = vmatmul.msk.f32.gmra.mxu2 %vm1326_vm2, %v3461_v51  ;;  %v1014_v51 = vld [vmem:[%s6382_s5 + $0xb8] sm:$0xff] }
 0x355   :  { %2407 = vmatmul.f32.gmra.mxu0 %v2291_v60  ;;  %v1652_v55 = vpop.f32.mrf.mxu3 }
 0x356   :  { %3527 = vmatmul.msk.f32.gmra.mxu3 %vm1326_vm2, %v1003_v26  ;;  %v3474_v26 = vld [vmem:[%s6382_s5 + $0x1b8] sm:$0xff] }
 0x35c   :  { %3494 = vmatmul.msk.f32.gmra.mxu2 %vm1326_vm2, %v3462_v33 }
 0x35d   :  { %2410 = vmatmul.f32.gmra.mxu0 %v2293_v21 }
 0x35e   :  { %3528 = vmatmul.msk.f32.gmra.mxu3 %vm1326_vm2, %v1004_v37  ;;  %v2302_v37 = vld [vmem:[#allocation2 + $0x1e8] sm:$0xff] }
 0x364   :  { %3495 = vmatmul.msk.f32.gmra.mxu2 %vm1326_vm2, %v3463_v34  ;;  %v1015_v34 = vld [vmem:[%s6382_s5 + $0xc0] sm:$0xff] }
 0x365   :  { %2413 = vmatmul.f32.gmra.mxu0 %v2295_v56 }
 0x366   :  { %3529 = vmatmul.msk.f32.gmra.mxu3 %vm1326_vm2, %v1005_v11  ;;  %v3475_v11 = vld [vmem:[%s6382_s5 + $0x1c0] sm:$0xff] }
 0x36c   :  { %3496 = vmatmul.msk.f32.gmra.mxu2 %vm1326_vm2, %v3464_v4 }
 0x36d   :  { %2416 = vmatmul.f32.gmra.mxu0 %v2297_v63  ;;  %v1016_v63 = vld [vmem:[%s6382_s5 + $0xc8] sm:$0xff] }
 0x36e   :  { %3530 = vmatmul.msk.f32.gmra.mxu3 %vm1326_vm2, %v1006_v49 }
 0x374   :  { %3497 = vmatmul.msk.f32.gmra.mxu2 %vm1326_vm2, %v3465_v46  ;;  %v2304_v46 = vld [vmem:[#allocation2 + $0x1f8] sm:$0xff] }
 0x375   :  { %2419 = vmatmul.f32.gmra.mxu0 %v2299_v31  ;;  %v3476_v31 = vld [vmem:[%s6382_s5 + $0x1c8] sm:$0xff] }
 0x376   :  { %3531 = vmatmul.msk.f32.gmra.mxu3 %vm1326_vm2, %v1007_v62  ;;  %v1017_v62 = vld [vmem:[%s6382_s5 + $0xd0] sm:$0xff] }
 0x37c   :  { %3498 = vmatmul.msk.f32.gmra.mxu2 %vm1326_vm2, %v3466_v29 }
 0x37d   :  { %2422 = vmatmul.f32.gmra.mxu0 %v2301_v38  ;;  %v3581_v38 = vld [vmem:[%s6382_s5 + $0x200] sm:$0xff] }
 0x37e   :  { %3532 = vmatmul.msk.f32.gmra.mxu3 %vm1326_vm2, %v1008_v48 }
 0x384   :  { %3499 = vmatmul.msk.f32.gmra.mxu2 %vm1326_vm2, %v3467_v28  ;;  %v3477_v28 = vld [vmem:[%s6382_s5 + $0x1d0] sm:$0xff] }
 0x385   :  { %2425 = vmatmul.f32.gmra.mxu0 %v2303_v18  ;;  %v1018_v18 = vld [vmem:[%s6382_s5 + $0xd8] sm:$0xff] }
 0x386   :  { %3533 = vmatmul.msk.f32.gmra.mxu3 %vm1326_vm2, %v1009_v40  ;;  %v1019_v40 = vld [vmem:[%s6382_s5 + $0xe0] sm:$0xff] }
 0x387   :  { %v1440_v19 = vpop.f32.mrf.mxu2 }
 0x388   :  { %v5536_v39 = vadd.f32 %v1649_v1, %v1440_v19  ;;  %v3582_v19 = vld [vmem:[%s6382_s5 + $0x208] sm:$0xff] }
 0x389   :  { %v1655_v42 = vpop.f32.mrf.mxu3 }
 0x38a   :  { %v5541_v2 = vpop.f32.mrf.mxu0 }
 0x38c   :  { %3500 = vmatmul.msk.f32.gmra.mxu2 %vm1326_vm2, %v3468_v17  ;;  %v3478_v17 = vld [vmem:[%s6382_s5 + $0x1d8] sm:$0xff] }
 0x38d   :  { %3663 = vmatmul.msk.f32.vlgmr.msrb.gmra.mxu0 %vm610_vm0, %v2290_v15  ;;  %v3583_v15 = vld [vmem:[%s6382_s5 + $0x210] sm:$0xff] }
 0x38e   :  { %3534 = vmatmul.msk.f32.gmra.mxu3 %vm1326_vm2, %v1010_v13  ;;  %v3584_v13 = vld [vmem:[%s6382_s5 + $0x218] sm:$0xff] }
 0x38f   :  { %v1443_v50 = vpop.f32.mrf.mxu2 }
 0x390   :  { %v5549_v23 = vadd.f32 %v1652_v55, %v1443_v50 }
 0x391   :  { %v1658_v9 = vpop.f32.mrf.mxu3 }
 0x392   :  { %v5554_v59 = vpop.f32.mrf.mxu0 }
 0x394   :  { %3501 = vmatmul.msk.f32.gmra.mxu2 %vm1326_vm2, %v3469_v5 }
 0x395   :  { %3664 = vmatmul.msk.f32.gmra.mxu0 %vm610_vm0, %v2292_v54 }
 0x396   :  { %3535 = vmatmul.msk.f32.gmra.mxu3 %vm1326_vm2, %v1011_v0 }
 0x397   :  { %v1446_v44 = vpop.f32.mrf.mxu2 }
 0x398   :  { %v5562_v7 = vadd.f32 %v1655_v42, %v1446_v44  ;;  %v3479_v42 = vld [vmem:[%s6382_s5 + $0x1e0] sm:$0xff]  ;;  %v3480_v44 = vld [vmem:[%s6382_s5 + $0x1e8] sm:$0xff] }
 0x399   :  { %v1661_v47 = vpop.f32.mrf.mxu3 }
 0x39a   :  { %v5567_v24 = vpop.f32.mrf.mxu0 }
 0x39c   :  { %3502 = vmatmul.msk.f32.gmra.mxu2 %vm1326_vm2, %v3470_v43  ;;  %v1021_v43 = vld [vmem:[%s6382_s5 + $0xf0] sm:$0xff] }
 0x39d   :  { %3665 = vmatmul.msk.f32.gmra.mxu0 %vm610_vm0, %v2294_v27  ;;  %v3481_v27 = vld [vmem:[%s6382_s5 + $0x1f0] sm:$0xff] }
 0x39e   :  { %3536 = vmatmul.msk.f32.gmra.mxu3 %vm1326_vm2, %v1012_v58  ;;  %v3482_v58 = vld [vmem:[%s6382_s5 + $0x1f8] sm:$0xff] }
 0x39f   :  { %v1449_v10 = vpop.f32.mrf.mxu2 }
 0x3a0   :  { %v5575_v53 = vadd.f32 %v1658_v9, %v1449_v10 }
 0x3a1   :  { %v1664_v6 = vpop.f32.mrf.mxu3 }
 0x3a2   :  { %v2000_v8 = vpop.f32.mrf.mxu0 }
 0x3a4   :  { %3503 = vmatmul.msk.f32.gmra.mxu2 %vm1326_vm2, %v3471_v45  ;;  %v3586_v45 = vld [vmem:[%s6382_s5 + $0x228] sm:$0xff] }
 0x3a5   :  { %3666 = vmatmul.msk.f32.gmra.mxu0 %vm610_vm0, %v2296_v14 }
 0x3a6   :  { %3537 = vmatmul.msk.f32.gmra.mxu3 %vm1326_vm2, %v1013_v52 }
 0x3a7   :  { %v1452_v22 = vpop.f32.mrf.mxu2 }
 0x3a8   :  { %v5586_v3 = vadd.f32 %v1661_v47, %v1452_v22  ;;  %v1022_v47 = vld [vmem:[%s6382_s5 + $0xf8] sm:$0xff]  ;;  %v3587_v22 = vld [vmem:[%s6382_s5 + $0x230] sm:$0xff] }
 0x3a9   :  { %v1667_v25 = vpop.f32.mrf.mxu3 }
 0x3aa   :  { %v2003_v16 = vpop.f32.mrf.mxu0 }
 0x3ac   :  { %3504 = vmatmul.msk.f32.gmra.mxu2 %vm1326_vm2, %v3472_v35 }
 0x3ad   :  { %3667 = vmatmul.msk.f32.gmra.mxu0 %vm610_vm0, %v2298_v36  ;;  %v2327_v36 = vpop.permute.xlu0 %2326 }
 0x3ae   :  { %3538 = vmatmul.msk.f32.gmra.mxu3 %vm1326_vm2, %v1014_v51 }
 0x3af   :  { %v1455_v57 = vpop.f32.mrf.mxu2 }
 0x3b0   :  { %v5597_v30 = vadd.f32 %v1664_v6, %v1455_v57 }
 0x3b1   :  { %v1670_v56 = vpop.f32.mrf.mxu3 }
 0x3b2   :  { %v2006_v12 = vpop.f32.mrf.mxu0 }
 0x3b4   :  { %3505 = vmatmul.msk.f32.gmra.mxu2 %vm1326_vm2, %v3473_v41 }
 0x3b5   :  { %3668 = vmatmul.msk.f32.gmra.mxu0 %vm610_vm0, %v2300_v20  ;;  %v3589_v20 = vld [vmem:[%s6382_s5 + $0x240] sm:$0xff] }
 0x3b6   :  { %3539 = vmatmul.msk.f32.gmra.mxu3 %vm1326_vm2, %v1015_v34 }
 0x3b7   :  { %v1458_v60 = vpop.f32.mrf.mxu2 }
 0x3b8   :  { %v5608_v33 = vadd.f32 %v1667_v25, %v1458_v60 }
 0x3ba   :  { %v2009_v21 = vpop.f32.mrf.mxu0 }
 0x3bc   :  { %3506 = vmatmul.msk.f32.gmra.mxu2 %vm1326_vm2, %v3474_v26  ;;  %v2332_v26 = vpop.permute.xlu1 %2331 }
 0x3bd   :  { %3669 = vmatmul.msk.f32.gmra.mxu0 %vm610_vm0, %v2302_v37 }
 0x3be   :  { %3540 = vmatmul.msk.f32.gmra.mxu3 %vm1326_vm2, %v1016_v63 }
 0x3bf   :  { %v1461_v4 = vpop.f32.mrf.mxu2 }
 0x3c0   :  { %v5619_v32 = vadd.f32 %v1670_v56, %v1461_v4 }
 0x3c2   :  { %v2012_v61 = vpop.f32.mrf.mxu0 }
 0x3c3   :  { %2152 = vmatpush.msra.mxu1 %v2012_v61  ;;  %v3590_v61 = vld [vmem:[%s6382_s5 + $0x248] sm:$0xff] }
 0x3c4   :  { %3507 = vmatmul.msk.f32.gmra.mxu2 %vm1326_vm2, %v3475_v11 }
 0x3c5   :  { %2153 = vmatpush.msra.mxu1 %v2009_v21  ;;  %3670 = vmatmul.msk.f32.gmra.mxu0 %vm610_vm0, %v2304_v46  ;;  %v2337_v46 = vpop.permute.xlu2 %2336 }
 0x3c6   :  { %3541 = vmatmul.msk.f32.gmra.mxu3 %vm1326_vm2, %v1017_v62 }
 0x3c7   :  { %2154 = vmatpush.msra.mxu1 %v2006_v12  ;;  %v5630_v49 = vpop.f32.mrf.mxu2 }
 0x3c9   :  { %2155 = vmatpush.msra.mxu1 %v2003_v16  ;;  %v3588_v16 = vld [vmem:[%s6382_s5 + $0x238] sm:$0xff] }
 0x3ca   :  { %v2405_v29 = vpop.f32.mrf.mxu0 }
 0x3cb   :  { %2156 = vmatpush.msra.mxu1 %v2000_v8  ;;  %v2406_v57 = vadd.f32 %v2405_v29, %v2327_v36 }
 0x3cc   :  { %3508 = vmatmul.msk.f32.gmra.mxu2 %vm1326_vm2, %v3476_v31 }
 0x3cd   :  { %2157 = vmatpush.msra.mxu1 %v5567_v24  ;;  %v3585_v24 = vld [vmem:[%s6382_s5 + $0x220] sm:$0xff] }
 0x3ce   :  { %3542 = vmatmul.msk.f32.gmra.mxu3 %vm1326_vm2, %v1018_v18 }
 0x3cf   :  { %2158 = vmatpush.msra.mxu1 %v5554_v59  ;;  %v5645_v1 = vpop.f32.mrf.mxu2  ;;  %v1020_v59 = vld [vmem:[%s6382_s5 + $0xe8] sm:$0xff] }
 0x3d1   :  { %2159 = vmatpush.msra.mxu1 %v5541_v2 }
 0x3d2   :  { %3613 = vmatmul.msk.f32.vlgmr.msra.gmra.mxu1 %vm1326_vm2, %v3581_v38  ;;  %v2408_v48 = vpop.f32.mrf.mxu0 }
 0x3d3   :  { %v2409_v21 = vadd.f32 %v2408_v48, %v2332_v26 }
 0x3d4   :  { %3509 = vmatmul.msk.f32.gmra.mxu2 %vm1326_vm2, %v3477_v28 }
 0x3d6   :  { %3543 = vmatmul.msk.f32.gmra.mxu3 %vm1326_vm2, %v1019_v40 }
 0x3d7   :  { %v5660_v55 = vpop.f32.mrf.mxu2 }
 0x3d8   :  { %6385 = vst [vmem:[#allocation3_spill] sm:$0xff] %v5660_v55 }
 0x3da   :  { %3614 = vmatmul.msk.f32.gmra.mxu1 %vm1326_vm2, %v3582_v19  ;;  %v2411_v2 = vpop.f32.mrf.mxu0 }
 0x3db   :  { %v2412_v29 = vadd.f32 %v2411_v2, %v2337_v46  ;;  %v3594_v46 = vld [vmem:[%s6382_s5 + $0x268] sm:$0xff] }
 0x3dc   :  { %3510 = vmatmul.msk.f32.gmra.mxu2 %vm1326_vm2, %v3478_v17  ;;  %v3591_v17 = vld [vmem:[%s6382_s5 + $0x250] sm:$0xff] }
 0x3de   :  { %3544 = vmatmul.msk.f32.gmra.mxu3 %vm1326_vm2, %v1020_v59 }
 0x3df   :  { %v5674_v50 = vpop.f32.mrf.mxu2 }
 0x3e2   :  { %3615 = vmatmul.msk.f32.gmra.mxu1 %vm1326_vm2, %v3583_v15  ;;  %v5680_v5 = vpop.f32.mrf.mxu0  ;;  %v2342_v15 = vpop.permute.xlu0 %2341 }
 0x3e3   :  { %v2415_v2 = vadd.f32 %v5680_v5, %v2342_v15  ;;  %v3595_v15 = vld [vmem:[%s6382_s5 + $0x270] sm:$0xff] }
 0x3e4   :  { %3511 = vmatmul.msk.f32.gmra.mxu2 %vm1326_vm2, %v3479_v42 }
 0x3e6   :  { %3545 = vmatmul.msk.f32.gmra.mxu3 %vm1326_vm2, %v1021_v43 }
 0x3e7   :  { %v5690_v54 = vpop.f32.mrf.mxu2 }
 0x3ea   :  { %3616 = vmatmul.msk.f32.gmra.mxu1 %vm1326_vm2, %v3584_v13  ;;  %v5696_v9 = vpop.f32.mrf.mxu0 }
 0x3ec   :  { %3512 = vmatmul.msk.f32.gmra.mxu2 %vm1326_vm2, %v3480_v44 }
 0x3ee   :  { %3546 = vmatmul.msk.f32.gmra.mxu3 %vm1326_vm2, %v1022_v47  ;;  %v3592_v47 = vld [vmem:[%s6382_s5 + $0x258] sm:$0xff] }
 0x3ef   :  { %v5706_v0 = vpop.f32.mrf.mxu2 }
 0x3f2   :  { %3617 = vmatmul.msk.f32.gmra.mxu1 %vm1326_vm2, %v3585_v24  ;;  %v5712_v10 = vpop.f32.mrf.mxu0 }
 0x3f4   :  { %3513 = vmatmul.msk.f32.gmra.mxu2 %vm1326_vm2, %v3481_v27 }
 0x3f7   :  { %v5722_v8 = vpop.f32.mrf.mxu2 }
 0x3fa   :  { %3618 = vmatmul.msk.f32.gmra.mxu1 %vm1326_vm2, %v3586_v45  ;;  %v5728_v14 = vpop.f32.mrf.mxu0 }
 0x3fc   :  { %3514 = vmatmul.msk.f32.gmra.mxu2 %vm1326_vm2, %v3482_v58  ;;  %v2347_v58 = vpop.permute.xlu1 %2346 }
 0x3fd   :  { %v2418_v5 = vadd.f32 %v5696_v9, %v2347_v58  ;;  %v3596_v58 = vld [vmem:[%s6382_s5 + $0x278] sm:$0xff] }
 0x3ff   :  { %v5734_v35 = vpop.f32.mrf.mxu2 }
 0x402   :  { %3619 = vmatmul.msk.f32.gmra.mxu1 %vm1326_vm2, %v3587_v22  ;;  %v5737_v6 = vpop.f32.mrf.mxu0 }
 0x407   :  { %v5742_v52 = vpop.f32.mrf.mxu2 }
 0x408   :  { %6386 = vst [vmem:[#allocation4_spill] sm:$0xff] %v5742_v52 }
 0x40a   :  { %3620 = vmatmul.msk.f32.gmra.mxu1 %vm1326_vm2, %v3588_v16  ;;  %v2446_v41 = vpop.f32.mrf.mxu0 }
 0x40b   :  { %v2447_v12 = vadd.f32 %v2446_v41, %v2406_v57 }
 0x40d   :  { %v2478_v25 = vmin.f32 %v2447_v12, 0.0  ;;  %vm2470_vm0 = vcmp.gt.f32.partialorder %v2447_v12, 0.0 }
 0x40f   :  { %v2486_v51 = vmul.f32 1.442695, %v2478_v25  ;;  %v5748_v60 = vpop.f32.mrf.mxu2 }
 0x411   :  { %3893 = vpow2.f32 %v2486_v51  ;;  %v3593_v51 = vld [vmem:[%s6382_s5 + $0x260] sm:$0xff] }
 0x412   :  { %3621 = vmatmul.msk.f32.gmra.mxu1 %vm1326_vm2, %v3589_v20  ;;  %v2449_v34 = vpop.f32.mrf.mxu0  ;;  %v2352_v20 = vpop.permute.xlu2 %2351 }
 0x413   :  { %v2450_v37 = vadd.f32 %v2449_v34, %v2409_v21  ;;  %v2421_v9 = vadd.f32 %v5712_v10, %v2352_v20 }
 0x415   :  { %v2479_v56 = vmin.f32 %v2450_v37, 0.0  ;;  %vm2471_vm11 = vcmp.gt.f32.partialorder %v2450_v37, 0.0 }
 0x417   :  { %v3894_v4 = vpop.eup %3893  ;;  %v2488_v11 = vmul.f32 1.442695, %v2479_v56  ;;  %v5754_v63 = vpop.f32.mrf.mxu2 }
 0x418   :  { %v3671_v31 = vadd.f32 -1.0, %v3894_v4 }
 0x419   :  { %3895 = vpow2.f32 %v2488_v11 }
 0x41a   :  { %v2510_v62 = vsel %vm2470_vm0, %v2447_v12, %v3671_v31  ;;  %3622 = vmatmul.msk.f32.gmra.mxu1 %vm1326_vm2, %v3590_v61  ;;  %v2452_v38 = vpop.f32.mrf.mxu0  ;;  %v2357_v31 = vpop.permute.xlu0 %2356 }
 0x41b   :  { %v2453_v28 = vadd.f32 %v2452_v38, %v2412_v29  ;;  %2534 = vmatmul.f32.vlgmr.msra.gmra.mxu2 %v2510_v62  ;;  %v2424_v62 = vadd.f32 %v5728_v14, %v2357_v31 }
 0x41d   :  { %v2480_v48 = vmin.f32 %v2453_v28, 0.0  ;;  %vm2472_vm12 = vcmp.gt.f32.partialorder %v2453_v28, 0.0 }
 0x41f   :  { %v3896_v18 = vpop.eup %3895  ;;  %v2490_v19 = vmul.f32 1.442695, %v2480_v48  ;;  %v5760_v40 = vpop.f32.mrf.mxu2 }
 0x420   :  { %v3672_v42 = vadd.f32 -1.0, %v3896_v18 }
 0x421   :  { %3897 = vpow2.f32 %v2490_v19 }
 0x422   :  { %3623 = vmatmul.msk.f32.gmra.mxu1 %vm1326_vm2, %v3591_v17  ;;  %v2455_v59 = vpop.f32.mrf.mxu0  ;;  %v2511_v13 = vsel %vm2471_vm11, %v2450_v37, %v3672_v42  ;;  %v2362_v42 = vpop.permute.xlu1 %2361 }
 0x423   :  { %v2456_v44 = vadd.f32 %v2455_v59, %v2415_v2  ;;  %2537 = vmatmul.f32.gmra.mxu2 %v2511_v13  ;;  %v2427_v14 = vadd.f32 %v5737_v6, %v2362_v42  ;;  %v3604_v42 = vld [vmem:[%s6382_s5 + $0x2b8] sm:$0xff] }
 0x425   :  { %v2481_v43 = vmin.f32 %v2456_v44, 0.0  ;;  %vm2473_vm13 = vcmp.gt.f32.partialorder %v2456_v44, 0.0 }
 0x427   :  { %v3898_v24 = vpop.eup %3897  ;;  %v2492_v27 = vmul.f32 1.442695, %v2481_v43  ;;  %v5767_v45 = vpop.f32.mrf.mxu2 }
 0x428   :  { %v3673_v22 = vadd.f32 -1.0, %v3898_v24 }
 0x429   :  { %3899 = vpow2.f32 %v2492_v27 }
 0x42a   :  { %3624 = vmatmul.msk.f32.gmra.mxu1 %vm1326_vm2, %v3592_v47  ;;  %v2458_v16 = vpop.f32.mrf.mxu0  ;;  %v2512_v36 = vsel %vm2472_vm12, %v2453_v28, %v3673_v22 }
 0x42b   :  { %v2459_v57 = vadd.f32 %v2458_v16, %v2418_v5  ;;  %2540 = vmatmul.f32.gmra.mxu2 %v2512_v36 }
 0x42d   :  { %v2482_v41 = vmin.f32 %v2459_v57, 0.0  ;;  %vm2474_vm14 = vcmp.gt.f32.partialorder %v2459_v57, 0.0 }
 0x42f   :  { %v3900_v12 = vpop.eup %3899  ;;  %v2494_v25 = vmul.f32 1.442695, %v2482_v41  ;;  %v5774_v21 = vpop.f32.mrf.mxu2 }
 0x430   :  { %v3674_v26 = vadd.f32 -1.0, %v3900_v12 }
 0x431   :  { %3901 = vpow2.f32 %v2494_v25 }
 0x432   :  { %3625 = vmatmul.msk.f32.gmra.mxu1 %vm1326_vm2, %v3593_v51  ;;  %v2461_v34 = vpop.f32.mrf.mxu0  ;;  %v2513_v37 = vsel %vm2473_vm13, %v2456_v44, %v3674_v26  ;;  %v3598_v51 = vld [vmem:[%s6382_s5 + $0x288] sm:$0xff] }
 0x433   :  { %v2462_v56 = vadd.f32 %v2461_v34, %v2421_v9  ;;  %2543 = vmatmul.f32.gmra.mxu2 %v2513_v37  ;;  %v3599_v9 = vld [vmem:[%s6382_s5 + $0x290] sm:$0xff] }
 0x435   :  { %v2483_v4 = vmin.f32 %v2462_v56, 0.0  ;;  %vm2475_vm15 = vcmp.gt.f32.partialorder %v2462_v56, 0.0 }
 0x437   :  { %v3902_v11 = vpop.eup %3901  ;;  %v2496_v61 = vmul.f32 1.442695, %v2483_v4  ;;  %v5783_v28 = vpop.f32.mrf.mxu2 }
 0x438   :  { %v3675_v29 = vadd.f32 -1.0, %v3902_v11  ;;  %v5825_v4 = vpop.f32.mrf.mxu3 }
 0x439   :  { %3903 = vpow2.f32 %v2496_v61 }
 0x43a   :  { %3626 = vmatmul.msk.f32.gmra.mxu1 %vm1326_vm2, %v3594_v46  ;;  %v2464_v10 = vpop.f32.mrf.mxu0  ;;  %v2514_v38 = vsel %vm2474_vm14, %v2459_v57, %v3675_v29  ;;  %v3597_v57 = vld [vmem:[%s6382_s5 + $0x280] sm:$0xff] }
 0x43b   :  { %v2465_v48 = vadd.f32 %v2464_v10, %v2424_v62  ;;  %2546 = vmatmul.f32.gmra.mxu2 %v2514_v38  ;;  %v3601_v46 = vld [vmem:[%s6382_s5 + $0x2a0] sm:$0xff]  ;;  %v3602_v10 = vld [vmem:[%s6382_s5 + $0x2a8] sm:$0xff] }
 0x43d   :  { %v2484_v18 = vmin.f32 %v2465_v48, 0.0  ;;  %vm2476_vm1 = vcmp.gt.f32.partialorder %v2465_v48, 0.0 }
 0x43f   :  { %v3904_v19 = vpop.eup %3903  ;;  %v2498_v17 = vmul.f32 1.442695, %v2484_v18  ;;  %v5790_v43 = vpop.f32.mrf.mxu2  ;;  %v3603_v18 = vld [vmem:[%s6382_s5 + $0x2b0] sm:$0xff] }
 0x440   :  { %v3676_v2 = vadd.f32 -1.0, %v3904_v19  ;;  %v5836_v31 = vpop.f32.mrf.mxu3 }
 0x441   :  { %3905 = vpow2.f32 %v2498_v17 }
 0x442   :  { %3627 = vmatmul.msk.f32.gmra.mxu1 %vm1326_vm2, %v3595_v15  ;;  %v2467_v59 = vpop.f32.mrf.mxu0  ;;  %v2515_v13 = vsel %vm2475_vm15, %v2462_v56, %v3676_v2  ;;  %v3600_v56 = vld [vmem:[%s6382_s5 + $0x298] sm:$0xff] }
 0x443   :  { %v2468_v44 = vadd.f32 %v2467_v59, %v2427_v14  ;;  %2549 = vmatmul.f32.gmra.mxu2 %v2515_v13  ;;  %v3605_v59 = vld [vmem:[%s6382_s5 + $0x2c0] sm:$0xff] }
 0x445   :  { %v2485_v24 = vmin.f32 %v2468_v44, 0.0  ;;  %vm2477_vm3 = vcmp.gt.f32.partialorder %v2468_v44, 0.0 }
 0x447   :  { %v3906_v27 = vpop.eup %3905  ;;  %v2500_v47 = vmul.f32 1.442695, %v2485_v24  ;;  %v5796_v5 = vpop.f32.mrf.mxu2 }
 0x448   :  { %v3677_v22 = vadd.f32 -1.0, %v3906_v27  ;;  %v5846_v38 = vpop.f32.mrf.mxu3  ;;  %v3606_v27 = vld [vmem:[%s6382_s5 + $0x2c8] sm:$0xff] }
 0x449   :  { %3907 = vpow2.f32 %v2500_v47  ;;  %6390 = vst [vmem:[#allocation8_spill] sm:$0xff] %v5846_v38 }
 0x44a   :  { %3628 = vmatmul.msk.f32.gmra.mxu1 %vm1326_vm2, %v3596_v58  ;;  %v2516_v6 = vsel %vm2476_vm1, %v2465_v48, %v3677_v22 }
 0x44b   :  { %2552 = vmatmul.f32.gmra.mxu2 %v2516_v6  ;;  %v3607_v6 = vld [vmem:[%s6382_s5 + $0x2d0] sm:$0xff] }
 0x44f   :  { %v3908_v16 = vpop.eup %3907  ;;  %v5798_v36 = vpop.f32.mrf.mxu1 }
 0x450   :  { %v3678_v41 = vadd.f32 -1.0, %v3908_v16  ;;  %v5809_v20 = vpop.f32.mrf.mxu2  ;;  %v5856_v17 = vpop.f32.mrf.mxu3 }
 0x452   :  { %3629 = vmatmul.msk.f32.gmra.mxu1 %vm1326_vm2, %v3597_v57  ;;  %v2517_v12 = vsel %vm2477_vm3, %v2468_v44, %v3678_v41 }
 0x453   :  { %2555 = vmatmul.f32.gmra.mxu2 %v2517_v12  ;;  %v3608_v12 = vld [vmem:[%s6382_s5 + $0x2d8] sm:$0xff] }
 0x457   :  { %v5804_v25 = vpop.f32.mrf.mxu1 }
 0x458   :  { %v5818_v34 = vpop.f32.mrf.mxu2  ;;  %v5871_v13 = vpop.f32.mrf.mxu3 }
 0x459   :  { %6387 = vst [vmem:[#allocation5_spill] sm:$0xff] %v5818_v34 }
 0x45a   :  { %3630 = vmatmul.msk.f32.gmra.mxu1 %vm1326_vm2, %v3598_v51 }
 0x45f   :  { %v5812_v26 = vpop.f32.mrf.mxu1 }
 0x460   :  { %v5828_v11 = vpop.f32.mrf.mxu2  ;;  %v5882_v47 = vpop.f32.mrf.mxu3 }
 0x461   :  { %6388 = vst [vmem:[#allocation6_spill] sm:$0xff] %v5828_v11 }
 0x462   :  { %3631 = vmatmul.msk.f32.gmra.mxu1 %vm1326_vm2, %v3599_v9 }
 0x467   :  { %v5820_v37 = vpop.f32.mrf.mxu1 }
 0x468   :  { %v5838_v29 = vpop.f32.mrf.mxu2  ;;  %v5890_v16 = vpop.f32.mrf.mxu3 }
 0x469   :  { %6389 = vst [vmem:[#allocation7_spill] sm:$0xff] %v5838_v29 }
 0x46a   :  { %3632 = vmatmul.msk.f32.gmra.mxu1 %vm1326_vm2, %v3600_v56 }
 0x46f   :  { %v5830_v61 = vpop.f32.mrf.mxu1 }
 0x470   :  { %v5853_v19 = vpop.f32.mrf.mxu2  ;;  %v5898_v9 = vpop.f32.mrf.mxu3 }
 0x471   :  { %6391 = vst [vmem:[#allocation9_spill] sm:$0xff] %v5853_v19 }
 0x472   :  { %3633 = vmatmul.msk.f32.gmra.mxu1 %vm1326_vm2, %v3601_v46  ;;  %v3609_v46 = vld [vmem:[%s6382_s5 + $0x2e0] sm:$0xff] }
 0x477   :  { %v5840_v62 = vpop.f32.mrf.mxu1 }
 0x478   :  { %v5864_v2 = vpop.f32.mrf.mxu2 }
 0x479   :  { %6392 = vst [vmem:[#allocation10_spill] sm:$0xff] %v5864_v2 }
 0x47a   :  { %3634 = vmatmul.msk.f32.gmra.mxu1 %vm1326_vm2, %v3602_v10 }
 0x47f   :  { %v5848_v48 = vpop.f32.mrf.mxu1 }
 0x480   :  { %v5874_v44 = vpop.f32.mrf.mxu2 }
 0x481   :  { %6393 = vst [vmem:[#allocation11_spill] sm:$0xff] %v5874_v44  ;;  %v3612_v44 = vld [vmem:[%s6382_s5 + $0x2f8] sm:$0xff] }
 0x482   :  { %3635 = vmatmul.msk.f32.gmra.mxu1 %vm1326_vm2, %v3603_v18 }
 0x487   :  { %v5858_v15 = vpop.f32.mrf.mxu1 }
 0x48a   :  { %3636 = vmatmul.msk.f32.gmra.mxu1 %vm1326_vm2, %v3604_v42  ;;  %v3610_v42 = vld [vmem:[%s6382_s5 + $0x2e8] sm:$0xff] }
 0x48f   :  { %v5866_v14 = vpop.f32.mrf.mxu1 }
 0x492   :  { %3637 = vmatmul.msk.f32.gmra.mxu1 %vm1326_vm2, %v3605_v59  ;;  %v5911_v59 = vpop.f32.mrf.mxu3 }
 0x493   :  { %6396 = vst [vmem:[#allocation14_spill] sm:$0xff] %v5911_v59 }
 0x497   :  { %v5876_v24 = vpop.f32.mrf.mxu1 }
 0x49a   :  { %3638 = vmatmul.msk.f32.gmra.mxu1 %vm1326_vm2, %v3606_v27 }
 0x49e   :  { %v2535_v58 = vpop.f32.mrf.mxu2 }
 0x49f   :  { %v5884_v22 = vpop.f32.mrf.mxu1 }
 0x4a0   :  { %6394 = vst [vmem:[#allocation12_spill] sm:$0xff] %v5884_v22 }
 0x4a2   :  { %3639 = vmatmul.msk.f32.gmra.mxu1 %vm1326_vm2, %v3607_v6 }
 0x4a6   :  { %v2538_v57 = vpop.f32.mrf.mxu2 }
 0x4a7   :  { %v5892_v41 = vpop.f32.mrf.mxu1 }
 0x4a8   :  { %6395 = vst [vmem:[#allocation13_spill] sm:$0xff] %v5892_v41 }
 0x4aa   :  { %3640 = vmatmul.msk.f32.gmra.mxu1 %vm1326_vm2, %v3608_v12  ;;  %v3611_v12 = vld [vmem:[%s6382_s5 + $0x2f0] sm:$0xff] }
 0x4ae   :  { %v2541_v51 = vpop.f32.mrf.mxu2 }
 0x4af   :  { %v5900_v56 = vpop.f32.mrf.mxu1 }
 0x4b2   :  { %3641 = vmatmul.msk.f32.gmra.mxu1 %vm1326_vm2, %v3609_v46  ;;  %v1700_v46 = vpop.f32.mrf.mxu3 }
 0x4b3   :  { %v1701_v2 = vadd.f32 %v1700_v46, %v5748_v60  ;;  %v3679_v60 = vld [vmem:[%s6382_s5 + $0x300] sm:$0xff] }
 0x4b6   :  { %v2544_v10 = vpop.f32.mrf.mxu2 }
 0x4b7   :  { %v5906_v18 = vpop.f32.mrf.mxu1 }
 0x4ba   :  { %3642 = vmatmul.msk.f32.gmra.mxu1 %vm1326_vm2, %v3610_v42  ;;  %v1703_v42 = vpop.f32.mrf.mxu3 }
 0x4bb   :  { %v1704_v38 = vadd.f32 %v1703_v42, %v5754_v63 }
 0x4be   :  { %v2547_v27 = vpop.f32.mrf.mxu2 }
 0x4bf   :  { %v5914_v6 = vpop.f32.mrf.mxu1 }
 0x4c2   :  { %3643 = vmatmul.msk.f32.gmra.mxu1 %vm1326_vm2, %v3611_v12  ;;  %v1706_v59 = vpop.f32.mrf.mxu3 }
 0x4c6   :  { %v2550_v34 = vpop.f32.mrf.mxu2 }
 0x4c7   :  { %v5920_v11 = vpop.f32.mrf.mxu1 }
 0x4ca   :  { %3644 = vmatmul.msk.f32.gmra.mxu1 %vm1326_vm2, %v3612_v44  ;;  %v1709_v41 = vpop.f32.mrf.mxu3 }
 0x4ce   :  { %v2553_v29 = vpop.f32.mrf.mxu2 }
 0x4cf   :  { %v5926_v19 = vpop.f32.mrf.mxu1 }
 0x4d2   :  { %v1712_v63 = vpop.f32.mrf.mxu3 }
 0x4d6   :  { %v2556_v22 = vpop.f32.mrf.mxu2 }
 0x4d7   :  { %v2212_v52 = vpop.f32.mrf.mxu1  ;;  %2696 = vmatpush.msrb.mxu3 %v2556_v22 }
 0x4d8   :  { %v5929_v12 = vadd.f32 %v2212_v52, %v1701_v2  ;;  %v1707_v52 = vadd.f32 %v1706_v59, %v5760_v40  ;;  %v3681_v40 = vld [vmem:[%s6382_s5 + $0x310] sm:$0xff] }
 0x4d9   :  { %2697 = vmatpush.msrb.mxu3 %v2553_v29 }
 0x4db   :  { %2698 = vmatpush.msrb.mxu3 %v2550_v34 }
 0x4dd   :  { %2699 = vmatpush.msrb.mxu3 %v2547_v27 }
 0x4df   :  { %v2215_v55 = vpop.f32.mrf.mxu1  ;;  %2700 = vmatpush.msrb.mxu3 %v2544_v10 }
 0x4e0   :  { %v5932_v44 = vadd.f32 %v2215_v55, %v1704_v38  ;;  %v3680_v55 = vld [vmem:[%s6382_s5 + $0x308] sm:$0xff]  ;;  %v1710_v38 = vadd.f32 %v1709_v41, %v5767_v45  ;;  %v3682_v45 = vld [vmem:[%s6382_s5 + $0x318] sm:$0xff] }
 0x4e1   :  { %2701 = vmatpush.msrb.mxu3 %v2541_v51 }
 0x4e3   :  { %2702 = vmatpush.msrb.mxu3 %v2538_v57  ;;  %v1713_v57 = vadd.f32 %v1712_v63, %v5774_v21  ;;  %v3683_v21 = vld [vmem:[%s6382_s5 + $0x320] sm:$0xff] }
 0x4e5   :  { %2703 = vmatpush.msrb.mxu3 %v2535_v58  ;;  %v1715_v58 = vpop.f32.mrf.mxu3 }
 0x4e6   :  { %3711 = vmatmul.msk.f32.vlgmr.msrb.gmra.mxu3 %vm1326_vm2, %v3679_v60  ;;  %v1716_v41 = vadd.f32 %v1715_v58, %v5783_v28  ;;  %v3684_v28 = vld [vmem:[%s6382_s5 + $0x328] sm:$0xff] }
 0x4e7   :  { %v2218_v34 = vpop.f32.mrf.mxu1 }
 0x4e8   :  { %v5939_v29 = vadd.f32 %v2218_v34, %v1707_v52 }
 0x4ed   :  { %v1718_v59 = vpop.f32.mrf.mxu3 }
 0x4ee   :  { %3712 = vmatmul.msk.f32.gmra.mxu3 %vm1326_vm2, %v3680_v55  ;;  %v1719_v42 = vadd.f32 %v1718_v59, %v5790_v43  ;;  %v3685_v43 = vld [vmem:[%s6382_s5 + $0x330] sm:$0xff] }
 0x4ef   :  { %v2221_v2 = vpop.f32.mrf.mxu1 }
 0x4f0   :  { %v5946_v22 = vadd.f32 %v2221_v2, %v1710_v38 }
 0x4f5   :  { %v1721_v34 = vpop.f32.mrf.mxu3 }
 0x4f6   :  { %3713 = vmatmul.msk.f32.gmra.mxu3 %vm1326_vm2, %v3681_v40  ;;  %v1722_v63 = vadd.f32 %v1721_v34, %v5796_v5  ;;  %v3686_v5 = vld [vmem:[%s6382_s5 + $0x338] sm:$0xff] }
 0x4f7   :  { %v2224_v51 = vpop.f32.mrf.mxu1 }
 0x4f8   :  { %v5953_v10 = vadd.f32 %v2224_v51, %v1713_v57  ;;  %v3687_v51 = vld [vmem:[%s6382_s5 + $0x340] sm:$0xff] }
 0x4fd   :  { %v1724_v2 = vpop.f32.mrf.mxu3 }
 0x4fe   :  { %3714 = vmatmul.msk.f32.gmra.mxu3 %vm1326_vm2, %v3682_v45  ;;  %v1725_v40 = vadd.f32 %v1724_v2, %v5809_v20  ;;  %v3688_v20 = vld [vmem:[%s6382_s5 + $0x348] sm:$0xff] }
 0x4ff   :  { %v2227_v27 = vpop.f32.mrf.mxu1 }
 0x500   :  { %v5960_v46 = vadd.f32 %v2227_v27, %v1716_v41  ;;  %v3689_v41 = vld [vmem:[%s6382_s5 + $0x350] sm:$0xff]  ;;  %v3690_v27 = vld [vmem:[%s6382_s5 + $0x358] sm:$0xff] }
 0x505   :  { %v5995_v45 = vpop.f32.mrf.mxu3 }
 0x506   :  { %3715 = vmatmul.msk.f32.gmra.mxu3 %vm1326_vm2, %v3683_v21 }
 0x507   :  { %v2230_v60 = vpop.f32.mrf.mxu1 }
 0x508   :  { %v5967_v52 = vadd.f32 %v2230_v60, %v1719_v42  ;;  %v3691_v42 = vld [vmem:[%s6382_s5 + $0x360] sm:$0xff]  ;;  %v3692_v60 = vld [vmem:[%s6382_s5 + $0x368] sm:$0xff] }
 0x50d   :  { %v6001_v59 = vpop.f32.mrf.mxu3 }
 0x50e   :  { %3716 = vmatmul.msk.f32.gmra.mxu3 %vm1326_vm2, %v3684_v28  ;;  %v3693_v28 = vld [vmem:[%s6382_s5 + $0x370] sm:$0xff] }
 0x50f   :  { %v2233_v55 = vpop.f32.mrf.mxu1 }
 0x510   :  { %v5974_v38 = vadd.f32 %v2233_v55, %v1722_v63  ;;  %v3694_v55 = vld [vmem:[%s6382_s5 + $0x378] sm:$0xff] }
 0x515   :  { %v6007_v21 = vpop.f32.mrf.mxu3 }
 0x516   :  { %3717 = vmatmul.msk.f32.gmra.mxu3 %vm1326_vm2, %v3685_v43  ;;  %v3695_v43 = vld [vmem:[%s6382_s5 + $0x380] sm:$0xff] }
 0x517   :  { %v2236_v58 = vpop.f32.mrf.mxu1 }
 0x518   :  { %v5981_v57 = vadd.f32 %v2236_v58, %v1725_v40  ;;  %v2257_v40 = vadd.f32 %v5798_v36, %v5536_v39  ;;  %v2259_v39 = vadd.f32 %v5812_v26, %v5562_v7  ;;  %v2261_v7 = vadd.f32 %v5830_v61, %v5586_v3 }
 0x519   :  { %v2263_v3 = vadd.f32 %v5848_v48, %v5608_v33  ;;  %v1674_v33 = vadd.f32 %v5825_v4, %v5630_v49 }
 0x51b   :  { %v2265_v48 = vadd.f32 %v5866_v14, %v1674_v33 }
 0x51d   :  { %v6016_v34 = vpop.f32.mrf.mxu3 }
 0x51e   :  { %3718 = vmatmul.msk.f32.gmra.mxu3 %vm1326_vm2, %v3686_v5 }
 0x525   :  { %v6023_v63 = vpop.f32.mrf.mxu3 }
 0x526   :  { %3719 = vmatmul.msk.f32.gmra.mxu3 %vm1326_vm2, %v3687_v51  ;;  %v3696_v51 = vld [vmem:[%s6382_s5 + $0x388] sm:$0xff] }
 0x52d   :  { %v6029_v2 = vpop.f32.mrf.mxu3 }
 0x52e   :  { %3720 = vmatmul.msk.f32.gmra.mxu3 %vm1326_vm2, %v3688_v20  ;;  %v2258_v20 = vadd.f32 %v5804_v25, %v5549_v23  ;;  %v2260_v23 = vadd.f32 %v5820_v37, %v5575_v53  ;;  %v2262_v53 = vadd.f32 %v5840_v62, %v5597_v30  ;;  %v2264_v30 = vadd.f32 %v5858_v15, %v5619_v32  ;;  %v3704_v32 = vld [vmem:[%s6382_s5 + $0x3c8] sm:$0xff]  ;;  %v6107_v15 = vpop.permute.xlu2 %3022 }
 0x536   :  { %3721 = vmatmul.msk.f32.gmra.mxu3 %vm1326_vm2, %v3689_v41 }
 0x53e   :  { %3722 = vmatmul.msk.f32.gmra.mxu3 %vm1326_vm2, %v3690_v27 }
 0x546   :  { %3723 = vmatmul.msk.f32.gmra.mxu3 %vm1326_vm2, %v3691_v42  ;;  %v3697_v42 = vld [vmem:[%s6382_s5 + $0x390] sm:$0xff] }
 0x54e   :  { %3724 = vmatmul.msk.f32.gmra.mxu3 %vm1326_vm2, %v3692_v60 }
 0x556   :  { %3725 = vmatmul.msk.f32.gmra.mxu3 %vm1326_vm2, %v3693_v28  ;;  %v3698_v28 = vld [vmem:[%s6382_s5 + $0x398] sm:$0xff] }
 0x55e   :  { %3726 = vmatmul.msk.f32.gmra.mxu3 %vm1326_vm2, %v3694_v55 }
 0x566   :  { %3727 = vmatmul.msk.f32.gmra.mxu3 %vm1326_vm2, %v3695_v43  ;;  %v3699_v43 = vld [vmem:[%s6382_s5 + $0x3a0] sm:$0xff] }
 0x569   :  { %v2705_v58 = vpop.f32.mrf.mxu3 }
 0x56a   :  { %v6037_v5 = vadd.f32 %v2705_v58, %v2257_v40  ;;  %v3700_v58 = vld [vmem:[%s6382_s5 + $0x3a8] sm:$0xff] }
 0x56e   :  { %3728 = vmatmul.msk.f32.gmra.mxu3 %vm1326_vm2, %v3696_v51 }
 0x571   :  { %v2708_v41 = vpop.f32.mrf.mxu3 }
 0x572   :  { %v6045_v27 = vadd.f32 %v2708_v41, %v2258_v20  ;;  %v3701_v20 = vld [vmem:[%s6382_s5 + $0x3b0] sm:$0xff] }
 0x576   :  { %3729 = vmatmul.msk.f32.gmra.mxu3 %vm1326_vm2, %v3697_v42  ;;  %v3702_v42 = vld [vmem:[%s6382_s5 + $0x3b8] sm:$0xff] }
 0x579   :  { %v2711_v36 = vpop.f32.mrf.mxu3 }
 0x57a   :  { %v6053_v60 = vadd.f32 %v2711_v36, %v2259_v39  ;;  %v3703_v36 = vld [vmem:[%s6382_s5 + $0x3c0] sm:$0xff] }
 0x57e   :  { %3730 = vmatmul.msk.f32.gmra.mxu3 %vm1326_vm2, %v3698_v28 }
 0x581   :  { %v2714_v25 = vpop.f32.mrf.mxu3 }
 0x582   :  { %v6061_v55 = vadd.f32 %v2714_v25, %v2260_v23  ;;  %v1677_v25 = vadd.f32 %v5836_v31, %v5645_v1  ;;  %v3706_v31 = vld [vmem:[%s6382_s5 + $0x3d8] sm:$0xff] }
 0x584   :  { %v2266_v49 = vadd.f32 %v5876_v24, %v1677_v25 }
 0x586   :  { %3731 = vmatmul.msk.f32.gmra.mxu3 %vm1326_vm2, %v3699_v43  ;;  %v6112_v43 = vpop.permute.xlu0 %3017 }
 0x589   :  { %v2717_v26 = vpop.f32.mrf.mxu3 }
 0x58a   :  { %v6069_v40 = vadd.f32 %v2717_v26, %v2261_v7  ;;  %v3705_v7 = vld [vmem:[%s6382_s5 + $0x3d0] sm:$0xff]  ;;  %v6120_v26 = vpop.permute.xlu2 %3012 }
 0x58e   :  { %3732 = vmatmul.msk.f32.gmra.mxu3 %vm1326_vm2, %v3700_v58  ;;  %v2943_v58 = vpop.permute.xlu1 %2942  ;;  %v2938_v1 = vpop.permute.xlu0 %2937 }
 0x591   :  { %v2720_v37 = vpop.f32.mrf.mxu3 }
 0x592   :  { %v6077_v51 = vadd.f32 %v2720_v37, %v2262_v53  ;;  %v2933_v24 = vpop.permute.xlu2 %2932 }
 0x596   :  { %3733 = vmatmul.msk.f32.gmra.mxu3 %vm1326_vm2, %v3701_v20  ;;  %v6127_v20 = vpop.permute.xlu1 %3007 }
 0x599   :  { %v2723_v61 = vpop.f32.mrf.mxu3 }
 0x59a   :  { %v6085_v41 = vadd.f32 %v2723_v61, %v2263_v3  ;;  %v3707_v3 = vld [vmem:[%s6382_s5 + $0x3e0] sm:$0xff]  ;;  %v6132_v61 = vpop.permute.xlu0 %3002 }
 0x59b   :  { %6397 = vst [vmem:[#allocation15_spill] sm:$0xff] %v6132_v61 }
 0x59e   :  { %3734 = vmatmul.msk.f32.gmra.mxu3 %vm1326_vm2, %v3702_v42 }
 0x5a1   :  { %v2726_v62 = vpop.f32.mrf.mxu3 }
 0x5a2   :  { %v6093_v39 = vadd.f32 %v2726_v62, %v2264_v30  ;;  %v6135_v30 = vpop.permute.xlu2 %2997  ;;  %v3708_v62 = vld [vmem:[%s6382_s5 + $0x3e8] sm:$0xff]  ;;  %v2923_v33 = vpop.permute.xlu0 %2922 }
 0x5a3   :  { %6398 = vst [vmem:[#allocation16_spill] sm:$0xff] %v6135_v30  ;;  %v3710_v30 = vld [vmem:[%s6382_s5 + $0x3f8] sm:$0xff] }
 0x5a6   :  { %3735 = vmatmul.msk.f32.gmra.mxu3 %vm1326_vm2, %v3703_v36  ;;  %v2928_v36 = vpop.permute.xlu1 %2927 }
 0x5a9   :  { %v2729_v28 = vpop.f32.mrf.mxu3 }
 0x5aa   :  { %v6102_v23 = vadd.f32 %v2729_v28, %v2265_v48  ;;  %v3709_v28 = vld [vmem:[%s6382_s5 + $0x3f0] sm:$0xff] }
 0x5ae   :  { %3736 = vmatmul.msk.f32.gmra.mxu3 %vm1326_vm2, %v3704_v32  ;;  %v2918_v32 = vpop.permute.xlu2 %2917  ;;  %v6144_v25 = vpop.permute.xlu1 %2992 }
 0x5af   :  { %6399 = vst [vmem:[#allocation17_spill] sm:$0xff] %v6144_v25 }
 0x5b1   :  { %v2732_v4 = vpop.f32.mrf.mxu3 }
 0x5b2   :  { %v6115_v14 = vadd.f32 %v2732_v4, %v2266_v49  ;;  %v1692_v49 = vadd.f32 %v5890_v16, %v5722_v8  ;;  %v6149_v4 = vpop.permute.xlu0 %2987  ;;  %v1686_v16 = vadd.f32 %v5871_v13, %v5690_v54 }
 0x5b3   :  { %6400 = vst [vmem:[#allocation18_spill] sm:$0xff] %v6149_v4 }
 0x5b6   :  { %3737 = vmatmul.msk.f32.gmra.mxu3 %vm1326_vm2, %v3705_v7  ;;  %v2271_v7 = vadd.f32 %v5914_v6, %v1692_v49  ;;  %v6160_v8 = vpop.permute.xlu2 %2982  ;;  %v1695_v6 = vadd.f32 %v5898_v9, %v5734_v35  ;;  %v6402_v35 = vld [vmem:[#allocation13_spill] sm:$0xff] }
 0x5b7   :  { %6401 = vst [vmem:[#allocation19_spill] sm:$0xff] %v6160_v8 }
 0x5b8   :  { %v2272_v49 = vadd.f32 %v5920_v11, %v1695_v6  ;;  %v6405_v11 = vld [vmem:[#allocation4_spill] sm:$0xff]  ;;  %v6406_v6 = vld [vmem:[#allocation14_spill] sm:$0xff] }
 0x5b9   :  { %v2735_v53 = vpop.f32.mrf.mxu3  ;;  %v1698_v8 = vadd.f32 %v6406_v6, %v6405_v11 }
 0x5be   :  { %3738 = vmatmul.msk.f32.gmra.mxu3 %vm1326_vm2, %v3706_v31 }
 0x5c1   :  { %v2738_v37 = vpop.f32.mrf.mxu3 }
 0x5c6   :  { %3739 = vmatmul.msk.f32.gmra.mxu3 %vm1326_vm2, %v3707_v3  ;;  %v1689_v3 = vadd.f32 %v5882_v47, %v5706_v0  ;;  %v2913_v0 = vpop.permute.xlu1 %2912  ;;  %v2269_v47 = vadd.f32 %v5900_v56, %v1686_v16 }
 0x5c8   :  { %v2270_v25 = vadd.f32 %v5906_v18, %v1689_v3  ;;  %v1683_v18 = vadd.f32 %v5856_v17, %v5674_v50 }
 0x5c9   :  { %v2741_v42 = vpop.f32.mrf.mxu3 }
 0x5ca   :  { %v2813_v3 = vadd.f32 %v2741_v42, %v2269_v47  ;;  %v2268_v9 = vadd.f32 %v6402_v35, %v1683_v18  ;;  %v6407_v42 = vld [vmem:[#allocation12_spill] sm:$0xff]  ;;  %v2273_v47 = vadd.f32 %v5926_v19, %v1698_v8  ;;  %v6197_v8 = vadd.f32 %v2913_v0, %v6115_v14 }
 0x5cc   :  { %v2812_v56 = vadd.f32 %v2738_v37, %v2268_v9  ;;  %v6179_v50 = vadd.f32 %v2928_v36, %v2813_v3  ;;  %vm3066_vm10 = vcmp.gt.f32.partialorder %v6197_v8, 0.0 }
 0x5ce   :  { %3740 = vmatmul.msk.f32.gmra.mxu3 %vm1326_vm2, %v3708_v62  ;;  %v6184_v18 = vadd.f32 %v2923_v33, %v2812_v56  ;;  %vm3069_vm7 = vcmp.gt.f32.partialorder %v6179_v50, 0.0 }
 0x5d0   :  { %v3100_v19 = vmin.f32 %v6184_v18, 0.0  ;;  %vm3068_vm8 = vcmp.gt.f32.partialorder %v6184_v18, 0.0 }
 0x5d1   :  { %v2744_v48 = vpop.f32.mrf.mxu3 }
 0x5d2   :  { %v3143_v56 = vmul.f32 1.442695, %v3100_v19 }
 0x5d6   :  { %3741 = vmatmul.msk.f32.gmra.mxu3 %vm1326_vm2, %v3709_v28  ;;  %v2814_v28 = vadd.f32 %v2744_v48, %v2270_v25  ;;  %v6404_v25 = vld [vmem:[#allocation8_spill] sm:$0xff] }
 0x5d8   :  { %v6172_v54 = vadd.f32 %v2933_v24, %v2814_v28  ;;  %v2903_v28 = vpop.permute.xlu2 %2902 }
 0x5d9   :  { %v2747_v31 = vpop.f32.mrf.mxu3 }
 0x5da   :  { %v2815_v62 = vadd.f32 %v2747_v31, %v2271_v7  ;;  %v2908_v31 = vpop.permute.xlu0 %2907  ;;  %v3102_v17 = vmin.f32 %v6172_v54, 0.0  ;;  %vm3070_vm6 = vcmp.gt.f32.partialorder %v6172_v54, 0.0 }
 0x5db   :  { %v6207_v14 = vadd.f32 %v2908_v31, %v6102_v23 }
 0x5dc   :  { %v6158_v61 = vadd.f32 %v2938_v1, %v2815_v62  ;;  %v3147_v36 = vmul.f32 1.442695, %v3102_v17 }
 0x5dd   :  { %vm3065_vm0 = vcmp.gt.f32.partialorder %v6207_v14, 0.0 }
 0x5de   :  { %3742 = vmatmul.msk.f32.gmra.mxu3 %vm1326_vm2, %v3710_v30  ;;  %v3103_v1 = vmin.f32 %v6158_v61, 0.0  ;;  %v6403_v30 = vld [vmem:[#allocation3_spill] sm:$0xff]  ;;  %vm3250_vm2 = vcmask 261120   ;;  %vm3071_vm5 = vcmp.gt.f32.partialorder %v6158_v61, 0.0 }
 0x5df   :  { %v1680_v62 = vadd.f32 %v6404_v25, %v6403_v30 }
 0x5e0   :  { %v3149_v16 = vmul.f32 1.442695, %v3103_v1  ;;  %v6186_v1 = vpop.permute.xlu1 %2977 }
 0x5e1   :  { %v2750_v7 = vpop.f32.mrf.mxu3  ;;  %v2267_v24 = vadd.f32 %v6407_v42, %v1680_v62  ;;  %v6200_v62 = vpop.permute.xlu2 %2967  ;;  %v3098_v42 = vmin.f32 %v6197_v8, 0.0 }
 0x5e2   :  { %v2816_v13 = vadd.f32 %v2750_v7, %v2272_v49  ;;  %3909 = vpow2.f32 %v3149_v16  ;;  %v3101_v7 = vmin.f32 %v6179_v50, 0.0 }
 0x5e3   :  { %v3139_v31 = vmul.f32 1.442695, %v3098_v42 }
 0x5e4   :  { %v3040_v48 = vadd.f32 %v2943_v58, %v2816_v13  ;;  %v2811_v58 = vadd.f32 %v2735_v53, %v2267_v24  ;;  %v6191_v13 = vpop.permute.xlu0 %2972 }
 0x5e6   :  { %v3104_v4 = vmin.f32 %v3040_v48, 0.0  ;;  %v6193_v35 = vadd.f32 %v2918_v32, %v2811_v58  ;;  %vm3072_vm4 = vcmp.gt.f32.partialorder %v3040_v48, 0.0  ;;  %v3097_v58 = vmin.f32 %v6207_v14, 0.0 }
 0x5e8   :  { %v3151_v49 = vmul.f32 1.442695, %v3104_v4  ;;  %v3145_v4 = vmul.f32 1.442695, %v3101_v7  ;;  %v3910_v53 = vpop.eup %3909  ;;  %v3099_v9 = vmin.f32 %v6193_v35, 0.0  ;;  %v2898_v17 = vpop.permute.xlu1 %2897  ;;  %vm3067_vm9 = vcmp.gt.f32.partialorder %v6193_v35, 0.0 }
 0x5e9   :  { %v2753_v37 = vpop.f32.mrf.mxu3  ;;  %v3757_v11 = vadd.f32 -1.0, %v3910_v53  ;;  %v2888_v19 = vpop.permute.xlu2 %2887  ;;  %v3137_v53 = vmul.f32 1.442695, %v3097_v58 }
 0x5ea   :  { %3911 = vpow2.f32 %v3151_v49  ;;  %v6189_v3 = vadd.f32 %v2753_v37, %v2273_v47  ;;  %v3141_v24 = vmul.f32 1.442695, %v3099_v9 }
 0x5eb   :  { %3913 = vpow2.f32 %v3147_v36  ;;  %v3231_v47 = vsel %vm3071_vm5, %v6158_v61, %v3757_v11 }
 0x5ec   :  { %3915 = vpow2.f32 %v3145_v4  ;;  %v2893_v0 = vpop.permute.xlu0 %2892 }
 0x5ed   :  { %3917 = vpow2.f32 %v3143_v56 }
 0x5ee   :  { %3919 = vpow2.f32 %v3141_v24 }
 0x5ef   :  { %3921 = vpow2.f32 %v3139_v31 }
 0x5f0   :  { %v3912_v33 = vpop.eup %3911  ;;  %3923 = vpow2.f32 %v3137_v53 }
 0x5f1   :  { %v3758_v30 = vadd.f32 -1.0, %v3912_v33  ;;  %v2756_v25 = vpop.f32.mrf.mxu3  ;;  %v3914_v6 = vpop.eup %3913 }
 0x5f2   :  { %v6203_v32 = vadd.f32 %v2756_v25, %v5929_v12  ;;  %v3756_v12 = vadd.f32 -1.0, %v3914_v6  ;;  %v3916_v49 = vpop.eup %3915 }
 0x5f3   :  { %v3232_v16 = vsel %vm3072_vm4, %v3040_v48, %v3758_v30  ;;  %v6214_v48 = vadd.f32 %v2903_v28, %v6093_v39  ;;  %v3755_v61 = vadd.f32 -1.0, %v3916_v49  ;;  %v3918_v36 = vpop.eup %3917  ;;  %v6224_v39 = vadd.f32 %v2898_v17, %v6085_v41  ;;  %v6226_v28 = vpop.permute.xlu1 %2962 }
 0x5f4   :  { %3775 = vmatpush.xpose.msk.msra.mxu0 %vm3250_vm2, %v3232_v16  ;;  %v3230_v7 = vsel %vm3070_vm6, %v6172_v54, %v3756_v12  ;;  %v3754_v33 = vadd.f32 -1.0, %v3918_v36  ;;  %v3920_v54 = vpop.eup %3919  ;;  %v6231_v9 = vpop.permute.xlu0 %2957  ;;  %v6235_v30 = vadd.f32 %v2893_v0, %v6077_v51  ;;  %v6245_v17 = vadd.f32 %v2888_v19, %v6069_v40 }
 0x5f5   :  { %v3096_v4 = vmin.f32 %v6214_v48, 0.0  ;;  %v3095_v41 = vmin.f32 %v6224_v39, 0.0  ;;  %v3753_v11 = vadd.f32 -1.0, %v3920_v54  ;;  %v3922_v6 = vpop.eup %3921  ;;  %v6247_v51 = vpop.permute.xlu2 %2952  ;;  %vm3064_vm11 = vcmp.gt.f32.partialorder %v6214_v48, 0.0 }
 0x5f6   :  { %v3094_v0 = vmin.f32 %v6235_v30, 0.0  ;;  %v3752_v24 = vadd.f32 -1.0, %v3922_v6  ;;  %v3093_v40 = vmin.f32 %v6245_v17, 0.0  ;;  %vm3063_vm12 = vcmp.gt.f32.partialorder %v6224_v39, 0.0 }
 0x5f7   :  { %v3135_v56 = vmul.f32 1.442695, %v3096_v4  ;;  %v3133_v42 = vmul.f32 1.442695, %v3095_v41  ;;  %vm3062_vm13 = vcmp.gt.f32.partialorder %v6235_v30, 0.0  ;;  %vm3061_vm14 = vcmp.gt.f32.partialorder %v6245_v17, 0.0 }
 0x5f8   :  { %3776 = vmatpush.xpose.msk.msra.mxu0 %vm3250_vm2, %v3231_v47  ;;  %v3924_v47 = vpop.eup %3923  ;;  %v3129_v19 = vmul.f32 1.442695, %v3093_v40 }
 0x5f9   :  { %v2759_v23 = vpop.f32.mrf.mxu3  ;;  %3925 = vpow2.f32 %v3135_v56 }
 0x5fa   :  { %v6218_v37 = vadd.f32 %v2759_v23, %v5932_v44  ;;  %v3229_v44 = vsel %vm3069_vm7, %v6179_v50, %v3755_v61  ;;  %v3228_v50 = vsel %vm3068_vm8, %v6184_v18, %v3754_v33  ;;  %v3131_v23 = vmul.f32 1.442695, %v3094_v0 }
 0x5fb   :  { %v2883_v18 = vpop.permute.xlu1 %2882  ;;  %3927 = vpow2.f32 %v3133_v42 }
 0x5fc   :  { %3777 = vmatpush.xpose.msk.msra.mxu0 %vm3250_vm2, %v3230_v7  ;;  %v6254_v12 = vadd.f32 %v2883_v18, %v6061_v55  ;;  %v2878_v58 = vpop.permute.xlu0 %2877  ;;  %v3751_v7 = vadd.f32 -1.0, %v3924_v47  ;;  %3929 = vpow2.f32 %v3131_v23 }
 0x5fd   :  { %v3027_v55 = vadd.f32 %v2878_v58, %v6053_v60  ;;  %3931 = vpow2.f32 %v3129_v19 }
 0x5fe   :  { %v3092_v36 = vmin.f32 %v6254_v12, 0.0  ;;  %v3225_v4 = vsel %vm3065_vm0, %v6207_v14, %v3751_v7  ;;  %vm3060_vm15 = vcmp.gt.f32.partialorder %v6254_v12, 0.0 }
 0x5ff   :  { %v3926_v61 = vpop.eup %3925  ;;  %v3091_v33 = vmin.f32 %v3027_v55, 0.0  ;;  %vm3059_vm1 = vcmp.gt.f32.partialorder %v3027_v55, 0.0 }
 0x600   :  { %3778 = vmatpush.xpose.msk.msra.mxu0 %vm3250_vm2, %v3229_v44  ;;  %v2873_v44 = vpop.permute.xlu2 %2872  ;;  %v3127_v41 = vmul.f32 1.442695, %v3092_v36 }
 0x601   :  { %v2762_v25 = vpop.f32.mrf.mxu3  ;;  %v3928_v53 = vpop.eup %3927 }
 0x602   :  { %v6239_v16 = vadd.f32 %v2762_v25, %v5939_v29  ;;  %v3227_v29 = vsel %vm3067_vm9, %v6193_v35, %v3753_v11  ;;  %v3226_v35 = vsel %vm3066_vm10, %v6197_v8, %v3752_v24  ;;  %v3026_v8 = vadd.f32 %v2873_v44, %v6045_v27  ;;  %v3930_v14 = vpop.eup %3929 }
 0x603   :  { %v3749_v56 = vadd.f32 -1.0, %v3928_v53  ;;  %v3125_v27 = vmul.f32 1.442695, %v3091_v33  ;;  %3933 = vpow2.f32 %v3127_v41  ;;  %v3932_v42 = vpop.eup %3931 }
 0x604   :  { %3779 = vmatpush.xpose.msk.msra.mxu0 %vm3250_vm2, %v3228_v50  ;;  %v2868_v50 = vpop.permute.xlu0 %2867  ;;  %v3090_v6 = vmin.f32 %v3026_v8, 0.0  ;;  %v3747_v18 = vadd.f32 -1.0, %v3932_v42  ;;  %vm3058_vm3 = vcmp.gt.f32.partialorder %v3026_v8, 0.0  ;;  %v6409_v42 = vld [vmem:[#allocation9_spill] sm:$0xff] }
 0x605   :  { %v3025_v11 = vadd.f32 %v2868_v50, %v6037_v5  ;;  %v3223_v0 = vsel %vm3063_vm12, %v6224_v39, %v3749_v56  ;;  %3935 = vpow2.f32 %v3125_v27  ;;  %v6408_v27 = vld [vmem:[#allocation10_spill] sm:$0xff] }
 0x606   :  { %v3123_v24 = vmul.f32 1.442695, %v3090_v6 }
 0x607   :  { %vm3057_vm4 = vcmp.gt.f32.partialorder %v3025_v11, 0.0 }
 0x608   :  { %3780 = vmatpush.xpose.msk.msra.mxu0 %vm3250_vm2, %v3227_v29  ;;  %v3089_v29 = vmin.f32 %v3025_v11, 0.0  ;;  %3937 = vpow2.f32 %v3123_v24 }
 0x609   :  { %v2765_v49 = vpop.f32.mrf.mxu3  ;;  %v3934_v40 = vpop.eup %3933 }
 0x60a   :  { %v6258_v31 = vadd.f32 %v2765_v49, %v5946_v22  ;;  %v3750_v22 = vadd.f32 -1.0, %v3926_v61  ;;  %v3121_v39 = vmul.f32 1.442695, %v3089_v29  ;;  %v3221_v49 = vsel %vm3061_vm14, %v6245_v17, %v3747_v18 }
 0x60b   :  { %v3746_v58 = vadd.f32 -1.0, %v3934_v40  ;;  %v3936_v23 = vpop.eup %3935  ;;  %v6411_v40 = vld [vmem:[#allocation11_spill] sm:$0xff] }
 0x60c   :  { %3781 = vmatpush.xpose.msk.msra.mxu0 %vm3250_vm2, %v3226_v35  ;;  %v3224_v25 = vsel %vm3064_vm11, %v6214_v48, %v3750_v22  ;;  %3939 = vpow2.f32 %v3121_v39  ;;  %v3745_v7 = vadd.f32 -1.0, %v3936_v23  ;;  %v1743_v39 = vadd.f32 %v6029_v2, %v6411_v40 }
 0x60e   :  { %v3938_v61 = vpop.eup %3937  ;;  %v3219_v36 = vsel %vm3059_vm1, %v3027_v55, %v3745_v7 }
 0x60f   :  { %v3744_v17 = vadd.f32 -1.0, %v3938_v61 }
 0x610   :  { %3782 = vmatpush.xpose.msk.msra.mxu0 %vm3250_vm2, %v3225_v4 }
 0x611   :  { %v2768_v54 = vpop.f32.mrf.mxu3  ;;  %v3218_v53 = vsel %vm3058_vm3, %v3026_v8, %v3744_v17  ;;  %v1740_v8 = vadd.f32 %v6023_v63, %v6408_v27 }
 0x612   :  { %v6270_v60 = vadd.f32 %v2768_v54, %v5953_v10  ;;  %v3748_v10 = vadd.f32 -1.0, %v3930_v14  ;;  %v3940_v19 = vpop.eup %3939 }
 0x613   :  { %v3743_v44 = vadd.f32 -1.0, %v3940_v19  ;;  %v6413_v19 = vld [vmem:[#allocation5_spill] sm:$0xff] }
 0x614   :  { %3783 = vmatpush.xpose.msk.msra.mxu0 %vm3250_vm2, %v3224_v25  ;;  %v3222_v5 = vsel %vm3062_vm13, %v6235_v30, %v3748_v10  ;;  %v3220_v30 = vsel %vm3060_vm15, %v6254_v12, %v3746_v58 }
 0x615   :  { %v3217_v12 = vsel %vm3057_vm4, %v3025_v11, %v3743_v44  ;;  %v1737_v11 = vadd.f32 %v6016_v34, %v6409_v42 }
 0x618   :  { %3784 = vmatpush.xpose.msk.msra.mxu0 %vm3250_vm2, %v3223_v0 }
 0x619   :  { %v2771_v48 = vpop.f32.mrf.mxu3 }
 0x61a   :  { %v6280_v47 = vadd.f32 %v2771_v48, %v5960_v46 }
 0x61c   :  { %3785 = vmatpush.xpose.msk.msra.mxu0 %vm3250_vm2, %v3222_v5  ;;  %v6410_v5 = vld [vmem:[#allocation7_spill] sm:$0xff] }
 0x61d   :  { %v1734_v18 = vadd.f32 %v6007_v21, %v6410_v5  ;;  %v1728_v21 = vadd.f32 %v5995_v45, %v6413_v19 }
 0x620   :  { %3786 = vmatpush.xpose.msk.msra.mxu0 %vm3250_vm2, %v3221_v49 }
 0x621   :  { %v2774_v46 = vpop.f32.mrf.mxu3 }
 0x622   :  { %v6289_v35 = vadd.f32 %v2774_v46, %v5967_v52  ;;  %v2239_v52 = vpop.f32.mrf.mxu1 }
 0x624   :  { %3787 = vmatpush.xpose.msk.msra.mxu0 %vm3250_vm2, %v3220_v30  ;;  %v6412_v30 = vld [vmem:[#allocation6_spill] sm:$0xff] }
 0x625   :  { %v1731_v7 = vadd.f32 %v6001_v59, %v6412_v30  ;;  %v6414_v59 = vld [vmem:[#allocation15_spill] sm:$0xff] }
 0x628   :  { %3788 = vmatpush.xpose.msk.msra.mxu0 %vm3250_vm2, %v3219_v36 }
 0x629   :  { %v2777_v4 = vpop.f32.mrf.mxu3 }
 0x62a   :  { %v6296_v22 = vadd.f32 %v2777_v4, %v5974_v38  ;;  %v2242_v54 = vpop.f32.mrf.mxu1 }
 0x62b   :  { %v2284_v17 = vadd.f32 %v2242_v54, %v1731_v7  ;;  %v6415_v54 = vld [vmem:[#allocation16_spill] sm:$0xff] }
 0x62c   :  { %3789 = vmatpush.xpose.msk.msra.mxu0 %vm3250_vm2, %v3218_v53 }
 0x630   :  { %3790 = vmatpush.xpose.msk.msra.mxu0 %vm3250_vm2, %v3217_v12 }
 0x631   :  { %v2780_v33 = vpop.f32.mrf.mxu3 }
 0x632   :  { %v2826_v55 = vadd.f32 %v2780_v33, %v5981_v57  ;;  %v2245_v25 = vpop.f32.mrf.mxu1  ;;  %v2283_v33 = vadd.f32 %v2239_v52, %v1728_v21  ;;  %v3045_v21 = vadd.f32 %v6200_v62, %v6258_v31  ;;  %v3043_v31 = vadd.f32 %v6231_v9, %v6218_v37 }
 0x633   :  { %v2285_v58 = vadd.f32 %v2245_v25, %v1734_v18 }
 0x634   :  { %vm3077_vm15 = vcmp.gt.f32.partialorder %v3045_v21, 0.0  ;;  %vm3075_vm3 = vcmp.gt.f32.partialorder %v3043_v31, 0.0 }
 0x639   :  { %v2783_v41 = vpop.f32.mrf.mxu3 }
 0x63a   :  { %v2248_v14 = vpop.f32.mrf.mxu1 }
 0x63b   :  { %v2286_v48 = vadd.f32 %v2248_v14, %v1737_v11  ;;  %v2827_v14 = vadd.f32 %v2783_v41, %v2283_v33 }
 0x641   :  { %v2786_v56 = vpop.f32.mrf.mxu3 }
 0x642   :  { %v2251_v6 = vpop.f32.mrf.mxu1  ;;  %v2828_v2 = vadd.f32 %v2786_v56, %v2284_v17 }
 0x643   :  { %v2287_v0 = vadd.f32 %v2251_v6, %v1740_v8  ;;  %v6416_v8 = vld [vmem:[#allocation17_spill] sm:$0xff] }
 0x649   :  { %v2789_v38 = vpop.f32.mrf.mxu3 }
 0x64a   :  { %v2254_v24 = vpop.f32.mrf.mxu1  ;;  %v2829_v34 = vadd.f32 %v2789_v38, %v2285_v58  ;;  %v3052_v38 = vadd.f32 %v6414_v59, %v2828_v2 }
 0x64b   :  { %v2288_v23 = vadd.f32 %v2254_v24, %v1743_v39  ;;  %v6418_v39 = vld [vmem:[#allocation19_spill] sm:$0xff] }
 0x64c   :  { %v3053_v53 = vadd.f32 %v6127_v20, %v2829_v34  ;;  %v3116_v6 = vmin.f32 %v3052_v38, 0.0  ;;  %v3050_v20 = vadd.f32 %v6416_v8, %v2826_v55  ;;  %vm3084_vm9 = vcmp.gt.f32.partialorder %v3052_v38, 0.0 }
 0x64e   :  { %v3175_v52 = vmul.f32 1.442695, %v3116_v6  ;;  %v3114_v24 = vmin.f32 %v3050_v20, 0.0  ;;  %vm3085_vm8 = vcmp.gt.f32.partialorder %v3053_v53, 0.0  ;;  %vm3082_vm0 = vcmp.gt.f32.partialorder %v3050_v20, 0.0 }
 0x651   :  { %v2792_v50 = vpop.f32.mrf.mxu3 }
 0x652   :  { %v2830_v49 = vadd.f32 %v2792_v50, %v2286_v48 }
 0x654   :  { %v3054_v61 = vadd.f32 %v6120_v26, %v2830_v49  ;;  %v3117_v26 = vmin.f32 %v3053_v53, 0.0  ;;  %v6326_v49 = vadd.f32 %v6418_v39, %v6289_v35 }
 0x656   :  { %v3118_v44 = vmin.f32 %v3054_v61, 0.0  ;;  %v3177_v27 = vmul.f32 1.442695, %v3117_v26  ;;  %vm3086_vm7 = vcmp.gt.f32.partialorder %v3054_v61, 0.0  ;;  %v3112_v30 = vmin.f32 %v6326_v49, 0.0 }
 0x657   :  { %vm3080_vm12 = vcmp.gt.f32.partialorder %v6326_v49, 0.0 }
 0x658   :  { %v3179_v50 = vmul.f32 1.442695, %v3118_v44  ;;  %v3044_v44 = vadd.f32 %v6226_v28, %v6239_v16  ;;  %v3249_v28 = vld [vmem:[%s6383_s7] sm:$0xf]  ;;  %v3042_v16 = vadd.f32 %v6247_v51, %v6203_v32 }
 0x659   :  { %v2795_v10 = vpop.f32.mrf.mxu3  ;;  %3791 = vmatmul.msk.f32.vlgmr.msra.gmra.mxu0 %vm3250_vm2, %v3249_v28 }
 0x65a   :  { %v2831_v29 = vadd.f32 %v2795_v10, %v2287_v0  ;;  %v3108_v59 = vmin.f32 %v3044_v44, 0.0  ;;  %v3106_v8 = vmin.f32 %v3042_v16, 0.0  ;;  %vm3076_vm1 = vcmp.gt.f32.partialorder %v3044_v44, 0.0 }
 0x65b   :  { %vm3074_vm4 = vcmp.gt.f32.partialorder %v3042_v16, 0.0 }
 0x65c   :  { %v3055_v57 = vadd.f32 %v6112_v43, %v2831_v29  ;;  %v6417_v29 = vld [vmem:[#allocation18_spill] sm:$0xff]  ;;  %v3159_v37 = vmul.f32 1.442695, %v3108_v59 }
 0x65d   :  { %v3049_v48 = vadd.f32 %v6417_v29, %v6296_v22 }
 0x65e   :  { %v3119_v63 = vmin.f32 %v3055_v57, 0.0  ;;  %vm3087_vm6 = vcmp.gt.f32.partialorder %v3055_v57, 0.0 }
 0x65f   :  { %v3113_v58 = vmin.f32 %v3049_v48, 0.0  ;;  %vm3081_vm11 = vcmp.gt.f32.partialorder %v3049_v48, 0.0 }
 0x660   :  { %v3181_v4 = vmul.f32 1.442695, %v3119_v63 }
 0x661   :  { %v2798_v46 = vpop.f32.mrf.mxu3  ;;  %v3169_v7 = vmul.f32 1.442695, %v3113_v58 }
 0x662   :  { %v2832_v36 = vadd.f32 %v2798_v46, %v2288_v23  ;;  %3941 = vpow2.f32 %v3181_v4  ;;  %v3171_v23 = vmul.f32 1.442695, %v3114_v24 }
 0x664   :  { %v3056_v43 = vadd.f32 %v6107_v15, %v2832_v36  ;;  %v3051_v15 = vadd.f32 %v6415_v54, %v2827_v14 }
 0x666   :  { %v3120_v12 = vmin.f32 %v3056_v43, 0.0  ;;  %v3115_v10 = vmin.f32 %v3051_v15, 0.0  ;;  %vm3088_vm5 = vcmp.gt.f32.partialorder %v3056_v43, 0.0  ;;  %vm3083_vm10 = vcmp.gt.f32.partialorder %v3051_v15, 0.0 }
 0x668   :  { %v3183_v25 = vmul.f32 1.442695, %v3120_v12  ;;  %v3942_v45 = vpop.eup %3941  ;;  %v3173_v5 = vmul.f32 1.442695, %v3115_v10  ;;  %v3109_v12 = vmin.f32 %v3045_v21, 0.0 }
 0x669   :  { %v3773_v42 = vadd.f32 -1.0, %v3942_v45  ;;  %v2948_v45 = vpop.permute.xlu1 %2947 }
 0x66a   :  { %3943 = vpow2.f32 %v3183_v25 }
 0x66b   :  { %3945 = vpow2.f32 %v3179_v50  ;;  %v3247_v18 = vsel %vm3087_vm6, %v3055_v57, %v3773_v42  ;;  %v6331_v57 = vadd.f32 %v6186_v1, %v6280_v47  ;;  %vm3393_vm6 = vcmask 1043456  }
 0x66c   :  { %3947 = vpow2.f32 %v3177_v27 }
 0x66d   :  { %3949 = vpow2.f32 %v3175_v52  ;;  %v3111_v17 = vmin.f32 %v6331_v57, 0.0  ;;  %vm3079_vm13 = vcmp.gt.f32.partialorder %v6331_v57, 0.0  ;;  %v3155_v52 = vmul.f32 1.442695, %v3106_v8 }
 0x66e   :  { %3951 = vpow2.f32 %v3173_v5 }
 0x66f   :  { %3953 = vpow2.f32 %v3171_v23  ;;  %v3165_v2 = vmul.f32 1.442695, %v3111_v17 }
 0x670   :  { %v3944_v56 = vpop.eup %3943  ;;  %3955 = vpow2.f32 %v3169_v7 }
 0x671   :  { %v3774_v0 = vadd.f32 -1.0, %v3944_v56  ;;  %v3946_v11 = vpop.eup %3945  ;;  %v3041_v56 = vadd.f32 %v2948_v45, %v6189_v3 }
 0x672   :  { %v3772_v40 = vadd.f32 -1.0, %v3946_v11  ;;  %v3948_v55 = vpop.eup %3947 }
 0x673   :  { %v3248_v41 = vsel %vm3088_vm5, %v3056_v43, %v3774_v0  ;;  %v3771_v46 = vadd.f32 -1.0, %v3948_v55  ;;  %v3950_v22 = vpop.eup %3949  ;;  %v3167_v43 = vmul.f32 1.442695, %v3112_v30  ;;  %v3105_v10 = vmin.f32 %v3041_v56, 0.0 }
 0x674   :  { %3792 = vmatpush.xpose.msk.msrb.mxu2 %vm3250_vm2, %v3248_v41  ;;  %v3246_v63 = vsel %vm3086_vm7, %v3054_v61, %v3772_v40  ;;  %v3770_v34 = vadd.f32 -1.0, %v3950_v22  ;;  %v3952_v36 = vpop.eup %3951  ;;  %v6337_v61 = vadd.f32 %v6191_v13, %v6270_v60  ;;  %vm3073_vm5 = vcmp.gt.f32.partialorder %v3041_v56, 0.0 }
 0x675   :  { %v3245_v35 = vsel %vm3085_vm8, %v3053_v53, %v3771_v46  ;;  %v3769_v47 = vadd.f32 -1.0, %v3952_v36  ;;  %v3954_v19 = vpop.eup %3953  ;;  %3957 = vpow2.f32 %v3167_v43  ;;  %v3153_v11 = vmul.f32 1.442695, %v3105_v10 }
 0x676   :  { %v3244_v1 = vsel %vm3084_vm9, %v3052_v38, %v3770_v34  ;;  %v3110_v4 = vmin.f32 %v6337_v61, 0.0  ;;  %v3768_v60 = vadd.f32 -1.0, %v3954_v19  ;;  %v3956_v53 = vpop.eup %3955  ;;  %3959 = vpow2.f32 %v3165_v2 }
 0x677   :  { %v3243_v13 = vsel %vm3083_vm10, %v3051_v15, %v3769_v47  ;;  %v3767_v14 = vadd.f32 -1.0, %v3956_v53  ;;  %v3161_v38 = vmul.f32 1.442695, %v3109_v12  ;;  %v3107_v15 = vmin.f32 %v3043_v31, 0.0 }
 0x678   :  { %3793 = vmatpush.xpose.msk.msrb.mxu2 %vm3250_vm2, %v3247_v18  ;;  %v3163_v33 = vmul.f32 1.442695, %v3110_v4  ;;  %v3242_v25 = vsel %vm3082_vm0, %v3050_v20, %v3768_v60  ;;  %vm3078_vm14 = vcmp.gt.f32.partialorder %v6337_v61, 0.0 }
 0x679   :  { %v3241_v26 = vsel %vm3081_vm11, %v3049_v48, %v3767_v14  ;;  %v3157_v20 = vmul.f32 1.442695, %v3107_v15 }
 0x67a   :  { %3961 = vpow2.f32 %v3163_v33 }
 0x67b   :  { %v3958_v62 = vpop.eup %3957  ;;  %3963 = vpow2.f32 %v3161_v38 }
 0x67c   :  { %3794 = vmatpush.xpose.msk.msrb.mxu2 %vm3250_vm2, %v3246_v63  ;;  %v3766_v50 = vadd.f32 -1.0, %v3958_v62  ;;  %v3960_v54 = vpop.eup %3959  ;;  %3965 = vpow2.f32 %v3159_v37 }
 0x67d   :  { %v3765_v6 = vadd.f32 -1.0, %v3960_v54  ;;  %3967 = vpow2.f32 %v3157_v20 }
 0x67e   :  { %v3240_v9 = vsel %vm3080_vm12, %v6326_v49, %v3766_v50  ;;  %3969 = vpow2.f32 %v3155_v52 }
 0x67f   :  { %v3239_v32 = vsel %vm3079_vm13, %v6331_v57, %v3765_v6  ;;  %3971 = vpow2.f32 %v3153_v11 }
 0x680   :  { %3795 = vmatpush.xpose.msk.msrb.mxu2 %vm3250_vm2, %v3245_v35  ;;  %v3962_v27 = vpop.eup %3961 }
 0x681   :  { %v3764_v51 = vadd.f32 -1.0, %v3962_v27  ;;  %v3964_v0 = vpop.eup %3963 }
 0x682   :  { %v3763_v42 = vadd.f32 -1.0, %v3964_v0  ;;  %v3966_v3 = vpop.eup %3965 }
 0x683   :  { %v3238_v41 = vsel %vm3078_vm14, %v6337_v61, %v3764_v51  ;;  %v3762_v48 = vadd.f32 -1.0, %v3966_v3  ;;  %v3968_v24 = vpop.eup %3967 }
 0x684   :  { %3796 = vmatpush.xpose.msk.msrb.mxu2 %vm3250_vm2, %v3244_v1  ;;  %v3237_v29 = vsel %vm3077_vm15, %v3045_v21, %v3763_v42  ;;  %v3761_v18 = vadd.f32 -1.0, %v3968_v24  ;;  %v3970_v40 = vpop.eup %3969 }
 0x685   :  { %v3236_v5 = vsel %vm3076_vm1, %v3044_v44, %v3762_v48  ;;  %v3760_v39 = vadd.f32 -1.0, %v3970_v40  ;;  %v3972_v49 = vpop.eup %3971 }
 0x686   :  { %v3235_v55 = vsel %vm3075_vm3, %v3043_v31, %v3761_v18  ;;  %v3759_v23 = vadd.f32 -1.0, %v3972_v49 }
 0x687   :  { %v3234_v58 = vsel %vm3074_vm4, %v3042_v16, %v3760_v39 }
 0x688   :  { %3797 = vmatpush.xpose.msk.msrb.mxu2 %vm3250_vm2, %v3243_v13  ;;  %v3233_v63 = vsel %vm3073_vm5, %v3041_v56, %v3759_v23 }
 0x68c   :  { %3798 = vmatpush.xpose.msk.msrb.mxu2 %vm3250_vm2, %v3242_v25 }
 0x690   :  { %3799 = vmatpush.xpose.msk.msrb.mxu2 %vm3250_vm2, %v3241_v26 }
 0x694   :  { %3800 = vmatpush.xpose.msk.msrb.mxu2 %vm3250_vm2, %v3240_v9 }
 0x698   :  { %3801 = vmatpush.xpose.msk.msrb.mxu2 %vm3250_vm2, %v3239_v32 }
 0x69c   :  { %3802 = vmatpush.xpose.msk.msrb.mxu2 %vm3250_vm2, %v3238_v41 }
 0x6a0   :  { %3803 = vmatpush.xpose.msk.msrb.mxu2 %vm3250_vm2, %v3237_v29 }
 0x6a4   :  { %3804 = vmatpush.xpose.msk.msrb.mxu2 %vm3250_vm2, %v3236_v5 }
 0x6a8   :  { %3805 = vmatpush.xpose.msk.msrb.mxu2 %vm3250_vm2, %v3235_v55 }
 0x6ac   :  { %3806 = vmatpush.xpose.msk.msrb.mxu2 %vm3250_vm2, %v3234_v58 }
 0x6b0   :  { %3807 = vmatpush.xpose.msk.msrb.mxu2 %vm3250_vm2, %v3233_v63 }
 0x6b3   :  { %3808 = vmatmul.msk.f32.vlgmr.msrb.gmra.mxu2 %vm3250_vm2, %v3249_v28 }
 0x6d6   :  { %v3367_v22 = vpop.f32.mrf.mxu0 }
 0x736   :  { %v3387_v46 = vpop.f32.mrf.mxu2 }
 0x737   :  { %v3392_v57 = vrot.slane %v3387_v46, 4 }
 0x739   :  { %v3394_v30 = vsel %vm3393_vm6, %v3367_v22, %v3392_v57 }
 0x73a   :  { %3396 = vst [vmem:[%s6384_s8] sm:$0xff] %v3394_v30 }

</bundles_post_ra>
